<compile_context>
chip_gen: v7x
topology: tpu7x:2x2x1
jax: 0.10.0
libtpu: 0.0.40
codegen_flags: <defaults>
</compile_context>

<pallas_src>
import functools

import jax
import jax.numpy as jnp
from jax import lax
from jax.experimental import pallas as pl
from jax.experimental.pallas import tpu as pltpu

IN_DIM = 150      # flattened input features
IN_PAD = 256      # 150 padded to a multiple of 128
HID1 = 1024
HID2 = 1024
H3_DIM = 150
H3_PAD = 256
H4_PAD = 256
SLAB_W = 1024     # width of the packed bias slab
BN_EPS = 1e-5


def _round_up(n, m):
    return ((n + m - 1) // m) * m


# ---------------------------------------------------------------------------
# In-kernel math
# ---------------------------------------------------------------------------
def _bn_normalize(h, row_mask=None, inv_b=None):
    """Training-mode BatchNorm1d *without* affine (affine folded into next Linear).

    Single-pass stats: var = E[h^2] - mean^2 (clamped at 0).  When the batch is
    sublane-padded, `row_mask`/`inv_b` restrict statistics to the true rows."""
    if row_mask is None:
        mean = jnp.mean(h, axis=0, keepdims=True)
        mean_sq = jnp.mean(h * h, axis=0, keepdims=True)
    else:
        hm = h * row_mask
        mean = jnp.sum(hm, axis=0, keepdims=True) * inv_b
        mean_sq = jnp.sum(hm * h, axis=0, keepdims=True) * inv_b
    var = jnp.maximum(mean_sq - mean * mean, 0.0)
    return (h - mean) * lax.rsqrt(var + BN_EPS)


def simclr_kernel(x_ref, w1_ref, w2_ref, w3_ref, w4_ref, w5_ref, b_ref, o_ref,
                  *, valid_rows):
    out_pad = o_ref.shape[1]
    b_pad = x_ref.shape[0]

    # Static (trace-time) choice: only build the masked-BN path when the batch
    # was actually padded; otherwise the mask multiplies are pure VALU waste.
    if valid_rows == b_pad:
        row_mask, inv_b = None, None
    else:
        rows = lax.broadcasted_iota(jnp.int32, (b_pad, 1), 0)
        row_mask = (rows < valid_rows).astype(jnp.float32)
        inv_b = jnp.float32(1.0 / valid_rows)

    def dot(h, w_ref):
        # Cast activations to the weight dtype (bf16) only at the MXU input;
        # accumulate and keep elementwise math in f32.
        return jnp.dot(h.astype(w_ref.dtype), w_ref[...],
                       preferred_element_type=jnp.float32)

    # Linear(150->1024) + ReLU + BN1 (affine folded into W2/b2)
    h = dot(x_ref[...], w1_ref) + b_ref[0:1, :HID1]
    h = _bn_normalize(jnp.maximum(h, 0.0), row_mask, inv_b)

    # Linear(1024->1024) + ReLU + BN2 (affine folded into W3/b3)
    h = dot(h, w2_ref) + b_ref[1:2, :HID2]
    h = _bn_normalize(jnp.maximum(h, 0.0), row_mask, inv_b)

    # Linear(1024->150) + ReLU + BN3 (affine folded into W4/b4); padded lanes stay 0
    h = dot(h, w3_ref) + b_ref[2:3, :H3_PAD]
    h = _bn_normalize(jnp.maximum(h, 0.0), row_mask, inv_b)

    # Linear(150->150) + ReLU
    h = dot(h, w4_ref) + b_ref[3:4, :H4_PAD]
    h = jnp.maximum(h, 0.0)

    # Linear(150->hidden_dim), lane-padded output
    o_ref[...] = dot(h, w5_ref) + b_ref[4:5, :out_pad]


# ---------------------------------------------------------------------------
# Parameter prep: fold BN affine into next Linear, pad, pack biases, cast bf16
# ---------------------------------------------------------------------------
def prepare_params(params, weight_dtype=jnp.bfloat16):
    w1, b1 = params["w1"], params["b1"]          # (150,1024), (1024,)
    w2, b2 = params["w2"], params["b2"]          # (1024,1024), (1024,)
    w3, b3 = params["w3"], params["b3"]          # (1024,150), (150,)
    w4, b4 = params["w4"], params["b4"]          # (150,150), (150,)
    w5, b5 = params["w5"], params["b5"]          # (150,hidden), (hidden,)
    g1, be1 = params["g1"], params["be1"]
    g2, be2 = params["g2"], params["be2"]
    g3, be3 = params["g3"], params["be3"]

    # Fold y = (xhat*g + be) @ W + b  ==>  xhat @ (diag(g) W) + (be @ W + b)
    w2f = g1[:, None] * w2
    b2f = be1 @ w2 + b2
    w3f = g2[:, None] * w3
    b3f = be2 @ w3 + b3
    w4f = g3[:, None] * w4
    b4f = be3 @ w4 + b4

    hidden_dim = w5.shape[1]
    out_pad = max(128, _round_up(hidden_dim, 128))
    assert out_pad <= SLAB_W

    def pad2(w, rows, cols):
        return jnp.pad(w, ((0, rows - w.shape[0]), (0, cols - w.shape[1])))

    def pad1(v):
        return jnp.pad(v, (0, SLAB_W - v.shape[0]))

    w1p = pad2(w1, IN_PAD, HID1)
    w2p = w2f
    w3p = pad2(w3f, HID2, H3_PAD)
    w4p = pad2(w4f, H4_PAD, H4_PAD)
    w5p = pad2(w5, H4_PAD, out_pad)

    # Single (5, 1024) f32 slab with all per-feature bias rows -> one DMA.
    bias = jnp.stack([pad1(b1), pad1(b2f), pad1(b3f), pad1(b4f), pad1(b5)],
                     axis=0).astype(jnp.float32)

    return {
        "w1": w1p.astype(weight_dtype),
        "w2": w2p.astype(weight_dtype),
        "w3": w3p.astype(weight_dtype),
        "w4": w4p.astype(weight_dtype),
        "w5": w5p.astype(weight_dtype),
        "bias": bias,
        "hidden_dim": hidden_dim,
        "out_pad": out_pad,
    }


# ---------------------------------------------------------------------------
# Forward wrapper
# ---------------------------------------------------------------------------
def simclr_forward(x, prepped):
    # nn.Flatten(): collapse everything but the batch dim, then pad:
    #   rows -> multiple of 8 sublanes, lanes -> IN_PAD (multiple of 128).
    B = x.shape[0]
    x2d = x.reshape(B, -1).astype(jnp.float32)
    assert x2d.shape[1] == IN_DIM, \
        f"expected {IN_DIM} flattened features, got {x2d.shape[1]}"
    b_pad = max(8, _round_up(B, 8))
    x_pad = jnp.pad(x2d, ((0, b_pad - B), (0, IN_PAD - IN_DIM)))

    out_pad = prepped["out_pad"]
    args = (x_pad, prepped["w1"], prepped["w2"], prepped["w3"],
            prepped["w4"], prepped["w5"], prepped["bias"])
    vmem = pl.BlockSpec(memory_space=pltpu.MemorySpace.VMEM)
    out = pl.pallas_call(
        functools.partial(simclr_kernel, valid_rows=B),
        out_shape=jax.ShapeDtypeStruct((b_pad, out_pad), jnp.float32),
        in_specs=[vmem] * len(args),
        out_specs=vmem,
    )(*args)
    return out[:B, :prepped["hidden_dim"]]


# ---------------------------------------------------------------------------
# References
# ---------------------------------------------------------------------------
def _bn_train(h, gamma, beta):
    mean = jnp.mean(h, axis=0, keepdims=True)
    var = jnp.mean((h - mean) ** 2, axis=0, keepdims=True)
    return (h - mean) * lax.rsqrt(var + BN_EPS) * gamma + beta


def simclr_forward_ref(x, params):
    """Exact PyTorch-semantics f32 reference (unfolded, unpadded)."""
    B = x.shape[0]
    h = x.reshape(B, -1).astype(jnp.float32)
    h = jnp.maximum(h @ params["w1"] + params["b1"], 0.0)
    h = _bn_train(h, params["g1"], params["be1"])
    h = jnp.maximum(h @ params["w2"] + params["b2"], 0.0)
    h = _bn_train(h, params["g2"], params["be2"])
    h = jnp.maximum(h @ params["w3"] + params["b3"], 0.0)
    h = _bn_train(h, params["g3"], params["be3"])
    h = jnp.maximum(h @ params["w4"] + params["b4"], 0.0)
    return h @ params["w5"] + params["b5"]


def prepared_ref(x, prepped):
    """Pure-JAX mirror of the kernel math on prepared (folded/padded) params,
    operating on the true (unpadded) batch so BN stats are exact."""
    B = x.shape[0]
    h = jnp.pad(x.reshape(B, -1).astype(jnp.float32), ((0, 0), (0, IN_PAD - IN_DIM)))
    b = prepped["bias"]

    def dot(h, w):
        return jnp.dot(h.astype(w.dtype), w, preferred_element_type=jnp.float32)

    h = _bn_normalize(jnp.maximum(dot(h, prepped["w1"]) + b[0:1, :HID1], 0.0))
    h = _bn_normalize(jnp.maximum(dot(h, prepped["w2"]) + b[1:2, :HID2], 0.0))
    h = _bn_normalize(jnp.maximum(dot(h, prepped["w3"]) + b[2:3, :H3_PAD], 0.0))
    h = jnp.maximum(dot(h, prepped["w4"]) + b[3:4, :H4_PAD], 0.0)
    out = dot(h, prepped["w5"]) + b[4:5, :prepped["out_pad"]]
    return out[:, :prepped["hidden_dim"]]


# ---------------------------------------------------------------------------
# Synthetic parameters (PyTorch-like uniform fan-in init; non-trivial BN affine
# so the folding is actually exercised)
# ---------------------------------------------------------------------------
def init_params(key, hidden_dim):
    def linear(k, fan_in, fan_out):
        k_w, k_b = jax.random.split(k)
        bound = 1.0 / (fan_in ** 0.5)
        w = jax.random.uniform(k_w, (fan_in, fan_out), jnp.float32, -bound, bound)
        b = jax.random.uniform(k_b, (fan_out,), jnp.float32, -bound, bound)
        return w, b

    def bn(k, n):
        k_g, k_b = jax.random.split(k)
        g = jax.random.uniform(k_g, (n,), jnp.float32, 0.5, 1.5)
        be = 0.1 * jax.random.normal(k_b, (n,), jnp.float32)
        return g, be

    keys = jax.random.split(key, 8)
    params = {}
    params["w1"], params["b1"] = linear(keys[0], IN_DIM, HID1)
    params["g1"], params["be1"] = bn(keys[1], HID1)
    params["w2"], params["b2"] = linear(keys[2], HID1, HID2)
    params["g2"], params["be2"] = bn(keys[3], HID2)
    params["w3"], params["b3"] = linear(keys[4], HID2, H3_DIM)
    params["g3"], params["be3"] = bn(keys[5], H3_DIM)
    params["w4"], params["b4"] = linear(keys[6], H3_DIM, H3_DIM)
    params["w5"], params["b5"] = linear(keys[7], H3_DIM, hidden_dim)
    return params


if __name__ == "__main__":
    key = jax.random.PRNGKey(0)
    k_x, k_p = jax.random.split(key)

    B = 8              # small batch (>1 required for training-mode BatchNorm)
    hidden_dim = 32    # SimCLR projection dim
    x = jax.random.normal(k_x, (B, IN_DIM), jnp.float32)
    params = init_params(k_p, hidden_dim)

    # bf16 weights for the kernel; f32-prepped copy only for the semantics check.
    prepped_bf16 = prepare_params(params, weight_dtype=jnp.bfloat16)
    prepped_f32 = prepare_params(params, weight_dtype=jnp.float32)

    out = jax.block_until_ready(simclr_forward(x, prepped_bf16))
    assert out.shape == (B, hidden_dim)

    # (1) Pallas kernel matches identical JAX math on the same bf16 params.
    ref_bf16 = jax.block_until_ready(prepared_ref(x, prepped_bf16))
    assert jnp.allclose(out, ref_bf16, atol=2e-3, rtol=2e-3), \
        "kernel mismatch vs prepared-params JAX reference"

    # (2) Folding/padding/bias-packing is semantics-preserving (pure f32 check
    #     against the original PyTorch-style math).
    ref_f32_prepared = prepared_ref(x, prepped_f32)
    ref_f32_pytorch = simclr_forward_ref(x, params)
    assert jnp.allclose(ref_f32_prepared, ref_f32_pytorch, atol=2e-3, rtol=2e-3), \
        "BN-affine folding / padding changed the forward semantics"

    # (3) Odd batch (sublane padding + masked BatchNorm statistics).
    B_odd = 6
    x_odd = jax.random.normal(jax.random.PRNGKey(1), (B_odd, IN_DIM), jnp.float32)
    out_odd = jax.block_until_ready(simclr_forward(x_odd, prepped_bf16))
    ref_odd = prepared_ref(x_odd, prepped_bf16)
    assert out_odd.shape == (B_odd, hidden_dim)
    assert jnp.allclose(out_odd, ref_odd, atol=2e-3, rtol=2e-3), \
        "masked-BN path mismatch for sublane-padded batch"

    print("KERNEL_OK")
</pallas_src>

<mosaic_0001>
module attributes {stable_mosaic.version = 11 : i64} {
  func.func @simclr_kernel(%arg0: memref<8x256xf32, #tpu.memory_space<vmem>>, %arg1: memref<256x1024xbf16, #tpu.memory_space<vmem>>, %arg2: memref<1024x1024xbf16, #tpu.memory_space<vmem>>, %arg3: memref<1024x256xbf16, #tpu.memory_space<vmem>>, %arg4: memref<256x256xbf16, #tpu.memory_space<vmem>>, %arg5: memref<256x128xbf16, #tpu.memory_space<vmem>>, %arg6: memref<5x1024xf32, #tpu.memory_space<vmem>>, %arg7: memref<8x128xf32, #tpu.memory_space<vmem>>) attributes {dimension_semantics = [], scalar_prefetch = 0 : i64, scratch_operands = 0 : i64, tpu.core_type = #tpu.core_type<tc>} {
    %c0 = arith.constant 0 : index
    %c0_0 = arith.constant 0 : index
    %0 = vector.load %arg0[%c0, %c0_0] : memref<8x256xf32, #tpu.memory_space<vmem>>, vector<8x256xf32>
    %1 = arith.truncf %0 : vector<8x256xf32> to vector<8x256xbf16>
    %c0_1 = arith.constant 0 : index
    %c0_2 = arith.constant 0 : index
    %2 = vector.load %arg1[%c0_1, %c0_2] : memref<256x1024xbf16, #tpu.memory_space<vmem>>, vector<256x1024xbf16>
    %cst = arith.constant dense<0.000000e+00> : vector<8x1024xf32>
    %3 = tpu.matmul %1, %2, %cst {dimension_numbers = #tpu.dot_dimension_numbers<[1], [0], [0], [1], [0, 0, 1, 1], [], []>} : vector<8x256xbf16>, vector<256x1024xbf16>, vector<8x1024xf32> -> vector<8x1024xf32>
    %c0_3 = arith.constant 0 : index
    %c0_4 = arith.constant 0 : index
    %4 = vector.load %arg6[%c0_3, %c0_4] : memref<5x1024xf32, #tpu.memory_space<vmem>>, vector<1x1024xf32>
    %5 = vector.broadcast %4 : vector<1x1024xf32> to vector<8x1024xf32>
    %6 = arith.addf %3, %5 : vector<8x1024xf32>
    %cst_5 = arith.constant 0.000000e+00 : f32
    %7 = vector.broadcast %cst_5 : f32 to vector<8x1024xf32>
    %8 = arith.maximumf %6, %7 : vector<8x1024xf32>
    %cst_6 = arith.constant dense<0.000000e+00> : vector<1024xf32>
    %9 = vector.multi_reduction <add>, %8, %cst_6 [0] : vector<8x1024xf32> to vector<1024xf32>
    %10 = vector.shape_cast %9 : vector<1024xf32> to vector<1x1024xf32>
    %cst_7 = arith.constant 8.000000e+00 : f32
    %11 = vector.broadcast %cst_7 : f32 to vector<1x1024xf32>
    %12 = arith.divf %10, %11 : vector<1x1024xf32>
    %13 = arith.mulf %8, %8 : vector<8x1024xf32>
    %cst_8 = arith.constant dense<0.000000e+00> : vector<1024xf32>
    %14 = vector.multi_reduction <add>, %13, %cst_8 [0] : vector<8x1024xf32> to vector<1024xf32>
    %15 = vector.shape_cast %14 : vector<1024xf32> to vector<1x1024xf32>
    %cst_9 = arith.constant 8.000000e+00 : f32
    %16 = vector.broadcast %cst_9 : f32 to vector<1x1024xf32>
    %17 = arith.divf %15, %16 : vector<1x1024xf32>
    %18 = arith.mulf %12, %12 : vector<1x1024xf32>
    %19 = arith.subf %17, %18 : vector<1x1024xf32>
    %cst_10 = arith.constant 0.000000e+00 : f32
    %20 = vector.broadcast %cst_10 : f32 to vector<1x1024xf32>
    %21 = arith.maximumf %19, %20 : vector<1x1024xf32>
    %22 = vector.broadcast %12 : vector<1x1024xf32> to vector<8x1024xf32>
    %23 = arith.subf %8, %22 : vector<8x1024xf32>
    %cst_11 = arith.constant 9.99999974E-6 : f32
    %24 = vector.broadcast %cst_11 : f32 to vector<1x1024xf32>
    %25 = arith.addf %21, %24 : vector<1x1024xf32>
    %26 = math.rsqrt %25 : vector<1x1024xf32>
    %27 = vector.broadcast %26 : vector<1x1024xf32> to vector<8x1024xf32>
    %28 = arith.mulf %23, %27 : vector<8x1024xf32>
    %29 = arith.truncf %28 : vector<8x1024xf32> to vector<8x1024xbf16>
    %c0_12 = arith.constant 0 : index
    %c0_13 = arith.constant 0 : index
    %30 = vector.load %arg2[%c0_12, %c0_13] : memref<1024x1024xbf16, #tpu.memory_space<vmem>>, vector<1024x1024xbf16>
    %cst_14 = arith.constant dense<0.000000e+00> : vector<8x1024xf32>
    %31 = tpu.matmul %29, %30, %cst_14 {dimension_numbers = #tpu.dot_dimension_numbers<[1], [0], [0], [1], [0, 0, 1, 1], [], []>} : vector<8x1024xbf16>, vector<1024x1024xbf16>, vector<8x1024xf32> -> vector<8x1024xf32>
    %c1 = arith.constant 1 : index
    %c0_15 = arith.constant 0 : index
    %32 = vector.load %arg6[%c1, %c0_15] : memref<5x1024xf32, #tpu.memory_space<vmem>>, vector<1x1024xf32>
    %33 = vector.broadcast %32 : vector<1x1024xf32> to vector<8x1024xf32>
    %34 = arith.addf %31, %33 : vector<8x1024xf32>
    %cst_16 = arith.constant 0.000000e+00 : f32
    %35 = vector.broadcast %cst_16 : f32 to vector<8x1024xf32>
    %36 = arith.maximumf %34, %35 : vector<8x1024xf32>
    %cst_17 = arith.constant dense<0.000000e+00> : vector<1024xf32>
    %37 = vector.multi_reduction <add>, %36, %cst_17 [0] : vector<8x1024xf32> to vector<1024xf32>
    %38 = vector.shape_cast %37 : vector<1024xf32> to vector<1x1024xf32>
    %cst_18 = arith.constant 8.000000e+00 : f32
    %39 = vector.broadcast %cst_18 : f32 to vector<1x1024xf32>
    %40 = arith.divf %38, %39 : vector<1x1024xf32>
    %41 = arith.mulf %36, %36 : vector<8x1024xf32>
    %cst_19 = arith.constant dense<0.000000e+00> : vector<1024xf32>
    %42 = vector.multi_reduction <add>, %41, %cst_19 [0] : vector<8x1024xf32> to vector<1024xf32>
    %43 = vector.shape_cast %42 : vector<1024xf32> to vector<1x1024xf32>
    %cst_20 = arith.constant 8.000000e+00 : f32
    %44 = vector.broadcast %cst_20 : f32 to vector<1x1024xf32>
    %45 = arith.divf %43, %44 : vector<1x1024xf32>
    %46 = arith.mulf %40, %40 : vector<1x1024xf32>
    %47 = arith.subf %45, %46 : vector<1x1024xf32>
    %cst_21 = arith.constant 0.000000e+00 : f32
    %48 = vector.broadcast %cst_21 : f32 to vector<1x1024xf32>
    %49 = arith.maximumf %47, %48 : vector<1x1024xf32>
    %50 = vector.broadcast %40 : vector<1x1024xf32> to vector<8x1024xf32>
    %51 = arith.subf %36, %50 : vector<8x1024xf32>
    %cst_22 = arith.constant 9.99999974E-6 : f32
    %52 = vector.broadcast %cst_22 : f32 to vector<1x1024xf32>
    %53 = arith.addf %49, %52 : vector<1x1024xf32>
    %54 = math.rsqrt %53 : vector<1x1024xf32>
    %55 = vector.broadcast %54 : vector<1x1024xf32> to vector<8x1024xf32>
    %56 = arith.mulf %51, %55 : vector<8x1024xf32>
    %57 = arith.truncf %56 : vector<8x1024xf32> to vector<8x1024xbf16>
    %c0_23 = arith.constant 0 : index
    %c0_24 = arith.constant 0 : index
    %58 = vector.load %arg3[%c0_23, %c0_24] : memref<1024x256xbf16, #tpu.memory_space<vmem>>, vector<1024x256xbf16>
    %cst_25 = arith.constant dense<0.000000e+00> : vector<8x256xf32>
    %59 = tpu.matmul %57, %58, %cst_25 {dimension_numbers = #tpu.dot_dimension_numbers<[1], [0], [0], [1], [0, 0, 1, 1], [], []>} : vector<8x1024xbf16>, vector<1024x256xbf16>, vector<8x256xf32> -> vector<8x256xf32>
    %c2 = arith.constant 2 : index
    %c0_26 = arith.constant 0 : index
    %60 = vector.load %arg6[%c2, %c0_26] : memref<5x1024xf32, #tpu.memory_space<vmem>>, vector<1x256xf32>
    %61 = vector.broadcast %60 : vector<1x256xf32> to vector<8x256xf32>
    %62 = arith.addf %59, %61 : vector<8x256xf32>
    %cst_27 = arith.constant 0.000000e+00 : f32
    %63 = vector.broadcast %cst_27 : f32 to vector<8x256xf32>
    %64 = arith.maximumf %62, %63 : vector<8x256xf32>
    %cst_28 = arith.constant dense<0.000000e+00> : vector<256xf32>
    %65 = vector.multi_reduction <add>, %64, %cst_28 [0] : vector<8x256xf32> to vector<256xf32>
    %66 = vector.shape_cast %65 : vector<256xf32> to vector<1x256xf32>
    %cst_29 = arith.constant 8.000000e+00 : f32
    %67 = vector.broadcast %cst_29 : f32 to vector<1x256xf32>
    %68 = arith.divf %66, %67 : vector<1x256xf32>
    %69 = arith.mulf %64, %64 : vector<8x256xf32>
    %cst_30 = arith.constant dense<0.000000e+00> : vector<256xf32>
    %70 = vector.multi_reduction <add>, %69, %cst_30 [0] : vector<8x256xf32> to vector<256xf32>
    %71 = vector.shape_cast %70 : vector<256xf32> to vector<1x256xf32>
    %cst_31 = arith.constant 8.000000e+00 : f32
    %72 = vector.broadcast %cst_31 : f32 to vector<1x256xf32>
    %73 = arith.divf %71, %72 : vector<1x256xf32>
    %74 = arith.mulf %68, %68 : vector<1x256xf32>
    %75 = arith.subf %73, %74 : vector<1x256xf32>
    %cst_32 = arith.constant 0.000000e+00 : f32
    %76 = vector.broadcast %cst_32 : f32 to vector<1x256xf32>
    %77 = arith.maximumf %75, %76 : vector<1x256xf32>
    %78 = vector.broadcast %68 : vector<1x256xf32> to vector<8x256xf32>
    %79 = arith.subf %64, %78 : vector<8x256xf32>
    %cst_33 = arith.constant 9.99999974E-6 : f32
    %80 = vector.broadcast %cst_33 : f32 to vector<1x256xf32>
    %81 = arith.addf %77, %80 : vector<1x256xf32>
    %82 = math.rsqrt %81 : vector<1x256xf32>
    %83 = vector.broadcast %82 : vector<1x256xf32> to vector<8x256xf32>
    %84 = arith.mulf %79, %83 : vector<8x256xf32>
    %85 = arith.truncf %84 : vector<8x256xf32> to vector<8x256xbf16>
    %c0_34 = arith.constant 0 : index
    %c0_35 = arith.constant 0 : index
    %86 = vector.load %arg4[%c0_34, %c0_35] : memref<256x256xbf16, #tpu.memory_space<vmem>>, vector<256x256xbf16>
    %cst_36 = arith.constant dense<0.000000e+00> : vector<8x256xf32>
    %87 = tpu.matmul %85, %86, %cst_36 {dimension_numbers = #tpu.dot_dimension_numbers<[1], [0], [0], [1], [0, 0, 1, 1], [], []>} : vector<8x256xbf16>, vector<256x256xbf16>, vector<8x256xf32> -> vector<8x256xf32>
    %c3 = arith.constant 3 : index
    %c0_37 = arith.constant 0 : index
    %88 = vector.load %arg6[%c3, %c0_37] : memref<5x1024xf32, #tpu.memory_space<vmem>>, vector<1x256xf32>
    %89 = vector.broadcast %88 : vector<1x256xf32> to vector<8x256xf32>
    %90 = arith.addf %87, %89 : vector<8x256xf32>
    %cst_38 = arith.constant 0.000000e+00 : f32
    %91 = vector.broadcast %cst_38 : f32 to vector<8x256xf32>
    %92 = arith.maximumf %90, %91 : vector<8x256xf32>
    %93 = arith.truncf %92 : vector<8x256xf32> to vector<8x256xbf16>
    %c0_39 = arith.constant 0 : index
    %c0_40 = arith.constant 0 : index
    %94 = vector.load %arg5[%c0_39, %c0_40] : memref<256x128xbf16, #tpu.memory_space<vmem>>, vector<256x128xbf16>
    %cst_41 = arith.constant dense<0.000000e+00> : vector<8x128xf32>
    %95 = tpu.matmul %93, %94, %cst_41 {dimension_numbers = #tpu.dot_dimension_numbers<[1], [0], [0], [1], [0, 0, 1, 1], [], []>} : vector<8x256xbf16>, vector<256x128xbf16>, vector<8x128xf32> -> vector<8x128xf32>
    %c4 = arith.constant 4 : index
    %c0_42 = arith.constant 0 : index
    %96 = vector.load %arg6[%c4, %c0_42] : memref<5x1024xf32, #tpu.memory_space<vmem>>, vector<1x128xf32>
    %97 = vector.broadcast %96 : vector<1x128xf32> to vector<8x128xf32>
    %98 = arith.addf %95, %97 : vector<8x128xf32>
    %c0_43 = arith.constant 0 : index
    %c0_44 = arith.constant 0 : index
    %99 = vector.load %arg7[%c0_43, %c0_44] : memref<8x128xf32, #tpu.memory_space<vmem>>, vector<8x128xf32>
    tpu.vector_store %arg7[%c0_43, %c0_44], %98 {strides = array<i32>} : memref<8x128xf32, #tpu.memory_space<vmem>>, vector<8x128xf32>,
    return
  }
}

</mosaic_0001>

<bundles_post_ra>
// kernel: tpu_custom_call.1
= control target key start
LH: loop header
LB: loop body
LE: loop exit
PB: predicated region body
PF: predicated region fallthrough
CT: control target
= control target key end

     0   :  { %12 = vsyncpa [#allocation3], 0  ;;  %s8549_s0 = inlined_call_operand.hbm [shape: f32[8,256], index: 0, kind: input, shape index: {}]   ;;  %s8550_s1 = inlined_call_operand.hbm [shape: bf16[256,1024], index: 1, kind: input, shape index: {}]   ;;  %s8551_s2 = inlined_call_operand.hbm [shape: bf16[1024,1024], index: 2, kind: input, shape index: {}]   ;;  %s8552_s3 = inlined_call_operand.hbm [shape: bf16[1024,256], index: 3, kind: input, shape index: {}]   ;;  %s8553_s4 = inlined_call_operand.hbm [shape: bf16[256,256], index: 4, kind: input, shape index: {}]   ;;  %s8554_s5 = inlined_call_operand.hbm [shape: bf16[256,128], index: 5, kind: input, shape index: {}]   ;;  %s8555_s6 = inlined_call_operand.hbm [shape: f32[5,1024], index: 6, kind: input, shape index: {}]   ;;  %s8556_s7 = inlined_call_operand.hbm [shape: f32[8,128], index: 7, kind: output, shape index: {}]  }
   0x1   :  { %13 = vsyncpa [#allocation6], 0 }
   0x2   :  { %14 = vsyncpa [#allocation9], 0 }
   0x3   :  { %15 = vsyncpa [#allocation12], 0 }
   0x4   :  { %16 = vsyncpa [#allocation4], 0  ;;  %s8088_s24 = smov [#allocation5]   ;;  %s7902_s28 = scalar_lea.hbm %s8550_s1, 16384 }
   0x5   :  { %s32_s25 = sshll.u32 %s8088_s24, 4  ;;  %p7903_p0 = scmp.ne.s32.totalorder %s8550_s1, %s7902_s28  ;;  %s33_s25 = int_to_ptr.vmem [resolvable:$true] %s32_s25 }
   0x6   :  { %p7906_p1 = scmp.lt.u32.totalorder %s7902_s28, %s8550_s1 }
   0x8   :  { %p7908_p2 = pnand %p7906_p1, %p7903_p0 }
   0xa   :  { %7911 = shalt.err (!%p7908_p2)
}
   0xb   :  { %s7912_s10 = scalar_lea.vmem %s33_s25, 16384  ;;  %p7917_p4 = scmp.lt.s32.totalorder %s33_s25, %s33_s25 }
   0xc   :  { %p7913_p3 = scmp.ne.s32.totalorder %s33_s25, %s7912_s10  ;;  %p7918_p5 = scmp.lt.s32.totalorder %s7912_s10, %s7912_s10 }
   0xe   :  { %p7919_p6 = por %p7918_p5, %p7917_p4 }
  0x10   :  { %p7920_p7 = pnand %p7919_p6, %p7913_p3 }
  0x12   :  { %7923 = shalt.err (!%p7920_p7)
}
  0x13   :  { %s8089_s11 = smov 512   ;;  %s8090_s12 = smov 32  }
  0x14   :  { %38 = dma.hbm_to_vmem [thread:$0]  %s8550_s1, 16384, %s33_s25, [#allocation6], %s8089_s11, %s8089_s11, %s8090_s12  }
  0x15   :  { %s8091_s15 = smov [#allocation8]   ;;  %s7924_s19 = scalar_lea.hbm %s8552_s3, 16384 }
  0x16   :  { %s56_s16 = sshll.u32 %s8091_s15, 4  ;;  %p7925_p8 = scmp.ne.s32.totalorder %s8552_s3, %s7924_s19  ;;  %s57_s16 = int_to_ptr.vmem [resolvable:$true] %s56_s16 }
  0x17   :  { %p7928_p9 = scmp.lt.u32.totalorder %s7924_s19, %s8552_s3 }
  0x19   :  { %p7930_p10 = pnand %p7928_p9, %p7925_p8 }
  0x1b   :  { %7933 = shalt.err (!%p7930_p10)
}
  0x1c   :  { %s7934_s24 = scalar_lea.vmem %s57_s16, 16384  ;;  %p7939_p12 = scmp.lt.s32.totalorder %s57_s16, %s57_s16 }
  0x1d   :  { %p7935_p11 = scmp.ne.s32.totalorder %s57_s16, %s7934_s24  ;;  %p7940_p13 = scmp.lt.s32.totalorder %s7934_s24, %s7934_s24 }
  0x1f   :  { %p7941_p0 = por %p7940_p13, %p7939_p12 }
  0x21   :  { %p7942_p1 = pnand %p7941_p0, %p7935_p11 }
  0x23   :  { %7945 = shalt.err (!%p7942_p1)
}
  0x24   :  { %s8092_s1 = smov 128   ;;  %s8093_s25 = smov 8  }
  0x25   :  { %62 = dma.hbm_to_vmem [thread:$0]  %s8552_s3, 16384, %s57_s16, [#allocation9], %s8092_s1, %s8092_s1, %s8093_s25  }
  0x26   :  { %s8094_s28 = smov [#allocation11]   ;;  %s7946_s9 = scalar_lea.hbm %s8554_s5, 2048 }
  0x27   :  { %s80_s29 = sshll.u32 %s8094_s28, 4  ;;  %p7947_p2 = scmp.ne.s32.totalorder %s8554_s5, %s7946_s9  ;;  %s81_s29 = int_to_ptr.vmem [resolvable:$true] %s80_s29 }
  0x28   :  { %p7950_p3 = scmp.lt.u32.totalorder %s7946_s9, %s8554_s5 }
  0x2a   :  { %p7952_p4 = pnand %p7950_p3, %p7947_p2 }
  0x2c   :  { %7955 = shalt.err (!%p7952_p4)
}
  0x2d   :  { %s7956_s17 = scalar_lea.vmem %s81_s29, 2048  ;;  %p7961_p6 = scmp.lt.s32.totalorder %s81_s29, %s81_s29 }
  0x2e   :  { %p7957_p5 = scmp.ne.s32.totalorder %s81_s29, %s7956_s17  ;;  %p7962_p7 = scmp.lt.s32.totalorder %s7956_s17, %s7956_s17 }
  0x30   :  { %p7963_p8 = por %p7962_p7, %p7961_p6 }
  0x32   :  { %p7964_p9 = pnand %p7963_p8, %p7957_p5 }
  0x34   :  { %7967 = shalt.err (!%p7964_p9)
}
  0x35   :  { %s8095_s3 = smov 64   ;;  %s8096_s16 = smov 4  }
  0x36   :  { %86 = dma.hbm_to_vmem [thread:$0]  %s8554_s5, 2048, %s81_s29, [#allocation12], %s8095_s3, %s8095_s3, %s8096_s16  }
  0x37   :  { %s8097_s20 = smov [#allocation2]   ;;  %s8098_s22 = smov [#allocation7]  }
  0x38   :  { %s23_s21 = sshll.u32 %s8097_s20, 4  ;;  %s44_s23 = sshll.u32 %s8098_s22, 4  ;;  %s24_s21 = int_to_ptr.vmem [resolvable:$true] %s23_s21  ;;  %s45_s23 = int_to_ptr.vmem [resolvable:$true] %s44_s23 }
  0x39   :  { %s7968_s27 = scalar_lea.hbm %s8549_s0, 256 }
  0x3a   :  { %p7969_p10 = scmp.ne.s32.totalorder %s8549_s0, %s7968_s27  ;;  %p7972_p11 = scmp.lt.u32.totalorder %s7968_s27, %s8549_s0 }
  0x3c   :  { %p7974_p12 = pnand %p7972_p11, %p7969_p10 }
  0x3e   :  { %7977 = shalt.err (!%p7974_p12)
}
  0x3f   :  { %s7978_s5 = scalar_lea.vmem %s24_s21, 256  ;;  %p7983_p0 = scmp.lt.s32.totalorder %s24_s21, %s24_s21 }
  0x40   :  { %p7979_p13 = scmp.ne.s32.totalorder %s24_s21, %s7978_s5  ;;  %p7984_p1 = scmp.lt.s32.totalorder %s7978_s5, %s7978_s5 }
  0x42   :  { %p7985_p2 = por %p7984_p1, %p7983_p0 }
  0x44   :  { %p7986_p3 = pnand %p7985_p2, %p7979_p13 }
  0x46   :  { %7989 = shalt.err (!%p7986_p3)
}
  0x47   :  { %26 = dma.hbm_to_vmem [thread:$0]  %s8549_s0, 256, %s24_s21, [#allocation3]  }
  0x48   :  { %s7990_s15 = scalar_lea.hbm %s8551_s2, 65536 }
  0x49   :  { %p7991_p4 = scmp.ne.s32.totalorder %s8551_s2, %s7990_s15  ;;  %p7994_p5 = scmp.lt.u32.totalorder %s7990_s15, %s8551_s2 }
  0x4b   :  { %p7996_p6 = pnand %p7994_p5, %p7991_p4 }
  0x4d   :  { %7999 = shalt.err (!%p7996_p6)
}
  0x4e   :  { %s8000_s19 = scalar_lea.vmem %s45_s23, 65536  ;;  %p8005_p8 = scmp.lt.s32.totalorder %s45_s23, %s45_s23 }
  0x4f   :  { %p8001_p7 = scmp.ne.s32.totalorder %s45_s23, %s8000_s19  ;;  %p8006_p9 = scmp.lt.s32.totalorder %s8000_s19, %s8000_s19 }
  0x51   :  { %p8007_p10 = por %p8006_p9, %p8005_p8 }
  0x53   :  { %p8008_p11 = pnand %p8007_p10, %p8001_p7 }
  0x55   :  { %8011 = shalt.err (!%p8008_p11)
}
  0x56   :  { %50 = dma.hbm_to_vmem [thread:$0]  %s8551_s2, 65536, %s45_s23, [#allocation6], %s8089_s11, %s8089_s11, %s8090_s12  }
  0x57   :  { %s8099_s21 = smov [#allocation10]   ;;  %s8100_s24 = smov [#allocation13]  }
  0x58   :  { %s68_s22 = sshll.u32 %s8099_s21, 4  ;;  %s93_s26 = sshll.u32 %s8100_s24, 4  ;;  %s69_s22 = int_to_ptr.vmem [resolvable:$true] %s68_s22  ;;  %s94_s26 = int_to_ptr.vmem [resolvable:$true] %s93_s26 }
  0x59   :  { %s8012_s30 = scalar_lea.hbm %s8553_s4, 4096 }
  0x5a   :  { %p8013_p12 = scmp.ne.s32.totalorder %s8553_s4, %s8012_s30  ;;  %p8016_p13 = scmp.lt.u32.totalorder %s8012_s30, %s8553_s4 }
  0x5c   :  { %p8018_p0 = pnand %p8016_p13, %p8013_p12 }
  0x5e   :  { %8021 = shalt.err (!%p8018_p0)
}
  0x5f   :  { %s8022_s2 = scalar_lea.vmem %s69_s22, 4096  ;;  %p8027_p2 = scmp.lt.s32.totalorder %s69_s22, %s69_s22 }
  0x60   :  { %p8023_p1 = scmp.ne.s32.totalorder %s69_s22, %s8022_s2  ;;  %p8028_p3 = scmp.lt.s32.totalorder %s8022_s2, %s8022_s2 }
  0x62   :  { %p8029_p4 = por %p8028_p3, %p8027_p2 }
  0x64   :  { %p8030_p5 = pnand %p8029_p4, %p8023_p1 }
  0x66   :  { %8033 = shalt.err (!%p8030_p5)
}
  0x67   :  { %74 = dma.hbm_to_vmem [thread:$0]  %s8553_s4, 4096, %s69_s22, [#allocation9], %s8092_s1, %s8092_s1, %s8093_s25  }
  0x68   :  { %s8034_s13 = scalar_lea.hbm %s8555_s6, 1024 }
  0x69   :  { %p8035_p6 = scmp.ne.s32.totalorder %s8555_s6, %s8034_s13  ;;  %p8038_p7 = scmp.lt.u32.totalorder %s8034_s13, %s8555_s6 }
  0x6b   :  { %p8040_p8 = pnand %p8038_p7, %p8035_p6 }
  0x6d   :  { %8043 = shalt.err (!%p8040_p8)
}
  0x6e   :  { %s8044_s16 = scalar_lea.vmem %s94_s26, 1024  ;;  %p8049_p10 = scmp.lt.s32.totalorder %s94_s26, %s94_s26 }
  0x6f   :  { %p8045_p9 = scmp.ne.s32.totalorder %s94_s26, %s8044_s16  ;;  %p8050_p11 = scmp.lt.s32.totalorder %s8044_s16, %s8044_s16 }
  0x71   :  { %p8051_p12 = por %p8050_p11, %p8049_p10 }
  0x73   :  { %p8052_p13 = pnand %p8051_p12, %p8045_p9 }
  0x75   :  { %8055 = shalt.err (!%p8052_p13)
}
  0x76   :  { %96 = dma.hbm_to_vmem [thread:$0]  %s8555_s6, 1024, %s94_s26, [#allocation12]  }
  0x77   :  { %8078 = dma.done.wait [#allocation3], 256  }
  0x78   :  { %8079 = vsyncadd [#allocation3], 4294967040 }
  0x79   :  { %8080 = dma.done.wait [#allocation6], 81920  }
  0x7a   :  { %8081 = vsyncadd [#allocation6], 4294885376 }
  0x7b   :  { %8082 = dma.done.wait [#allocation9], 20480  }
  0x7c   :  { %8083 = vsyncadd [#allocation9], 4294946816 }
  0x7d   :  { %8084 = dma.done.wait [#allocation12], 3072  }
  0x7e   :  { %8085 = vsyncadd [#allocation12], 4294964224  ;;  %v123_v0 = vld [vmem:[#allocation5] sm:$0xff]  ;;  %v120_v17 = vld [vmem:[#allocation2 + $0x8] sm:$0xff]  ;;  %s8101_s6 = smov [#allocation14]  }
  0x7f   :  { %v127_v1 = vld [vmem:[#allocation5 + $0x20] sm:$0xff]  ;;  %v8238_v18 = vpack.c.bf16 %v120_v17, %v120_v17  ;;  %v125_v25 = vld [vmem:[#allocation5 + $0x10] sm:$0xff]  ;;  %s6676_s25 = sshll.u32 %s8101_s6, 4  ;;  %s6677_s25 = int_to_ptr.vmem [resolvable:$true] %s6676_s25 }
  0x80   :  { %v131_v2 = vld [vmem:[#allocation5 + $0x40] sm:$0xff]  ;;  %v6689_v3 = vcombine.high %v123_v0, %v127_v1  ;;  %v6688_v4 = vcombine.low %v123_v0, %v127_v1  ;;  %v129_v26 = vld [vmem:[#allocation5 + $0x30] sm:$0xff]  ;;  %s8056_s18 = scalar_lea.vmem %s6677_s25, 128  ;;  %p8061_p1 = scmp.lt.s32.totalorder %s6677_s25, %s6677_s25 }
  0x81   :  { %v135_v5 = vld [vmem:[#allocation5 + $0x60] sm:$0xff]  ;;  %967 = vmatprep.mubr.bf16.mxu1 %v8238_v18  ;;  %1049 = vmatprep.mubr.bf16.mxu0 %v8238_v18  ;;  %v6693_v29 = vcombine.high %v125_v25, %v129_v26  ;;  %v6692_v30 = vcombine.low %v125_v25, %v129_v26  ;;  %v133_v31 = vld [vmem:[#allocation5 + $0x50] sm:$0xff]  ;;  %p8057_p0 = scmp.ne.s32.totalorder %s6677_s25, %s8056_s18  ;;  %p8062_p2 = scmp.lt.s32.totalorder %s8056_s18, %s8056_s18 }
  0x82   :  { %v6697_v6 = vcombine.high %v131_v2, %v135_v5  ;;  %v139_v7 = vld [vmem:[#allocation5 + $0x80] sm:$0xff]  ;;  %935 = vmatprep.subr.bf16.mxu1 %v6689_v3  ;;  %v6696_v9 = vcombine.low %v131_v2, %v135_v5  ;;  %v137_v32 = vld [vmem:[#allocation5 + $0x70] sm:$0xff] }
  0x83   :  { %v143_v8 = vld [vmem:[#allocation5 + $0xa0] sm:$0xff]  ;;  %936 = vmatpush1.bf16.msra.mxu1 %v6688_v4  ;;  %1017 = vmatprep.subr.bf16.mxu0 %v6693_v29  ;;  %v6701_v34 = vcombine.high %v133_v31, %v137_v32  ;;  %v141_v35 = vld [vmem:[#allocation5 + $0x90] sm:$0xff]  ;;  %v6700_v38 = vcombine.low %v133_v31, %v137_v32  ;;  %p8063_p3 = por %p8062_p2, %p8061_p1 }
  0x84   :  { %937 = vmatprep.subr.bf16.mxu1 %v6697_v6  ;;  %v6705_v10 = vcombine.high %v139_v7, %v143_v8  ;;  %v147_v11 = vld [vmem:[#allocation5 + $0xc0] sm:$0xff]  ;;  %v6704_v13 = vcombine.low %v139_v7, %v143_v8  ;;  %v145_v36 = vld [vmem:[#allocation5 + $0xb0] sm:$0xff]  ;;  %1018 = vmatpush1.bf16.msra.mxu0 %v6692_v30 }
  0x85   :  { %v151_v12 = vld [vmem:[#allocation5 + $0xe0] sm:$0xff]  ;;  %1019 = vmatprep.subr.bf16.mxu0 %v6701_v34  ;;  %v6709_v41 = vcombine.high %v141_v35, %v145_v36  ;;  %v149_v42 = vld [vmem:[#allocation5 + $0xd0] sm:$0xff]  ;;  %v6708_v46 = vcombine.low %v141_v35, %v145_v36  ;;  %p8064_p4 = pnand %p8063_p3, %p8057_p0 }
  0x86   :  { %v6713_v14 = vcombine.high %v147_v11, %v151_v12  ;;  %v155_v15 = vld [vmem:[#allocation5 + $0x100] sm:$0xff]  ;;  %v6712_v19 = vcombine.low %v147_v11, %v151_v12  ;;  %v153_v43 = vld [vmem:[#allocation5 + $0xf0] sm:$0xff] }
  0x87   :  { %938 = vmatpush1.bf16.msra.mxu1 %v6696_v9  ;;  %v159_v16 = vld [vmem:[#allocation5 + $0x120] sm:$0xff]  ;;  %v6717_v49 = vcombine.high %v149_v42, %v153_v43  ;;  %v157_v50 = vld [vmem:[#allocation5 + $0x110] sm:$0xff]  ;;  %v6716_v54 = vcombine.low %v149_v42, %v153_v43 }
  0x88   :  { %939 = vmatprep.subr.bf16.mxu1 %v6705_v10  ;;  %v6721_v20 = vcombine.high %v155_v15, %v159_v16  ;;  %v163_v21 = vld [vmem:[#allocation5 + $0x140] sm:$0xff]  ;;  %v6720_v23 = vcombine.low %v155_v15, %v159_v16  ;;  %1020 = vmatpush1.bf16.msra.mxu0 %v6700_v38  ;;  %v161_v51 = vld [vmem:[#allocation5 + $0x130] sm:$0xff] }
  0x89   :  { %v167_v22 = vld [vmem:[#allocation5 + $0x160] sm:$0xff]  ;;  %1021 = vmatprep.subr.bf16.mxu0 %v6709_v41  ;;  %v6725_v57 = vcombine.high %v157_v50, %v161_v51  ;;  %v165_v58 = vld [vmem:[#allocation5 + $0x150] sm:$0xff]  ;;  %v6724_v62 = vcombine.low %v157_v50, %v161_v51 }
  0x8a   :  { %v6729_v24 = vcombine.high %v163_v21, %v167_v22  ;;  %v171_v27 = vld [vmem:[#allocation5 + $0x180] sm:$0xff]  ;;  %v6728_v33 = vcombine.low %v163_v21, %v167_v22  ;;  %v169_v59 = vld [vmem:[#allocation5 + $0x170] sm:$0xff] }
  0x8b   :  { %940 = vmatpush1.bf16.msra.mxu1 %v6704_v13  ;;  %v175_v28 = vld [vmem:[#allocation5 + $0x1a0] sm:$0xff]  ;;  %v6733_v1 = vcombine.high %v165_v58, %v169_v59  ;;  %v173_v2 = vld [vmem:[#allocation5 + $0x190] sm:$0xff]  ;;  %v6732_v6 = vcombine.low %v165_v58, %v169_v59 }
  0x8c   :  { %941 = vmatprep.subr.bf16.mxu1 %v6713_v14  ;;  %v6737_v37 = vcombine.high %v171_v27, %v175_v28  ;;  %v179_v39 = vld [vmem:[#allocation5 + $0x1c0] sm:$0xff]  ;;  %v6736_v44 = vcombine.low %v171_v27, %v175_v28  ;;  %1022 = vmatpush1.bf16.msra.mxu0 %v6708_v46  ;;  %v177_v3 = vld [vmem:[#allocation5 + $0x1b0] sm:$0xff]  ;;  %v124_v46 = vld [vmem:[#allocation5 + $0x8] sm:$0xff] }
  0x8d   :  { %v183_v40 = vld [vmem:[#allocation5 + $0x1e0] sm:$0xff]  ;;  %1023 = vmatprep.subr.bf16.mxu0 %v6717_v49  ;;  %v6741_v9 = vcombine.high %v173_v2, %v177_v3  ;;  %v181_v10 = vld [vmem:[#allocation5 + $0x1d0] sm:$0xff]  ;;  %v6740_v16 = vcombine.low %v173_v2, %v177_v3 }
  0x8e   :  { %v6745_v45 = vcombine.high %v179_v39, %v183_v40  ;;  %v187_v47 = vld [vmem:[#allocation5 + $0x200] sm:$0xff]  ;;  %v6744_v52 = vcombine.low %v179_v39, %v183_v40  ;;  %v185_v11 = vld [vmem:[#allocation5 + $0x1f0] sm:$0xff] }
  0x8f   :  { %942 = vmatpush1.bf16.msra.mxu1 %v6712_v19  ;;  %v191_v48 = vld [vmem:[#allocation5 + $0x220] sm:$0xff]  ;;  %v189_v17 = vld [vmem:[#allocation5 + $0x210] sm:$0xff]  ;;  %v6748_v25 = vcombine.low %v181_v10, %v185_v11 }
  0x90   :  { %943 = vmatprep.subr.bf16.mxu1 %v6721_v20  ;;  %v6753_v53 = vcombine.high %v187_v47, %v191_v48  ;;  %v195_v55 = vld [vmem:[#allocation5 + $0x240] sm:$0xff]  ;;  %v6752_v60 = vcombine.low %v187_v47, %v191_v48  ;;  %1024 = vmatpush1.bf16.msra.mxu0 %v6716_v54  ;;  %v193_v19 = vld [vmem:[#allocation5 + $0x230] sm:$0xff]  ;;  %v6749_v20 = vcombine.high %v181_v10, %v185_v11  ;;  %v128_v47 = vld [vmem:[#allocation5 + $0x28] sm:$0xff] }
  0x91   :  { %v199_v56 = vld [vmem:[#allocation5 + $0x260] sm:$0xff]  ;;  %1025 = vmatprep.subr.bf16.mxu0 %v6725_v57  ;;  %v197_v26 = vld [vmem:[#allocation5 + $0x250] sm:$0xff]  ;;  %v6757_v28 = vcombine.high %v189_v17, %v193_v19  ;;  %v6691_v57 = vcombine.high %v124_v46, %v128_v47 }
  0x92   :  { %v6761_v61 = vcombine.high %v195_v55, %v199_v56  ;;  %v203_v63 = vld [vmem:[#allocation5 + $0x280] sm:$0xff]  ;;  %v6760_v4 = vcombine.low %v195_v55, %v199_v56  ;;  %v201_v27 = vld [vmem:[#allocation5 + $0x270] sm:$0xff]  ;;  %v132_v55 = vld [vmem:[#allocation5 + $0x48] sm:$0xff] }
  0x93   :  { %944 = vmatpush1.bf16.msra.mxu1 %v6720_v23  ;;  %v207_v0 = vld [vmem:[#allocation5 + $0x2a0] sm:$0xff]  ;;  %v205_v34 = vld [vmem:[#allocation5 + $0x290] sm:$0xff]  ;;  %v6765_v36 = vcombine.high %v197_v26, %v201_v27  ;;  %v6764_v41 = vcombine.low %v197_v26, %v201_v27  ;;  %v136_v56 = vld [vmem:[#allocation5 + $0x68] sm:$0xff] }
  0x94   :  { %945 = vmatprep.subr.bf16.mxu1 %v6729_v24  ;;  %v6769_v5 = vcombine.high %v203_v63, %v207_v0  ;;  %1026 = vmatpush1.bf16.msra.mxu0 %v6724_v62  ;;  %v211_v7 = vld [vmem:[#allocation5 + $0x2c0] sm:$0xff]  ;;  %v6768_v12 = vcombine.low %v203_v63, %v207_v0  ;;  %v209_v35 = vld [vmem:[#allocation5 + $0x2b0] sm:$0xff]  ;;  %v6690_v63 = vcombine.low %v124_v46, %v128_v47  ;;  %v140_v0 = vld [vmem:[#allocation5 + $0x88] sm:$0xff] }
  0x95   :  { %v215_v8 = vld [vmem:[#allocation5 + $0x2e0] sm:$0xff]  ;;  %1027 = vmatprep.subr.bf16.mxu0 %v6733_v1  ;;  %v213_v42 = vld [vmem:[#allocation5 + $0x2d0] sm:$0xff]  ;;  %v6772_v49 = vcombine.low %v205_v34, %v209_v35  ;;  %v144_v1 = vld [vmem:[#allocation5 + $0xa8] sm:$0xff]  ;;  %v6699_v2 = vcombine.high %v132_v55, %v136_v56 }
  0x96   :  { %v219_v13 = vld [vmem:[#allocation5 + $0x300] sm:$0xff]  ;;  %v6777_v15 = vcombine.high %v211_v7, %v215_v8  ;;  %v6776_v21 = vcombine.low %v211_v7, %v215_v8  ;;  %v217_v43 = vld [vmem:[#allocation5 + $0x2f0] sm:$0xff]  ;;  %v6698_v7 = vcombine.low %v132_v55, %v136_v56  ;;  %v148_v8 = vld [vmem:[#allocation5 + $0xc8] sm:$0xff]  ;;  %v6707_v10 = vcombine.high %v140_v0, %v144_v1 }
  0x97   :  { %946 = vmatpush1.bf16.msra.mxu1 %v6728_v33  ;;  %v223_v14 = vld [vmem:[#allocation5 + $0x320] sm:$0xff]  ;;  %v6756_v33 = vcombine.low %v189_v17, %v193_v19  ;;  %v221_v50 = vld [vmem:[#allocation5 + $0x310] sm:$0xff]  ;;  %v6780_v58 = vcombine.low %v213_v42, %v217_v43  ;;  %v160_v17 = vld [vmem:[#allocation5 + $0x128] sm:$0xff] }
  0x98   :  { %947 = vmatprep.subr.bf16.mxu1 %v6737_v37  ;;  %1028 = vmatpush1.bf16.msra.mxu0 %v6732_v6  ;;  %v227_v22 = vld [vmem:[#allocation5 + $0x340] sm:$0xff]  ;;  %v6785_v24 = vcombine.high %v219_v13, %v223_v14  ;;  %v6784_v29 = vcombine.low %v219_v13, %v223_v14  ;;  %v225_v51 = vld [vmem:[#allocation5 + $0x330] sm:$0xff]  ;;  %v168_v26 = vld [vmem:[#allocation5 + $0x168] sm:$0xff] }
  0x99   :  { %1029 = vmatprep.subr.bf16.mxu0 %v6741_v9  ;;  %v231_v23 = vld [vmem:[#allocation5 + $0x360] sm:$0xff]  ;;  %v229_v59 = vld [vmem:[#allocation5 + $0x350] sm:$0xff]  ;;  %v6788_v3 = vcombine.low %v221_v50, %v225_v51  ;;  %v152_v9 = vld [vmem:[#allocation5 + $0xe8] sm:$0xff] }
  0x9a   :  { %v235_v30 = vld [vmem:[#allocation5 + $0x380] sm:$0xff]  ;;  %v6793_v32 = vcombine.high %v227_v22, %v231_v23  ;;  %v6792_v37 = vcombine.low %v227_v22, %v231_v23  ;;  %v241_v6 = vld [vmem:[#allocation5 + $0x3b0] sm:$0xff]  ;;  %v6715_v19 = vcombine.high %v148_v8, %v152_v9 }
  0x9b   :  { %948 = vmatpush1.bf16.msra.mxu1 %v6736_v44  ;;  %v239_v31 = vld [vmem:[#allocation5 + $0x3a0] sm:$0xff]  ;;  %v6773_v44 = vcombine.high %v205_v34, %v209_v35  ;;  %v249_v13 = vld [vmem:[#allocation5 + $0x3f0] sm:$0xff]  ;;  %v176_v34 = vld [vmem:[#allocation5 + $0x1a8] sm:$0xff] }
  0x9c   :  { %949 = vmatprep.subr.bf16.mxu1 %v6745_v45  ;;  %1030 = vmatpush1.bf16.msra.mxu0 %v6740_v16  ;;  %v243_v38 = vld [vmem:[#allocation5 + $0x3c0] sm:$0xff]  ;;  %v6801_v40 = vcombine.high %v235_v30, %v239_v31  ;;  %v6800_v45 = vcombine.low %v235_v30, %v239_v31  ;;  %v156_v16 = vld [vmem:[#allocation5 + $0x108] sm:$0xff] }
  0x9d   :  { %1031 = vmatprep.subr.bf16.mxu0 %v6749_v20  ;;  %v247_v39 = vld [vmem:[#allocation5 + $0x3e0] sm:$0xff]  ;;  %v6723_v27 = vcombine.high %v156_v16, %v160_v17 }
  0x9e   :  { %v6809_v48 = vcombine.high %v243_v38, %v247_v39  ;;  %v6808_v54 = vcombine.low %v243_v38, %v247_v39  ;;  %v1296_v22 = vld [vmem:[#allocation7 + $0x20] sm:$0xff] }
  0x9f   :  { %950 = vmatpush1.bf16.msra.mxu1 %v6744_v52  ;;  %v119_v52 = vld [vmem:[#allocation2] sm:$0xff]  ;;  %v1304_v30 = vld [vmem:[#allocation7 + $0x60] sm:$0xff] }
  0xa0   :  { %951 = vmatprep.subr.bf16.mxu1 %v6753_v53  ;;  %1032 = vmatpush1.bf16.msra.mxu0 %v6748_v25  ;;  %v6781_v53 = vcombine.high %v213_v42, %v217_v43  ;;  %v8242_v62 = vpack.c.bf16 %v119_v52, %v119_v52  ;;  %v164_v25 = vld [vmem:[#allocation5 + $0x148] sm:$0xff]  ;;  %v1312_v38 = vld [vmem:[#allocation7 + $0xa0] sm:$0xff] }
  0xa1   :  { %1033 = vmatprep.subr.bf16.mxu0 %v6757_v28  ;;  %v6731_v35 = vcombine.high %v164_v25, %v168_v26  ;;  %v184_v43 = vld [vmem:[#allocation5 + $0x1e8] sm:$0xff]  ;;  %v1320_v47 = vld [vmem:[#allocation7 + $0xe0] sm:$0xff] }
  0xa3   :  { %952 = vmatpush1.bf16.msra.mxu1 %v6752_v60  ;;  %v233_v60 = vld [vmem:[#allocation5 + $0x370] sm:$0xff] }
  0xa4   :  { %953 = vmatprep.subr.bf16.mxu1 %v6761_v61  ;;  %1034 = vmatpush1.bf16.msra.mxu0 %v6756_v33  ;;  %v6789_v61 = vcombine.high %v221_v50, %v225_v51  ;;  %v6796_v11 = vcombine.low %v229_v59, %v233_v60  ;;  %v172_v33 = vld [vmem:[#allocation5 + $0x188] sm:$0xff] }
  0xa5   :  { %1035 = vmatprep.subr.bf16.mxu0 %v6765_v36  ;;  %v6739_v42 = vcombine.high %v172_v33, %v176_v34  ;;  %v192_v50 = vld [vmem:[#allocation5 + $0x228] sm:$0xff] }
  0xa7   :  { %954 = vmatpush1.bf16.msra.mxu1 %v6760_v4  ;;  %v6797_v4 = vcombine.high %v229_v59, %v233_v60 }
  0xa8   :  { %955 = vmatprep.subr.bf16.mxu1 %v6769_v5  ;;  %1036 = vmatpush1.bf16.msra.mxu0 %v6764_v41  ;;  %v237_v5 = vld [vmem:[#allocation5 + $0x390] sm:$0xff]  ;;  %v180_v41 = vld [vmem:[#allocation5 + $0x1c8] sm:$0xff] }
  0xa9   :  { %1037 = vmatprep.subr.bf16.mxu0 %v6773_v44  ;;  %v6805_v14 = vcombine.high %v237_v5, %v241_v6  ;;  %v6804_v20 = vcombine.low %v237_v5, %v241_v6  ;;  %v6747_v51 = vcombine.high %v180_v41, %v184_v43  ;;  %v6746_v56 = vcombine.low %v180_v41, %v184_v43  ;;  %v150_v43 = vld [vmem:[#allocation5 + $0xd8] sm:$0xff] }
  0xab   :  { %956 = vmatpush1.bf16.msra.mxu1 %v6768_v12  ;;  %v245_v12 = vld [vmem:[#allocation5 + $0x3d0] sm:$0xff] }
  0xac   :  { %957 = vmatprep.subr.bf16.mxu1 %v6777_v15  ;;  %1038 = vmatpush1.bf16.msra.mxu0 %v6772_v49  ;;  %v6706_v15 = vcombine.low %v140_v0, %v144_v1  ;;  %v6813_v23 = vcombine.high %v245_v12, %v249_v13  ;;  %v6812_v28 = vcombine.low %v245_v12, %v249_v13  ;;  %v188_v49 = vld [vmem:[#allocation5 + $0x208] sm:$0xff] }
  0xad   :  { %1039 = vmatprep.subr.bf16.mxu0 %v6781_v53  ;;  %v1324_v53 = vld [vmem:[#allocation7 + $0x100] sm:$0xff]  ;;  %v6755_v59 = vcombine.high %v188_v49, %v192_v50  ;;  %v6754_v1 = vcombine.low %v188_v49, %v192_v50  ;;  %v220_v13 = vld [vmem:[#allocation5 + $0x308] sm:$0xff] }
  0xaf   :  { %958 = vmatpush1.bf16.msra.mxu1 %v6776_v21  ;;  %v1292_v21 = vld [vmem:[#allocation7] sm:$0xff] }
  0xb0   :  { %959 = vmatprep.subr.bf16.mxu1 %v6785_v24  ;;  %1040 = vmatpush1.bf16.msra.mxu0 %v6780_v58  ;;  %v6714_v24 = vcombine.low %v148_v8, %v152_v9  ;;  %v6817_v31 = vcombine.high %v1292_v21, %v1296_v22  ;;  %v6816_v36 = vcombine.low %v1292_v21, %v1296_v22  ;;  %v200_v58 = vld [vmem:[#allocation5 + $0x268] sm:$0xff] }
  0xb1   :  { %1041 = vmatprep.subr.bf16.mxu0 %v6789_v61  ;;  %v1332_v61 = vld [vmem:[#allocation7 + $0x140] sm:$0xff]  ;;  %v212_v8 = vld [vmem:[#allocation5 + $0x2c8] sm:$0xff] }
  0xb2   :  { %v216_v9 = vld [vmem:[#allocation5 + $0x2e8] sm:$0xff] }
  0xb3   :  { %960 = vmatpush1.bf16.msra.mxu1 %v6784_v29  ;;  %v1300_v29 = vld [vmem:[#allocation7 + $0x40] sm:$0xff]  ;;  %v236_v22 = vld [vmem:[#allocation5 + $0x388] sm:$0xff] }
  0xb4   :  { %961 = vmatprep.subr.bf16.mxu1 %v6793_v32  ;;  %1042 = vmatpush1.bf16.msra.mxu0 %v6788_v3  ;;  %v6722_v32 = vcombine.low %v156_v16, %v160_v17  ;;  %v6825_v39 = vcombine.high %v1300_v29, %v1304_v30  ;;  %v6824_v44 = vcombine.low %v1300_v29, %v1304_v30  ;;  %v208_v3 = vld [vmem:[#allocation5 + $0x2a8] sm:$0xff] }
  0xb5   :  { %1043 = vmatprep.subr.bf16.mxu0 %v6797_v4  ;;  %v6778_v16 = vcombine.low %v212_v8, %v216_v9  ;;  %v228_v17 = vld [vmem:[#allocation5 + $0x348] sm:$0xff] }
  0xb7   :  { %962 = vmatpush1.bf16.msra.mxu1 %v6792_v37  ;;  %v1308_v37 = vld [vmem:[#allocation7 + $0x80] sm:$0xff] }
  0xb8   :  { %963 = vmatprep.subr.bf16.mxu1 %v6801_v40  ;;  %1044 = vmatpush1.bf16.msra.mxu0 %v6796_v11  ;;  %v6730_v40 = vcombine.low %v164_v25, %v168_v26  ;;  %v6833_v46 = vcombine.high %v1308_v37, %v1312_v38  ;;  %v6832_v52 = vcombine.low %v1308_v37, %v1312_v38 }
  0xb9   :  { %1045 = vmatprep.subr.bf16.mxu0 %v6805_v14  ;;  %v224_v14 = vld [vmem:[#allocation5 + $0x328] sm:$0xff] }
  0xba   :  { %v6786_v21 = vcombine.low %v220_v13, %v224_v14 }
  0xbb   :  { %964 = vmatpush1.bf16.msra.mxu1 %v6800_v45  ;;  %v1316_v45 = vld [vmem:[#allocation7 + $0xc0] sm:$0xff] }
  0xbc   :  { %965 = vmatprep.subr.bf16.mxu1 %v6809_v48  ;;  %1046 = vmatpush1.bf16.msra.mxu0 %v6804_v20  ;;  %v6738_v48 = vcombine.low %v172_v33, %v176_v34  ;;  %v6841_v55 = vcombine.high %v1316_v45, %v1320_v47  ;;  %v6840_v60 = vcombine.low %v1316_v45, %v1320_v47  ;;  %v158_v47 = vld [vmem:[#allocation5 + $0x118] sm:$0xff] }
  0xbd   :  { %1047 = vmatprep.subr.bf16.mxu0 %v6813_v23  ;;  %v6787_v20 = vcombine.high %v220_v13, %v224_v14  ;;  %v240_v23 = vld [vmem:[#allocation5 + $0x3a8] sm:$0xff]  ;;  %v1356_v13 = vld [vmem:[#allocation7 + $0x200] sm:$0xff] }
  0xbe   :  { %v6803_v26 = vcombine.high %v236_v22, %v240_v23  ;;  %v6802_v29 = vcombine.low %v236_v22, %v240_v23  ;;  %v1360_v14 = vld [vmem:[#allocation7 + $0x220] sm:$0xff] }
  0xbf   :  { %966 = vmatpush1.bf16.msra.mxu1 %v6808_v54  ;;  %v1328_v54 = vld [vmem:[#allocation7 + $0x120] sm:$0xff] }
  0xc0   :  { %976 = vmatprep.subr.bf16.mxu1 %v6691_v57  ;;  %1048 = vmatpush1.bf16.msra.mxu0 %v6812_v28  ;;  %v196_v57 = vld [vmem:[#allocation5 + $0x248] sm:$0xff]  ;;  %v6849_v0 = vcombine.high %v1324_v53, %v1328_v54  ;;  %v6848_v5 = vcombine.low %v1324_v53, %v1328_v54  ;;  %v174_v54 = vld [vmem:[#allocation5 + $0x198] sm:$0xff]  ;;  %v1364_v22 = vld [vmem:[#allocation7 + $0x240] sm:$0xff] }
  0xc1   :  { %4409 = vmatprep.subr.bf16.mxu0 %v6817_v31  ;;  %v6763_v4 = vcombine.high %v196_v57, %v200_v58  ;;  %v248_v28 = vld [vmem:[#allocation5 + $0x3e8] sm:$0xff]  ;;  %v126_v31 = vld [vmem:[#allocation5 + $0x18] sm:$0xff]  ;;  %v1368_v23 = vld [vmem:[#allocation7 + $0x260] sm:$0xff] }
  0xc2   :  { %968 = vmatmul.mubr.bf16.vlgmr.msra.gmra.mrb[0].mxu1 %v8242_v62 }
  0xc3   :  { %977 = vmatpush1.bf16.msra.mxu1 %v6690_v63  ;;  %1008 = vmatprep.mubr.bf16.mxu1 %v8238_v18  ;;  %v1336_v63 = vld [vmem:[#allocation7 + $0x160] sm:$0xff] }
  0xc4   :  { %978 = vmatprep.subr.bf16.mxu1 %v6699_v2  ;;  %1050 = vmatmul.mubr.bf16.vlgmr.msra.gmra.mrb[0].mxu0 %v8242_v62  ;;  %v204_v2 = vld [vmem:[#allocation5 + $0x288] sm:$0xff]  ;;  %v6857_v6 = vcombine.high %v1332_v61, %v1336_v63  ;;  %v6856_v11 = vcombine.low %v1332_v61, %v1336_v63  ;;  %v1344_v61 = vld [vmem:[#allocation7 + $0x1a0] sm:$0xff] }
  0xc5   :  { %4410 = vmatpush1.bf16.msra.mxu0 %v6816_v36  ;;  %v6770_v12 = vcombine.low %v204_v2, %v208_v3  ;;  %v138_v36 = vld [vmem:[#allocation5 + $0x78] sm:$0xff] }
  0xc6   :  { %4411 = vmatprep.subr.bf16.mxu0 %v6825_v39  ;;  %v142_v39 = vld [vmem:[#allocation5 + $0x98] sm:$0xff] }
  0xc7   :  { %979 = vmatpush1.bf16.msra.mxu1 %v6698_v7  ;;  %v6762_v7 = vcombine.low %v196_v57, %v200_v58  ;;  %v182_v58 = vld [vmem:[#allocation5 + $0x1d8] sm:$0xff] }
  0xc8   :  { %980 = vmatprep.subr.bf16.mxu1 %v6707_v10  ;;  %v6771_v10 = vcombine.high %v204_v2, %v208_v3  ;;  %v190_v3 = vld [vmem:[#allocation5 + $0x218] sm:$0xff] }
  0xc9   :  { %4412 = vmatpush1.bf16.msra.mxu0 %v6824_v44  ;;  %v154_v44 = vld [vmem:[#allocation5 + $0xf8] sm:$0xff] }
  0xca   :  { %4413 = vmatprep.subr.bf16.mxu0 %v6833_v46  ;;  %v6719_v46 = vcombine.high %v150_v43, %v154_v44  ;;  %v6718_v49 = vcombine.low %v150_v43, %v154_v44  ;;  %v230_v44 = vld [vmem:[#allocation5 + $0x358] sm:$0xff] }
  0xcb   :  { %981 = vmatpush1.bf16.msra.mxu1 %v6706_v15  ;;  %v6779_v15 = vcombine.high %v212_v8, %v216_v9 }
  0xcc   :  { %982 = vmatprep.subr.bf16.mxu1 %v6715_v19  ;;  %v232_v19 = vld [vmem:[#allocation5 + $0x368] sm:$0xff] }
  0xcd   :  { %4414 = vmatpush1.bf16.msra.mxu0 %v6832_v52  ;;  %v6794_v25 = vcombine.low %v228_v17, %v232_v19  ;;  %v170_v52 = vld [vmem:[#allocation5 + $0x178] sm:$0xff] }
  0xce   :  { %4415 = vmatprep.subr.bf16.mxu0 %v6841_v55  ;;  %v178_v55 = vld [vmem:[#allocation5 + $0x1b8] sm:$0xff] }
  0xcf   :  { %983 = vmatpush1.bf16.msra.mxu1 %v6714_v24  ;;  %v6795_v24 = vcombine.high %v228_v17, %v232_v19  ;;  %v6743_v57 = vcombine.high %v174_v54, %v178_v55  ;;  %v6880_v17 = vcombine.low %v1356_v13, %v1360_v14 }
  0xd0   :  { %984 = vmatprep.subr.bf16.mxu1 %v6723_v27  ;;  %v244_v27 = vld [vmem:[#allocation5 + $0x3c8] sm:$0xff] }
  0xd1   :  { %4416 = vmatpush1.bf16.msra.mxu0 %v6840_v60  ;;  %v6811_v30 = vcombine.high %v244_v27, %v248_v28  ;;  %v6810_v33 = vcombine.low %v244_v27, %v248_v28  ;;  %v1340_v60 = vld [vmem:[#allocation7 + $0x180] sm:$0xff]  ;;  %v214_v28 = vld [vmem:[#allocation5 + $0x2d8] sm:$0xff] }
  0xd2   :  { %4417 = vmatprep.subr.bf16.mxu0 %v6849_v0  ;;  %v6865_v63 = vcombine.high %v1340_v60, %v1344_v61  ;;  %v6742_v0 = vcombine.low %v174_v54, %v178_v55  ;;  %v1400_v54 = vld [vmem:[#allocation7 + $0x360] sm:$0xff] }
  0xd3   :  { %985 = vmatpush1.bf16.msra.mxu1 %v6722_v32  ;;  %v130_v32 = vld [vmem:[#allocation5 + $0x38] sm:$0xff] }
  0xd4   :  { %986 = vmatprep.subr.bf16.mxu1 %v6731_v35  ;;  %v6695_v34 = vcombine.high %v126_v31, %v130_v32  ;;  %v134_v35 = vld [vmem:[#allocation5 + $0x58] sm:$0xff]  ;;  %v6694_v37 = vcombine.low %v126_v31, %v130_v32  ;;  %v1376_v31 = vld [vmem:[#allocation7 + $0x2a0] sm:$0xff] }
  0xd5   :  { %4418 = vmatpush1.bf16.msra.mxu0 %v6848_v5  ;;  %v6703_v38 = vcombine.high %v134_v35, %v138_v36  ;;  %v6702_v41 = vcombine.low %v134_v35, %v138_v36  ;;  %v1348_v5 = vld [vmem:[#allocation7 + $0x1c0] sm:$0xff]  ;;  %v222_v36 = vld [vmem:[#allocation5 + $0x318] sm:$0xff] }
  0xd6   :  { %4419 = vmatprep.subr.bf16.mxu0 %v6857_v6  ;;  %v1352_v6 = vld [vmem:[#allocation7 + $0x1e0] sm:$0xff] }
  0xd7   :  { %987 = vmatpush1.bf16.msra.mxu1 %v6730_v40  ;;  %v146_v40 = vld [vmem:[#allocation5 + $0xb8] sm:$0xff]  ;;  %v6872_v9 = vcombine.low %v1348_v5, %v1352_v6 }
  0xd8   :  { %988 = vmatprep.subr.bf16.mxu1 %v6739_v42  ;;  %v6711_v42 = vcombine.high %v142_v39, %v146_v40  ;;  %v6710_v45 = vcombine.low %v142_v39, %v146_v40  ;;  %v1384_v39 = vld [vmem:[#allocation7 + $0x2e0] sm:$0xff] }
  0xd9   :  { %4420 = vmatpush1.bf16.msra.mxu0 %v6856_v11  ;;  %v198_v11 = vld [vmem:[#allocation5 + $0x258] sm:$0xff] }
  0xda   :  { %4421 = vmatprep.subr.bf16.mxu0 %v6865_v63 }
  0xdb   :  { %989 = vmatpush1.bf16.msra.mxu1 %v6738_v48  ;;  %v162_v48 = vld [vmem:[#allocation5 + $0x138] sm:$0xff] }
  0xdc   :  { %990 = vmatprep.subr.bf16.mxu1 %v6747_v51  ;;  %v6727_v50 = vcombine.high %v158_v47, %v162_v48  ;;  %v166_v51 = vld [vmem:[#allocation5 + $0x158] sm:$0xff]  ;;  %v6726_v53 = vcombine.low %v158_v47, %v162_v48  ;;  %v1392_v47 = vld [vmem:[#allocation7 + $0x320] sm:$0xff] }
  0xdf   :  { %991 = vmatpush1.bf16.msra.mxu1 %v6746_v56  ;;  %v6734_v56 = vcombine.low %v166_v51, %v170_v52 }
  0xe0   :  { %992 = vmatprep.subr.bf16.mxu1 %v6755_v59  ;;  %v186_v59 = vld [vmem:[#allocation5 + $0x1f8] sm:$0xff] }
  0xe1   :  { %v6751_v2 = vcombine.high %v182_v58, %v186_v59  ;;  %v6750_v8 = vcombine.low %v182_v58, %v186_v59  ;;  %v1408_v58 = vld [vmem:[#allocation7 + $0x3a0] sm:$0xff] }
  0xe3   :  { %993 = vmatpush1.bf16.msra.mxu1 %v6754_v1  ;;  %v6864_v1 = vcombine.low %v1340_v60, %v1344_v61  ;;  %v1412_v61 = vld [vmem:[#allocation7 + $0x3c0] sm:$0xff] }
  0xe4   :  { %994 = vmatprep.subr.bf16.mxu1 %v6763_v4  ;;  %v194_v4 = vld [vmem:[#allocation5 + $0x238] sm:$0xff] }
  0xe5   :  { %4422 = vmatpush1.bf16.msra.mxu0 %v6864_v1  ;;  %v246_v1 = vld [vmem:[#allocation5 + $0x3d8] sm:$0xff] }
  0xe7   :  { %995 = vmatpush1.bf16.msra.mxu1 %v6762_v7  ;;  %v6873_v7 = vcombine.high %v1348_v5, %v1352_v6 }
  0xe8   :  { %996 = vmatprep.subr.bf16.mxu1 %v6771_v10  ;;  %v6759_v10 = vcombine.high %v190_v3, %v194_v4 }
  0xe9   :  { %4423 = vmatprep.subr.bf16.mxu0 %v6873_v7  ;;  %v1293_v7 = vld [vmem:[#allocation7 + $0x8] sm:$0xff] }
  0xea   :  { %4424 = vmatpush1.bf16.msra.mxu0 %v6872_v9 }
  0xeb   :  { %997 = vmatpush1.bf16.msra.mxu1 %v6770_v12  ;;  %v202_v12 = vld [vmem:[#allocation5 + $0x278] sm:$0xff] }
  0xec   :  { %998 = vmatprep.subr.bf16.mxu1 %v6779_v15  ;;  %v6881_v15 = vcombine.high %v1356_v13, %v1360_v14  ;;  %v6767_v19 = vcombine.high %v198_v11, %v202_v12  ;;  %v1305_v13 = vld [vmem:[#allocation7 + $0x68] sm:$0xff]  ;;  %v8249_v14 = vld [vmem:[#allocation7 + $0x400] sm:$0xff] }
  0xee   :  { %4425 = vmatprep.subr.bf16.mxu0 %v6881_v15  ;;  %v8251_v15 = vld [vmem:[#allocation7 + $0x420] sm:$0xff] }
  0xef   :  { %999 = vmatpush1.bf16.msra.mxu1 %v6778_v16  ;;  %v6758_v16 = vcombine.low %v190_v3, %v194_v4  ;;  %4426 = vmatpush1.bf16.msra.mxu0 %v6880_v17  ;;  %v6945_v17 = vcombine.high %v8249_v14, %v8251_v15 }
  0xf0   :  { %1000 = vmatprep.subr.bf16.mxu1 %v6787_v20  ;;  %v206_v20 = vld [vmem:[#allocation5 + $0x298] sm:$0xff] }
  0xf3   :  { %1001 = vmatpush1.bf16.msra.mxu1 %v6786_v21  ;;  %v210_v21 = vld [vmem:[#allocation5 + $0x2b8] sm:$0xff] }
  0xf4   :  { %1002 = vmatprep.subr.bf16.mxu1 %v6795_v24  ;;  %v6889_v24 = vcombine.high %v1364_v22, %v1368_v23  ;;  %v6775_v27 = vcombine.high %v206_v20, %v210_v21 }
  0xf6   :  { %4427 = vmatprep.subr.bf16.mxu0 %v6889_v24  ;;  %v1309_v24 = vld [vmem:[#allocation7 + $0x88] sm:$0xff] }
  0xf7   :  { %1003 = vmatpush1.bf16.msra.mxu1 %v6794_v25  ;;  %v6766_v25 = vcombine.low %v198_v11, %v202_v12  ;;  %v1301_v12 = vld [vmem:[#allocation7 + $0x48] sm:$0xff] }
  0xf8   :  { %1004 = vmatprep.subr.bf16.mxu1 %v6803_v26  ;;  %v6888_v26 = vcombine.low %v1364_v22, %v1368_v23  ;;  %v6827_v23 = vcombine.high %v1301_v12, %v1305_v13 }
  0xfa   :  { %4428 = vmatpush1.bf16.msra.mxu0 %v6888_v26  ;;  %v6826_v26 = vcombine.low %v1301_v12, %v1305_v13  ;;  %v1417_v12 = vld [vmem:[#allocation7 + $0x3e8] sm:$0xff] }
  0xfb   :  { %1005 = vmatpush1.bf16.msra.mxu1 %v6802_v29  ;;  %v218_v29 = vld [vmem:[#allocation5 + $0x2f8] sm:$0xff] }
  0xfc   :  { %1006 = vmatprep.subr.bf16.mxu1 %v6811_v30  ;;  %v1372_v30 = vld [vmem:[#allocation7 + $0x280] sm:$0xff]  ;;  %v6783_v35 = vcombine.high %v214_v28, %v218_v29 }
  0xfd   :  { %v6897_v32 = vcombine.high %v1372_v30, %v1376_v31 }
  0xff   :  { %1007 = vmatpush1.bf16.msra.mxu1 %v6810_v33  ;;  %v6774_v33 = vcombine.low %v206_v20, %v210_v21  ;;  %4429 = vmatprep.subr.bf16.mxu0 %v6897_v32  ;;  %v6944_v21 = vcombine.low %v8249_v14, %v8251_v15  ;;  %v1325_v32 = vld [vmem:[#allocation7 + $0x108] sm:$0xff] }
 0x100   :  { %1058 = vmatprep.subr.bf16.mxu1 %v6695_v34  ;;  %v6896_v34 = vcombine.low %v1372_v30, %v1376_v31  ;;  %v1449_v14 = vld [vmem:[#allocation7 + $0x4e8] sm:$0xff] }
 0x102   :  { %1009 = vmatmul.mubr.bf16.vlgmr.msra.gmra.mrb[4].mxu1 %v8242_v62  ;;  %4430 = vmatpush1.bf16.msra.mxu0 %v6896_v34 }
 0x103   :  { %1059 = vmatpush1.bf16.msra.mxu1 %v6694_v37  ;;  %1090 = vmatprep.mubr.bf16.mxu1 %v8238_v18  ;;  %v6735_v18 = vcombine.high %v166_v51, %v170_v52  ;;  %v226_v37 = vld [vmem:[#allocation5 + $0x338] sm:$0xff] }
 0x104   :  { %1060 = vmatprep.subr.bf16.mxu1 %v6703_v38  ;;  %v1380_v38 = vld [vmem:[#allocation7 + $0x2c0] sm:$0xff]  ;;  %v6791_v43 = vcombine.high %v222_v36, %v226_v37  ;;  %v238_v52 = vld [vmem:[#allocation5 + $0x398] sm:$0xff] }
 0x105   :  { %v6905_v40 = vcombine.high %v1380_v38, %v1384_v39 }
 0x107   :  { %1061 = vmatpush1.bf16.msra.mxu1 %v6702_v41  ;;  %v6782_v41 = vcombine.low %v214_v28, %v218_v29  ;;  %4431 = vmatprep.subr.bf16.mxu0 %v6905_v40  ;;  %v1317_v28 = vld [vmem:[#allocation7 + $0xc8] sm:$0xff] }
 0x108   :  { %1062 = vmatprep.subr.bf16.mxu1 %v6711_v42  ;;  %v6904_v42 = vcombine.low %v1380_v38, %v1384_v39  ;;  %v1321_v29 = vld [vmem:[#allocation7 + $0xe8] sm:$0xff] }
 0x109   :  { %v6843_v31 = vcombine.high %v1317_v28, %v1321_v29  ;;  %v6842_v34 = vcombine.low %v1317_v28, %v1321_v29  ;;  %v1341_v39 = vld [vmem:[#allocation7 + $0x188] sm:$0xff] }
 0x10a   :  { %4432 = vmatpush1.bf16.msra.mxu0 %v6904_v42  ;;  %v1345_v40 = vld [vmem:[#allocation7 + $0x1a8] sm:$0xff] }
 0x10b   :  { %1063 = vmatpush1.bf16.msra.mxu1 %v6710_v45  ;;  %v234_v45 = vld [vmem:[#allocation5 + $0x378] sm:$0xff]  ;;  %v6867_v42 = vcombine.high %v1341_v39, %v1345_v40 }
 0x10c   :  { %1064 = vmatprep.subr.bf16.mxu1 %v6719_v46  ;;  %v1388_v46 = vld [vmem:[#allocation7 + $0x300] sm:$0xff]  ;;  %v6799_v51 = vcombine.high %v230_v44, %v234_v45  ;;  %v6798_v59 = vcombine.low %v230_v44, %v234_v45  ;;  %v1353_v44 = vld [vmem:[#allocation7 + $0x1e8] sm:$0xff]  ;;  %v6866_v45 = vcombine.low %v1341_v39, %v1345_v40 }
 0x10d   :  { %v6913_v48 = vcombine.high %v1388_v46, %v1392_v47 }
 0x10f   :  { %1065 = vmatpush1.bf16.msra.mxu1 %v6718_v49  ;;  %v6790_v49 = vcombine.low %v222_v36, %v226_v37  ;;  %4433 = vmatprep.subr.bf16.mxu0 %v6913_v48  ;;  %v1333_v36 = vld [vmem:[#allocation7 + $0x148] sm:$0xff] }
 0x110   :  { %1066 = vmatprep.subr.bf16.mxu1 %v6727_v50  ;;  %v6912_v50 = vcombine.low %v1388_v46, %v1392_v47  ;;  %v1337_v37 = vld [vmem:[#allocation7 + $0x168] sm:$0xff] }
 0x111   :  { %v6859_v38 = vcombine.high %v1333_v36, %v1337_v37  ;;  %v1357_v47 = vld [vmem:[#allocation7 + $0x208] sm:$0xff] }
 0x112   :  { %4434 = vmatpush1.bf16.msra.mxu0 %v6912_v50  ;;  %v1361_v48 = vld [vmem:[#allocation7 + $0x228] sm:$0xff] }
 0x113   :  { %1067 = vmatpush1.bf16.msra.mxu1 %v6726_v53  ;;  %v242_v53 = vld [vmem:[#allocation5 + $0x3b8] sm:$0xff]  ;;  %v6883_v50 = vcombine.high %v1357_v47, %v1361_v48 }
 0x114   :  { %1068 = vmatprep.subr.bf16.mxu1 %v6735_v18  ;;  %v1396_v18 = vld [vmem:[#allocation7 + $0x340] sm:$0xff]  ;;  %v6807_v63 = vcombine.high %v238_v52, %v242_v53  ;;  %v6806_v5 = vcombine.low %v238_v52, %v242_v53  ;;  %v1369_v52 = vld [vmem:[#allocation7 + $0x268] sm:$0xff]  ;;  %v6882_v53 = vcombine.low %v1357_v47, %v1361_v48 }
 0x115   :  { %v6920_v55 = vcombine.low %v1396_v18, %v1400_v54 }
 0x117   :  { %1069 = vmatpush1.bf16.msra.mxu1 %v6734_v56  ;;  %v6921_v56 = vcombine.high %v1396_v18, %v1400_v54  ;;  %v1373_v54 = vld [vmem:[#allocation7 + $0x288] sm:$0xff] }
 0x118   :  { %1070 = vmatprep.subr.bf16.mxu1 %v6743_v57  ;;  %v1404_v57 = vld [vmem:[#allocation7 + $0x380] sm:$0xff] }
 0x119   :  { %v6929_v60 = vcombine.high %v1404_v57, %v1408_v58  ;;  %4435 = vmatprep.subr.bf16.mxu0 %v6921_v56  ;;  %v6928_v3 = vcombine.low %v1404_v57, %v1408_v58  ;;  %v1381_v58 = vld [vmem:[#allocation7 + $0x2c8] sm:$0xff] }
 0x11a   :  { %4436 = vmatpush1.bf16.msra.mxu0 %v6920_v55  ;;  %v1377_v55 = vld [vmem:[#allocation7 + $0x2a8] sm:$0xff] }
 0x11b   :  { %1071 = vmatpush1.bf16.msra.mxu1 %v6742_v0  ;;  %v1416_v0 = vld [vmem:[#allocation7 + $0x3e0] sm:$0xff]  ;;  %4437 = vmatprep.subr.bf16.mxu0 %v6929_v60  ;;  %v6899_v57 = vcombine.high %v1373_v54, %v1377_v55  ;;  %v6898_v60 = vcombine.low %v1373_v54, %v1377_v55 }
 0x11c   :  { %1072 = vmatprep.subr.bf16.mxu1 %v6751_v2  ;;  %v250_v2 = vld [vmem:[#allocation5 + $0x3f8] sm:$0xff]  ;;  %v6937_v4 = vcombine.high %v1412_v61, %v1416_v0  ;;  %v6936_v9 = vcombine.low %v1412_v61, %v1416_v0  ;;  %v1393_v0 = vld [vmem:[#allocation7 + $0x328] sm:$0xff] }
 0x11d   :  { %v6815_v6 = vcombine.high %v246_v1, %v250_v2 }
 0x11e   :  { %4438 = vmatpush1.bf16.msra.mxu0 %v6928_v3  ;;  %v1397_v3 = vld [vmem:[#allocation7 + $0x348] sm:$0xff] }
 0x11f   :  { %1073 = vmatpush1.bf16.msra.mxu1 %v6750_v8  ;;  %v1297_v8 = vld [vmem:[#allocation7 + $0x28] sm:$0xff]  ;;  %4439 = vmatprep.subr.bf16.mxu0 %v6937_v4 }
 0x120   :  { %1074 = vmatprep.subr.bf16.mxu1 %v6759_v10  ;;  %v6814_v10 = vcombine.low %v246_v1, %v250_v2  ;;  %v6819_v11 = vcombine.high %v1293_v7, %v1297_v8  ;;  %v6818_v20 = vcombine.low %v1293_v7, %v1297_v8  ;;  %v1401_v4 = vld [vmem:[#allocation7 + $0x368] sm:$0xff] }
 0x121   :  { %v1405_v7 = vld [vmem:[#allocation7 + $0x388] sm:$0xff] }
 0x122   :  { %4440 = vmatpush1.bf16.msra.mxu0 %v6936_v9  ;;  %v1409_v8 = vld [vmem:[#allocation7 + $0x3a8] sm:$0xff]  ;;  %v6922_v9 = vcombine.low %v1397_v3, %v1401_v4 }
 0x123   :  { %1075 = vmatpush1.bf16.msra.mxu1 %v6758_v16  ;;  %v8253_v16 = vld [vmem:[#allocation7 + $0x408] sm:$0xff]  ;;  %4450 = vmatprep.subr.bf16.mxu0 %v6945_v17  ;;  %v6930_v13 = vcombine.low %v1405_v7, %v1409_v8 }
 0x124   :  { %1076 = vmatprep.subr.bf16.mxu1 %v6767_v19  ;;  %v8257_v19 = vld [vmem:[#allocation7 + $0x428] sm:$0xff] }
 0x125   :  { %v6946_v22 = vcombine.low %v8253_v16, %v8257_v19 }
 0x127   :  { %1077 = vmatpush1.bf16.msra.mxu1 %v6766_v25  ;;  %v1313_v25 = vld [vmem:[#allocation7 + $0xa8] sm:$0xff] }
 0x128   :  { %1078 = vmatprep.subr.bf16.mxu1 %v6775_v27  ;;  %v6835_v27 = vcombine.high %v1309_v24, %v1313_v25  ;;  %v6834_v30 = vcombine.low %v1309_v24, %v1313_v25  ;;  %v255_v24 = vlaneseq }
 0x12a   :  { %v8266_v25 = vshrl.u32 %v255_v24, 7 }
 0x12b   :  { %1079 = vmatpush1.bf16.msra.mxu1 %v6774_v33  ;;  %v1329_v33 = vld [vmem:[#allocation7 + $0x128] sm:$0xff] }
 0x12c   :  { %1080 = vmatprep.subr.bf16.mxu1 %v6783_v35  ;;  %v6851_v35 = vcombine.high %v1325_v32, %v1329_v33  ;;  %v8271_v29 = vsub.s32 0, %v8266_v25 }
 0x12f   :  { %1081 = vmatpush1.bf16.msra.mxu1 %v6782_v41  ;;  %v6858_v41 = vcombine.low %v1333_v36, %v1337_v37 }
 0x130   :  { %1082 = vmatprep.subr.bf16.mxu1 %v6791_v43  ;;  %v1349_v43 = vld [vmem:[#allocation7 + $0x1c8] sm:$0xff] }
 0x131   :  { %v6875_v46 = vcombine.high %v1349_v43, %v1353_v44 }
 0x133   :  { %1083 = vmatpush1.bf16.msra.mxu1 %v6790_v49  ;;  %v6874_v49 = vcombine.low %v1349_v43, %v1353_v44 }
 0x134   :  { %1084 = vmatprep.subr.bf16.mxu1 %v6799_v51  ;;  %v1365_v51 = vld [vmem:[#allocation7 + $0x248] sm:$0xff] }
 0x135   :  { %v6891_v18 = vcombine.high %v1365_v51, %v1369_v52  ;;  %v6890_v56 = vcombine.low %v1365_v51, %v1369_v52 }
 0x137   :  { %1085 = vmatpush1.bf16.msra.mxu1 %v6798_v59  ;;  %v1385_v59 = vld [vmem:[#allocation7 + $0x2e8] sm:$0xff] }
 0x138   :  { %1086 = vmatprep.subr.bf16.mxu1 %v6807_v63  ;;  %v6907_v61 = vcombine.high %v1381_v58, %v1385_v59  ;;  %v1389_v63 = vld [vmem:[#allocation7 + $0x308] sm:$0xff]  ;;  %v6906_v1 = vcombine.low %v1381_v58, %v1385_v59 }
 0x139   :  { %v6915_v2 = vcombine.high %v1389_v63, %v1393_v0 }
 0x13b   :  { %1087 = vmatpush1.bf16.msra.mxu1 %v6806_v5  ;;  %v6914_v5 = vcombine.low %v1389_v63, %v1393_v0 }
 0x13c   :  { %1088 = vmatprep.subr.bf16.mxu1 %v6815_v6  ;;  %v6923_v6 = vcombine.high %v1397_v3, %v1401_v4 }
 0x13f   :  { %1089 = vmatpush1.bf16.msra.mxu1 %v6814_v10  ;;  %v6931_v10 = vcombine.high %v1405_v7, %v1409_v8 }
 0x140   :  { %4573 = vmatprep.subr.bf16.mxu1 %v6819_v11  ;;  %v1413_v11 = vld [vmem:[#allocation7 + $0x3c8] sm:$0xff] }
 0x141   :  { %v6939_v17 = vcombine.high %v1413_v11, %v1417_v12 }
 0x142   :  { %1091 = vmatmul.mubr.bf16.vlgmr.msra.gmra.mrb[8].mxu1 %v8242_v62  ;;  %v6850_v62 = vcombine.low %v1325_v32, %v1329_v33 }
 0x143   :  { %4574 = vmatpush1.bf16.msra.mxu1 %v6818_v20  ;;  %v6938_v20 = vcombine.low %v1413_v11, %v1417_v12 }
 0x144   :  { %4575 = vmatprep.subr.bf16.mxu1 %v6827_v23  ;;  %v6947_v23 = vcombine.high %v8253_v16, %v8257_v19 }
 0x147   :  { %4576 = vmatpush1.bf16.msra.mxu1 %v6826_v26  ;;  %v251_v26 = vld [vmem:[#allocation13] ss:$8 sm:$0xf] }
 0x148   :  { %4577 = vmatprep.subr.bf16.mxu1 %v6835_v27  ;;  %v252_v27 = vld [vmem:[#allocation13] ss:$8 sm:$0xf0] }
 0x149   :  { %v8268_v28 = vor.u32 %v252_v27, %v251_v26  ;;  %v277_v26 = vsub.s32 5, %v8266_v25 }
 0x14b   :  { %4578 = vmatpush1.bf16.msra.mxu1 %v6834_v30  ;;  %v8274_v30 = vsub.s32 1, %v8266_v25  ;;  %v278_v27 = vrot.slane %v8268_v28, %v277_v26 }
 0x14c   :  { %4579 = vmatprep.subr.bf16.mxu1 %v6843_v31  ;;  %v258_v31 = vrot.slane %v8268_v28, %v8271_v29 }
 0x14d   :  { %v262_v32 = vrot.slane %v8268_v28, %v8274_v30 }
 0x14f   :  { %4580 = vmatpush1.bf16.msra.mxu1 %v6842_v34 }
 0x150   :  { %4581 = vmatprep.subr.bf16.mxu1 %v6851_v35 }
 0x153   :  { %4582 = vmatpush1.bf16.msra.mxu1 %v6850_v62 }
 0x154   :  { %4583 = vmatprep.subr.bf16.mxu1 %v6859_v38 }
 0x157   :  { %4584 = vmatpush1.bf16.msra.mxu1 %v6858_v41 }
 0x158   :  { %4585 = vmatprep.subr.bf16.mxu1 %v6867_v42 }
 0x15b   :  { %4586 = vmatpush1.bf16.msra.mxu1 %v6866_v45 }
 0x15c   :  { %4587 = vmatprep.subr.bf16.mxu1 %v6875_v46 }
 0x15f   :  { %4588 = vmatpush1.bf16.msra.mxu1 %v6874_v49 }
 0x160   :  { %4589 = vmatprep.subr.bf16.mxu1 %v6883_v50 }
 0x163   :  { %4590 = vmatpush1.bf16.msra.mxu1 %v6882_v53 }
 0x164   :  { %4591 = vmatprep.subr.bf16.mxu1 %v6891_v18 }
 0x167   :  { %4592 = vmatpush1.bf16.msra.mxu1 %v6890_v56 }
 0x168   :  { %4593 = vmatprep.subr.bf16.mxu1 %v6899_v57 }
 0x16b   :  { %4594 = vmatpush1.bf16.msra.mxu1 %v6898_v60 }
 0x16c   :  { %4595 = vmatprep.subr.bf16.mxu1 %v6907_v61 }
 0x16f   :  { %4596 = vmatpush1.bf16.msra.mxu1 %v6906_v1 }
 0x170   :  { %4597 = vmatprep.subr.bf16.mxu1 %v6915_v2 }
 0x173   :  { %4598 = vmatpush1.bf16.msra.mxu1 %v6914_v5 }
 0x174   :  { %4599 = vmatprep.subr.bf16.mxu1 %v6923_v6 }
 0x177   :  { %4600 = vmatpush1.bf16.msra.mxu1 %v6922_v9 }
 0x178   :  { %4601 = vmatprep.subr.bf16.mxu1 %v6931_v10 }
 0x17b   :  { %4602 = vmatpush1.bf16.msra.mxu1 %v6930_v13 }
 0x17c   :  { %4603 = vmatprep.subr.bf16.mxu1 %v6939_v17 }
 0x17f   :  { %4604 = vmatpush1.bf16.msra.mxu1 %v6938_v20 }
 0x180   :  { %4614 = vmatprep.subr.bf16.mxu1 %v6947_v23 }
 0x195   :  { %v969_v33 = vpop.f32.mrb[0].mxu1 }
 0x196   :  { %v970_v34 = vadd.f32 %v969_v33, %v258_v31  ;;  %v971_v35 = vpop.f32.mrb[1].mxu1 }
 0x197   :  { %v972_v36 = vadd.f32 %v971_v35, %v262_v32  ;;  %v973_v37 = vpop.f32.mrb[2].mxu1  ;;  %v8280_v2 = vpop.f32.mrb[0].mxu0 }
 0x198   :  { %v1099_v62 = vmax.f32 %v970_v34, 0.0  ;;  %v974_v38 = vpop.f32.mrb[3].mxu1  ;;  %v1053_v5 = vpop.f32.mrb[1].mxu0 }
 0x199   :  { %v1100_v39 = vmax.f32 %v972_v36, 0.0  ;;  %v1055_v8 = vpop.f32.mrb[2].mxu0  ;;  %v1428_v36 = vld [vmem:[#allocation7 + $0x440] sm:$0xff]  ;;  %v1054_v37 = vadd.f32 %v1053_v5, %v278_v27 }
 0x19a   :  { %v1107_v40 = vrot.slane %v1099_v62, 4  ;;  %v1164_v41 = vmul.f32 %v1099_v62, %v1099_v62  ;;  %v1056_v11 = vpop.f32.mrb[3].mxu0  ;;  %v1460_v5 = vld [vmem:[#allocation7 + $0x540] sm:$0xff] }
 0x19b   :  { %v1113_v42 = vrot.slane %v1100_v39, 4  ;;  %v1165_v43 = vmul.f32 %v1100_v39, %v1100_v39  ;;  %v1464_v8 = vld [vmem:[#allocation7 + $0x560] sm:$0xff] }
 0x19c   :  { %v1108_v44 = vadd.f32 %v1107_v40, %v1099_v62  ;;  %v1172_v45 = vrot.slane %v1164_v41, 4  ;;  %v1432_v40 = vld [vmem:[#allocation7 + $0x460] sm:$0xff] }
 0x19d   :  { %v1114_v46 = vadd.f32 %v1113_v42, %v1100_v39  ;;  %v1178_v47 = vrot.slane %v1165_v43, 4  ;;  %v1433_v42 = vld [vmem:[#allocation7 + $0x468] sm:$0xff] }
 0x19e   :  { %v1109_v48 = vrot.slane %v1108_v44, 2  ;;  %v1173_v49 = vadd.f32 %v1172_v45, %v1164_v41  ;;  %v1429_v41 = vld [vmem:[#allocation7 + $0x448] sm:$0xff]  ;;  %v6953_v45 = vcombine.high %v1428_v36, %v1432_v40 }
 0x19f   :  { %v1115_v50 = vrot.slane %v1114_v46, 2  ;;  %v1179_v51 = vadd.f32 %v1178_v47, %v1165_v43  ;;  %v1436_v47 = vld [vmem:[#allocation7 + $0x480] sm:$0xff] }
 0x1a0   :  { %v1110_v52 = vadd.f32 %v1109_v48, %v1108_v44  ;;  %v1174_v53 = vrot.slane %v1173_v49, 2  ;;  %v8290_v48 = vmax.f32 %v1054_v37, 0.0 }
 0x1a1   :  { %v1116_v18 = vadd.f32 %v1115_v50, %v1114_v46  ;;  %v1180_v54 = vrot.slane %v1179_v51, 2  ;;  %v6955_v46 = vcombine.high %v1429_v41, %v1433_v42  ;;  %v6952_v50 = vcombine.low %v1428_v36, %v1432_v40 }
 0x1a2   :  { %v1111_v55 = vrot.slane %v1110_v52, 1  ;;  %v1175_v56 = vadd.f32 %v1174_v53, %v1173_v49  ;;  %v1441_v49 = vld [vmem:[#allocation7 + $0x4a8] sm:$0xff] }
 0x1a3   :  { %v1117_v57 = vrot.slane %v1116_v18, 1  ;;  %v1181_v58 = vadd.f32 %v1180_v54, %v1179_v51  ;;  %v6954_v51 = vcombine.low %v1429_v41, %v1433_v42  ;;  %v1137_v54 = vrot.slane %v8290_v48, 4  ;;  %v1476_v42 = vld [vmem:[#allocation7 + $0x5c0] sm:$0xff] }
 0x1a4   :  { %v1112_v59 = vadd.f32 %v1111_v55, %v1110_v52  ;;  %v1176_v60 = vrot.slane %v1175_v56, 1  ;;  %v1169_v55 = vmul.f32 %v8290_v48, %v8290_v48 }
 0x1a5   :  { %v1118_v61 = vadd.f32 %v1117_v57, %v1116_v18  ;;  %v1182_v63 = vrot.slane %v1181_v58, 1  ;;  %v1444_v18 = vld [vmem:[#allocation7 + $0x4c0] sm:$0xff]  ;;  %v1445_v57 = vld [vmem:[#allocation7 + $0x4c8] sm:$0xff] }
 0x1a6   :  { %v1156_v0 = vmul.f32 0.125, %v1112_v59  ;;  %v1177_v1 = vadd.f32 %v1176_v60, %v1175_v56  ;;  %v1448_v56 = vld [vmem:[#allocation7 + $0x4e0] sm:$0xff]  ;;  %v1202_v59 = vrot.slane %v1169_v55, 4 }
 0x1a7   :  { %v1157_v3 = vmul.f32 0.125, %v1118_v61  ;;  %v1183_v4 = vadd.f32 %v1182_v63, %v1181_v58  ;;  %v6969_v19 = vcombine.high %v1444_v18, %v1448_v56  ;;  %v1138_v58 = vadd.f32 %v1137_v54, %v8290_v48  ;;  %v1456_v60 = vld [vmem:[#allocation7 + $0x520] sm:$0xff]  ;;  %v1453_v61 = vld [vmem:[#allocation7 + $0x508] sm:$0xff] }
 0x1a8   :  { %v1220_v6 = vmul.f32 0.125, %v1177_v1  ;;  %v1228_v7 = vmul.f32 %v1156_v0, %v1156_v0  ;;  %v1252_v31 = vsub.f32 %v1099_v62, %v1156_v0  ;;  %v1440_v62 = vld [vmem:[#allocation7 + $0x4a0] sm:$0xff]  ;;  %v1457_v63 = vld [vmem:[#allocation7 + $0x528] sm:$0xff]  ;;  %v6968_v0 = vcombine.low %v1444_v18, %v1448_v56 }
 0x1a9   :  { %v1221_v9 = vmul.f32 0.125, %v1183_v4  ;;  %v1229_v10 = vmul.f32 %v1157_v3, %v1157_v3  ;;  %v1253_v33 = vsub.f32 %v1100_v39, %v1157_v3  ;;  %v1437_v39 = vld [vmem:[#allocation7 + $0x488] sm:$0xff]  ;;  %v6961_v52 = vcombine.high %v1436_v47, %v1440_v62  ;;  %v1484_v54 = vld [vmem:[#allocation7 + $0x600] sm:$0xff] }
 0x1aa   :  { %v1236_v12 = vsub.f32 %v1220_v6, %v1228_v7  ;;  %v6963_v53 = vcombine.high %v1437_v39, %v1441_v49  ;;  %v6960_v15 = vcombine.low %v1436_v47, %v1440_v62  ;;  %v6962_v16 = vcombine.low %v1437_v39, %v1441_v49  ;;  %v1477_v62 = vld [vmem:[#allocation7 + $0x5c8] sm:$0xff] }
 0x1ab   :  { %v1237_v13 = vsub.f32 %v1221_v9, %v1229_v10  ;;  %v6970_v1 = vcombine.low %v1445_v57, %v1449_v14  ;;  %v6979_v4 = vcombine.high %v1453_v61, %v1457_v63  ;;  %v1139_v6 = vrot.slane %v1138_v58, 2  ;;  %v1461_v9 = vld [vmem:[#allocation7 + $0x548] sm:$0xff] }
 0x1ac   :  { %v1244_v17 = vmax.f32 %v1236_v12, 0.0  ;;  %v1203_v7 = vadd.f32 %v1202_v59, %v1169_v55  ;;  %v1465_v10 = vld [vmem:[#allocation7 + $0x568] sm:$0xff]  ;;  %v6978_v12 = vcombine.low %v1453_v61, %v1457_v63 }
 0x1ad   :  { %v1245_v20 = vmax.f32 %v1237_v13, 0.0  ;;  %v265_v13 = vsub.s32 2, %v8266_v25  ;;  %v1140_v27 = vadd.f32 %v1139_v6, %v1138_v58  ;;  %v6986_v36 = vcombine.low %v1461_v9, %v1465_v10  ;;  %v1481_v39 = vld [vmem:[#allocation7 + $0x5e8] sm:$0xff] }
 0x1ae   :  { %v1260_v23 = vadd.f32 1e-05, %v1244_v17  ;;  %v269_v17 = vsub.s32 3, %v8266_v25  ;;  %v7002_v61 = vcombine.low %v1477_v62, %v1481_v39 }
 0x1af   :  { %v1261_v24 = vadd.f32 1e-05, %v1245_v20  ;;  %v6985_v20 = vcombine.high %v1460_v5, %v1464_v8  ;;  %v266_v37 = vrot.slane %v8268_v28, %v265_v13 }
 0x1b0   :  { %7866 = vrsqrt.f32 %v1260_v23  ;;  %v6987_v23 = vcombine.high %v1461_v9, %v1465_v10  ;;  %v1497_v9 = vld [vmem:[#allocation7 + $0x668] sm:$0xff] }
 0x1b1   :  { %7868 = vrsqrt.f32 %v1261_v24  ;;  %v1468_v24 = vld [vmem:[#allocation7 + $0x580] sm:$0xff] }
 0x1ba   :  { %v7867_v32 = vpop.eup %7866 }
 0x1bb   :  { %v7869_v34 = vpop.eup %7868  ;;  %v1276_v35 = vmul.f32 %v7867_v32, %v1252_v31  ;;  %v1204_v31 = vrot.slane %v1203_v7, 2  ;;  %v1472_v32 = vld [vmem:[#allocation7 + $0x5a0] sm:$0xff] }
 0x1bc   :  { %v1277_v38 = vmul.f32 %v7869_v34, %v1253_v33  ;;  %v1469_v33 = vld [vmem:[#allocation7 + $0x588] sm:$0xff]  ;;  %v6993_v40 = vcombine.high %v1468_v24, %v1472_v32 }
 0x1bd   :  { %v8288_v44 = vpack.c.bf16 %v1276_v35, %v1276_v35  ;;  %v1473_v34 = vld [vmem:[#allocation7 + $0x5a8] sm:$0xff]  ;;  %v6984_v35 = vcombine.low %v1460_v5, %v1464_v8  ;;  %v1205_v47 = vadd.f32 %v1204_v31, %v1203_v7  ;;  %v1496_v7 = vld [vmem:[#allocation7 + $0x660] sm:$0xff] }
 0x1be   :  { %v8286_v43 = vpack.c.bf16 %v1277_v38, %v1277_v38  ;;  %v270_v38 = vrot.slane %v8268_v28, %v269_v17  ;;  %v6995_v41 = vcombine.high %v1469_v33, %v1473_v34  ;;  %v1493_v8 = vld [vmem:[#allocation7 + $0x648] sm:$0xff] }
 0x1c0   :  { %4441 = vmatprep.mubr.bf16.mxu0 %v8286_v43  ;;  %4605 = vmatprep.mubr.bf16.mxu1 %v8286_v43 }
 0x1c1   :  { %4442 = vmatmul.mubr.bf16.vlgmr.msra.gmra.mrb[4].mxu0 %v8288_v44  ;;  %4606 = vmatmul.mubr.bf16.vlgmr.msra.gmra.mrb[12].mxu1 %v8288_v44 }
 0x1c2   :  { %4451 = vmatpush1.bf16.msra.mxu0 %v6944_v21  ;;  %4615 = vmatpush1.bf16.msra.mxu1 %v6946_v22  ;;  %v6971_v21 = vcombine.high %v1445_v57, %v1449_v14  ;;  %v1452_v22 = vld [vmem:[#allocation7 + $0x500] sm:$0xff]  ;;  %v7003_v57 = vcombine.high %v1477_v62, %v1481_v39  ;;  %v1505_v62 = vld [vmem:[#allocation7 + $0x6a8] sm:$0xff] }
 0x1c3   :  { %4452 = vmatprep.subr.bf16.mxu0 %v6953_v45  ;;  %4616 = vmatprep.subr.bf16.mxu1 %v6955_v46  ;;  %v6977_v3 = vcombine.high %v1452_v22, %v1456_v60  ;;  %v6976_v11 = vcombine.low %v1452_v22, %v1456_v60  ;;  %v1480_v45 = vld [vmem:[#allocation7 + $0x5e0] sm:$0xff]  ;;  %v1141_v46 = vrot.slane %v1140_v27, 1 }
 0x1c4   :  { %v7001_v18 = vcombine.high %v1476_v42, %v1480_v45  ;;  %v1488_v14 = vld [vmem:[#allocation7 + $0x620] sm:$0xff]  ;;  %v7000_v60 = vcombine.low %v1476_v42, %v1480_v45 }
 0x1c6   :  { %4453 = vmatpush1.bf16.msra.mxu0 %v6952_v50  ;;  %4617 = vmatpush1.bf16.msra.mxu1 %v6954_v51  ;;  %v6992_v50 = vcombine.low %v1468_v24, %v1472_v32 }
 0x1c7   :  { %4454 = vmatprep.subr.bf16.mxu0 %v6961_v52  ;;  %4618 = vmatprep.subr.bf16.mxu1 %v6963_v53  ;;  %v6994_v53 = vcombine.low %v1469_v33, %v1473_v34 }
 0x1ca   :  { %4455 = vmatpush1.bf16.msra.mxu0 %v6960_v15  ;;  %4619 = vmatpush1.bf16.msra.mxu1 %v6962_v16  ;;  %v1485_v15 = vld [vmem:[#allocation7 + $0x608] sm:$0xff] }
 0x1cb   :  { %4456 = vmatprep.subr.bf16.mxu0 %v6969_v19  ;;  %4620 = vmatprep.subr.bf16.mxu1 %v6971_v21  ;;  %v1489_v16 = vld [vmem:[#allocation7 + $0x628] sm:$0xff]  ;;  %v1142_v19 = vadd.f32 %v1141_v46, %v1140_v27  ;;  %v1206_v21 = vrot.slane %v1205_v47, 1  ;;  %v7008_v27 = vcombine.low %v1484_v54, %v1488_v14 }
 0x1cc   :  { %v7010_v31 = vcombine.low %v1485_v15, %v1489_v16 }
 0x1cd   :  { %v8324_v10 = vmul.f32 0.125, %v1142_v19 }
 0x1ce   :  { %4457 = vmatpush1.bf16.msra.mxu0 %v6968_v0  ;;  %4621 = vmatpush1.bf16.msra.mxu1 %v6970_v1  ;;  %v7009_v1 = vcombine.high %v1484_v54, %v1488_v14  ;;  %v1512_v14 = vld [vmem:[#allocation7 + $0x6e0] sm:$0xff] }
 0x1cf   :  { %4458 = vmatprep.subr.bf16.mxu0 %v6977_v3  ;;  %4622 = vmatprep.subr.bf16.mxu1 %v6979_v4  ;;  %v7011_v3 = vcombine.high %v1485_v15, %v1489_v16  ;;  %v1492_v4 = vld [vmem:[#allocation7 + $0x640] sm:$0xff]  ;;  %v1233_v42 = vmul.f32 %v8324_v10, %v8324_v10 }
 0x1d0   :  { %v7017_v34 = vcombine.high %v1492_v4, %v1496_v7 }
 0x1d2   :  { %4459 = vmatpush1.bf16.msra.mxu0 %v6976_v11  ;;  %4623 = vmatpush1.bf16.msra.mxu1 %v6978_v12  ;;  %v1207_v11 = vadd.f32 %v1206_v21, %v1205_v47  ;;  %v1501_v47 = vld [vmem:[#allocation7 + $0x688] sm:$0xff] }
 0x1d3   :  { %4460 = vmatprep.subr.bf16.mxu0 %v6985_v20  ;;  %4624 = vmatprep.subr.bf16.mxu1 %v6987_v23  ;;  %v1509_v21 = vld [vmem:[#allocation7 + $0x6c8] sm:$0xff] }
 0x1d5   :  { %v1010_v49 = vpop.f32.mrb[4].mxu1 }
 0x1d6   :  { %v1011_v51 = vadd.f32 %v1010_v49, %v266_v37  ;;  %4461 = vmatpush1.bf16.msra.mxu0 %v6984_v35  ;;  %4625 = vmatpush1.bf16.msra.mxu1 %v6986_v36  ;;  %v1012_v52 = vpop.f32.mrb[5].mxu1  ;;  %v7019_v35 = vcombine.high %v1493_v8, %v1497_v9 }
 0x1d7   :  { %v1013_v55 = vadd.f32 %v1012_v52, %v270_v38  ;;  %v1014_v56 = vpop.f32.mrb[6].mxu1  ;;  %4462 = vmatprep.subr.bf16.mxu0 %v6993_v40  ;;  %4626 = vmatprep.subr.bf16.mxu1 %v6995_v41  ;;  %v1500_v38 = vld [vmem:[#allocation7 + $0x680] sm:$0xff]  ;;  %v1225_v41 = vmul.f32 0.125, %v1207_v11 }
 0x1d8   :  { %v8314_v22 = vmax.f32 %v1011_v51, 0.0  ;;  %v1015_v58 = vpop.f32.mrb[7].mxu1  ;;  %v1504_v40 = vld [vmem:[#allocation7 + $0x6a0] sm:$0xff]  ;;  %v7027_v56 = vcombine.high %v1501_v47, %v1505_v62 }
 0x1d9   :  { %v8316_v59 = vmax.f32 %v1013_v55, 0.0  ;;  %v1241_v15 = vsub.f32 %v1225_v41, %v1233_v42  ;;  %v1513_v58 = vld [vmem:[#allocation7 + $0x6e8] sm:$0xff]  ;;  %v1528_v42 = vld [vmem:[#allocation7 + $0x760] sm:$0xff] }
 0x1da   :  { %v1119_v63 = vrot.slane %v8314_v22, 4  ;;  %v1166_v0 = vmul.f32 %v8314_v22, %v8314_v22  ;;  %4463 = vmatpush1.bf16.msra.mxu0 %v6992_v50  ;;  %4627 = vmatpush1.bf16.msra.mxu1 %v6994_v53  ;;  %v7016_v50 = vcombine.low %v1492_v4, %v1496_v7  ;;  %v7018_v53 = vcombine.low %v1493_v8, %v1497_v9  ;;  %v1516_v8 = vld [vmem:[#allocation7 + $0x700] sm:$0xff] }
 0x1db   :  { %v1125_v5 = vrot.slane %v8316_v59, 4  ;;  %v1167_v6 = vmul.f32 %v8316_v59, %v8316_v59  ;;  %4464 = vmatprep.subr.bf16.mxu0 %v7001_v18  ;;  %4628 = vmatprep.subr.bf16.mxu1 %v7003_v57  ;;  %v7025_v18 = vcombine.high %v1500_v38, %v1504_v40  ;;  %v1508_v57 = vld [vmem:[#allocation7 + $0x6c0] sm:$0xff]  ;;  %v7035_v7 = vcombine.high %v1509_v21, %v1513_v58 }
 0x1dc   :  { %v1120_v12 = vadd.f32 %v1119_v63, %v8314_v22  ;;  %v1184_v20 = vrot.slane %v1166_v0, 4  ;;  %v7024_v63 = vcombine.low %v1500_v38, %v1504_v40  ;;  %v7033_v4 = vcombine.high %v1508_v57, %v1512_v14  ;;  %v1524_v38 = vld [vmem:[#allocation7 + $0x740] sm:$0xff] }
 0x1dd   :  { %v1126_v23 = vadd.f32 %v1125_v5, %v8316_v59  ;;  %v1190_v24 = vrot.slane %v1167_v6, 4  ;;  %v1249_v9 = vmax.f32 %v1241_v15, 0.0 }
 0x1de   :  { %v1121_v32 = vrot.slane %v1120_v12, 2  ;;  %v1185_v33 = vadd.f32 %v1184_v20, %v1166_v0  ;;  %4465 = vmatpush1.bf16.msra.mxu0 %v7000_v60  ;;  %4629 = vmatpush1.bf16.msra.mxu1 %v7002_v61  ;;  %v1520_v20 = vld [vmem:[#allocation7 + $0x720] sm:$0xff] }
 0x1df   :  { %v1127_v36 = vrot.slane %v1126_v23, 2  ;;  %v1191_v37 = vadd.f32 %v1190_v24, %v1167_v6  ;;  %4466 = vmatprep.subr.bf16.mxu0 %v7009_v1  ;;  %4630 = vmatprep.subr.bf16.mxu1 %v7011_v3  ;;  %v7026_v3 = vcombine.low %v1501_v47, %v1505_v62  ;;  %v1521_v24 = vld [vmem:[#allocation7 + $0x728] sm:$0xff]  ;;  %v1265_v40 = vadd.f32 1e-05, %v1249_v9 }
 0x1e0   :  { %v1122_v45 = vadd.f32 %v1121_v32, %v1120_v12  ;;  %v1186_v46 = vrot.slane %v1185_v33, 2  ;;  %v1549_v9 = vld [vmem:[#allocation7 + $0x808] sm:$0xff] }
 0x1e1   :  { %v1128_v39 = vadd.f32 %v1127_v36, %v1126_v23  ;;  %v1192_v49 = vrot.slane %v1191_v37, 2  ;;  %v1517_v23 = vld [vmem:[#allocation7 + $0x708] sm:$0xff]  ;;  %v7041_v36 = vcombine.high %v1516_v8, %v1520_v20  ;;  %7870 = vrsqrt.f32 %v1265_v40 }
 0x1e2   :  { %v1123_v51 = vrot.slane %v1122_v45, 1  ;;  %v1187_v52 = vadd.f32 %v1186_v46, %v1185_v33  ;;  %4467 = vmatpush1.bf16.msra.mxu0 %v7008_v27  ;;  %4631 = vmatpush1.bf16.msra.mxu1 %v7010_v31  ;;  %v7032_v33 = vcombine.low %v1508_v57, %v1512_v14  ;;  %v1529_v46 = vld [vmem:[#allocation7 + $0x768] sm:$0xff]  ;;  %v273_v14 = vsub.s32 4, %v8266_v25 }
 0x1e3   :  { %v1129_v54 = vrot.slane %v1128_v39, 1  ;;  %v1193_v55 = vadd.f32 %v1192_v49, %v1191_v37  ;;  %4468 = vmatprep.subr.bf16.mxu0 %v7017_v34  ;;  %4632 = vmatprep.subr.bf16.mxu1 %v7019_v35  ;;  %v7034_v34 = vcombine.low %v1509_v21, %v1513_v58  ;;  %v7043_v37 = vcombine.high %v1517_v23, %v1521_v24  ;;  %v1544_v21 = vld [vmem:[#allocation7 + $0x7e0] sm:$0xff]  ;;  %v1541_v58 = vld [vmem:[#allocation7 + $0x7c8] sm:$0xff] }
 0x1e4   :  { %v1124_v16 = vadd.f32 %v1123_v51, %v1122_v45  ;;  %v1188_v19 = vrot.slane %v1187_v52, 1  ;;  %v1525_v45 = vld [vmem:[#allocation7 + $0x748] sm:$0xff]  ;;  %v7042_v49 = vcombine.low %v1517_v23, %v1521_v24  ;;  %v7049_v51 = vcombine.high %v1524_v38, %v1528_v42 }
 0x1e5   :  { %v1130_v60 = vadd.f32 %v1129_v54, %v1128_v39  ;;  %v1194_v61 = vrot.slane %v1193_v55, 1  ;;  %v7040_v39 = vcombine.low %v1516_v8, %v1520_v20  ;;  %v1533_v54 = vld [vmem:[#allocation7 + $0x788] sm:$0xff]  ;;  %v7050_v57 = vcombine.low %v1525_v45, %v1529_v46  ;;  %v1552_v8 = vld [vmem:[#allocation7 + $0x820] sm:$0xff] }
 0x1e6   :  { %v8330_v0 = vmul.f32 0.125, %v1124_v16  ;;  %v1189_v1 = vadd.f32 %v1188_v19, %v1187_v52  ;;  %4469 = vmatpush1.bf16.msra.mxu0 %v7016_v50  ;;  %4633 = vmatpush1.bf16.msra.mxu1 %v7018_v53  ;;  %v7051_v52 = vcombine.high %v1525_v45, %v1529_v46  ;;  %v1532_v53 = vld [vmem:[#allocation7 + $0x780] sm:$0xff] }
 0x1e7   :  { %v8332_v5 = vmul.f32 0.125, %v1130_v60  ;;  %v1195_v6 = vadd.f32 %v1194_v61, %v1193_v55  ;;  %4470 = vmatprep.subr.bf16.mxu0 %v7025_v18  ;;  %4634 = vmatprep.subr.bf16.mxu1 %v7027_v56  ;;  %v1536_v18 = vld [vmem:[#allocation7 + $0x7a0] sm:$0xff]  ;;  %v1537_v55 = vld [vmem:[#allocation7 + $0x7a8] sm:$0xff]  ;;  %v7048_v56 = vcombine.low %v1524_v38, %v1528_v42  ;;  %v274_v61 = vrot.slane %v8268_v28, %v273_v14 }
 0x1e8   :  { %v1222_v11 = vmul.f32 0.125, %v1189_v1  ;;  %v1230_v12 = vmul.f32 %v8330_v0, %v8330_v0  ;;  %v7057_v15 = vcombine.high %v1532_v53, %v1536_v18  ;;  %v7059_v16 = vcombine.high %v1533_v54, %v1537_v55  ;;  %v1540_v19 = vld [vmem:[#allocation7 + $0x7c0] sm:$0xff]  ;;  %v1545_v60 = vld [vmem:[#allocation7 + $0x7e8] sm:$0xff] }
 0x1e9   :  { %v1223_v27 = vmul.f32 0.125, %v1195_v6  ;;  %v1231_v31 = vmul.f32 %v8332_v5, %v8332_v5  ;;  %v7058_v1 = vcombine.low %v1533_v54, %v1537_v55  ;;  %v1548_v6 = vld [vmem:[#allocation7 + $0x800] sm:$0xff]  ;;  %v1254_v20 = vsub.f32 %v8314_v22, %v8330_v0  ;;  %v1557_v22 = vld [vmem:[#allocation7 + $0x848] sm:$0xff] }
 0x1ea   :  { %v1238_v32 = vsub.f32 %v1222_v11, %v1230_v12  ;;  %4471 = vmatpush1.bf16.msra.mxu0 %v7024_v63  ;;  %4635 = vmatpush1.bf16.msra.mxu1 %v7026_v3  ;;  %v7056_v63 = vcombine.low %v1532_v53, %v1536_v18  ;;  %v7065_v3 = vcombine.high %v1540_v19, %v1544_v21  ;;  %v1553_v11 = vld [vmem:[#allocation7 + $0x828] sm:$0xff]  ;;  %v1564_v46 = vld [vmem:[#allocation7 + $0x880] sm:$0xff] }
 0x1eb   :  { %v1239_v35 = vsub.f32 %v1223_v27, %v1231_v31  ;;  %4472 = vmatprep.subr.bf16.mxu0 %v7033_v4  ;;  %4636 = vmatprep.subr.bf16.mxu1 %v7035_v7  ;;  %v7067_v4 = vcombine.high %v1541_v58, %v1545_v60  ;;  %v1257_v7 = vsub.f32 %v8290_v48, %v8324_v10  ;;  %v7871_v12 = vpop.eup %7870  ;;  %v1561_v0 = vld [vmem:[#allocation7 + $0x868] sm:$0xff]  ;;  %v1572_v55 = vld [vmem:[#allocation7 + $0x8c0] sm:$0xff] }
 0x1ec   :  { %v1246_v41 = vmax.f32 %v1238_v32, 0.0  ;;  %v7064_v23 = vcombine.low %v1540_v19, %v1544_v21  ;;  %v1255_v27 = vsub.f32 %v8316_v59, %v8332_v5  ;;  %v1052_v31 = vadd.f32 %v8280_v2, %v274_v61 }
 0x1ed   :  { %v1247_v47 = vmax.f32 %v1239_v35, 0.0  ;;  %v7066_v32 = vcombine.low %v1541_v58, %v1545_v60  ;;  %v7073_v48 = vcombine.high %v1548_v6, %v1552_v8  ;;  %v7075_v10 = vcombine.high %v1549_v9, %v1553_v11  ;;  %v1556_v35 = vld [vmem:[#allocation7 + $0x840] sm:$0xff] }
 0x1ee   :  { %v1262_v62 = vadd.f32 1e-05, %v1246_v41  ;;  %4473 = vmatpush1.bf16.msra.mxu0 %v7032_v33  ;;  %4637 = vmatpush1.bf16.msra.mxu1 %v7034_v34  ;;  %v1281_v38 = vmul.f32 %v7871_v12, %v1257_v7  ;;  %v8349_v40 = vmax.f32 %v1052_v31, 0.0  ;;  %v7072_v59 = vcombine.low %v1548_v6, %v1552_v8 }
 0x1ef   :  { %v1263_v50 = vadd.f32 1e-05, %v1247_v47  ;;  %4474 = vmatprep.subr.bf16.mxu0 %v7041_v36  ;;  %4638 = vmatprep.subr.bf16.mxu1 %v7043_v37  ;;  %v1560_v37 = vld [vmem:[#allocation7 + $0x860] sm:$0xff]  ;;  %v7074_v5 = vcombine.low %v1549_v9, %v1553_v11  ;;  %v7083_v45 = vcombine.high %v1557_v22, %v1561_v0  ;;  %v7082_v53 = vcombine.low %v1557_v22, %v1561_v0  ;;  %v1597_v22 = vld [vmem:[#allocation7 + $0x988] sm:$0xff] }
 0x1f0   :  { %7872 = vrsqrt.f32 %v1262_v62  ;;  %v7081_v42 = vcombine.high %v1556_v35, %v1560_v37  ;;  %v1568_v47 = vld [vmem:[#allocation7 + $0x8a0] sm:$0xff]  ;;  %v1565_v62 = vld [vmem:[#allocation7 + $0x888] sm:$0xff] }
 0x1f1   :  { %7874 = vrsqrt.f32 %v1263_v50  ;;  %v1131_v50 = vrot.slane %v8349_v40, 4  ;;  %v7089_v18 = vcombine.high %v1564_v46, %v1568_v47  ;;  %v7088_v21 = vcombine.low %v1564_v46, %v1568_v47  ;;  %v1601_v0 = vld [vmem:[#allocation7 + $0x9a8] sm:$0xff]  ;;  %v1604_v47 = vld [vmem:[#allocation7 + $0x9c0] sm:$0xff] }
 0x1f2   :  { %4475 = vmatpush1.bf16.msra.mxu0 %v7040_v39  ;;  %4639 = vmatpush1.bf16.msra.mxu1 %v7042_v49  ;;  %v1569_v39 = vld [vmem:[#allocation7 + $0x8a8] sm:$0xff]  ;;  %v8357_v49 = vpack.c.bf16 %v1281_v38, %v1281_v38  ;;  %v7123_v46 = vcombine.high %v1597_v22, %v1601_v0 }
 0x1f3   :  { %4476 = vmatprep.subr.bf16.mxu0 %v7049_v51  ;;  %4640 = vmatprep.subr.bf16.mxu1 %v7051_v52  ;;  %v1168_v51 = vmul.f32 %v8349_v40, %v8349_v40  ;;  %v7080_v52 = vcombine.low %v1556_v35, %v1560_v37  ;;  %v7091_v54 = vcombine.high %v1565_v62, %v1569_v39  ;;  %v1596_v35 = vld [vmem:[#allocation7 + $0x980] sm:$0xff] }
 0x1f4   :  { %v7090_v58 = vcombine.low %v1565_v62, %v1569_v39  ;;  %v1600_v37 = vld [vmem:[#allocation7 + $0x9a0] sm:$0xff] }
 0x1f5   :  { %v1196_v19 = vrot.slane %v1168_v51, 4  ;;  %v1608_v39 = vld [vmem:[#allocation7 + $0x9e0] sm:$0xff] }
 0x1f6   :  { %4477 = vmatpush1.bf16.msra.mxu0 %v7048_v56  ;;  %4641 = vmatpush1.bf16.msra.mxu1 %v7050_v57  ;;  %v1576_v56 = vld [vmem:[#allocation7 + $0x8e0] sm:$0xff]  ;;  %v1573_v57 = vld [vmem:[#allocation7 + $0x8c8] sm:$0xff] }
 0x1f7   :  { %4478 = vmatprep.subr.bf16.mxu0 %v7057_v15  ;;  %4642 = vmatprep.subr.bf16.mxu1 %v7059_v16  ;;  %v1577_v15 = vld [vmem:[#allocation7 + $0x8e8] sm:$0xff]  ;;  %v1132_v16 = vadd.f32 %v1131_v50, %v8349_v40  ;;  %v7097_v60 = vcombine.high %v1572_v55, %v1576_v56  ;;  %v1197_v7 = vadd.f32 %v1196_v19, %v1168_v51 }
 0x1f8   :  { %v7099_v61 = vcombine.high %v1573_v57, %v1577_v15  ;;  %v7096_v8 = vcombine.low %v1572_v55, %v1576_v56  ;;  %v7098_v9 = vcombine.low %v1573_v57, %v1577_v15  ;;  %v1605_v50 = vld [vmem:[#allocation7 + $0x9c8] sm:$0xff]  ;;  %v7122_v55 = vcombine.low %v1597_v22, %v1601_v0  ;;  %v1628_v22 = vld [vmem:[#allocation7 + $0xa80] sm:$0xff] }
 0x1f9   :  { %v1133_v6 = vrot.slane %v1132_v16, 2  ;;  %v1609_v51 = vld [vmem:[#allocation7 + $0x9e8] sm:$0xff]  ;;  %v7129_v57 = vcombine.high %v1604_v47, %v1608_v39 }
 0x1fa   :  { %v7873_v24 = vpop.eup %7872  ;;  %4479 = vmatpush1.bf16.msra.mxu0 %v7056_v63  ;;  %4643 = vmatpush1.bf16.msra.mxu1 %v7058_v1  ;;  %v1580_v63 = vld [vmem:[#allocation7 + $0x900] sm:$0xff]  ;;  %v7131_v15 = vcombine.high %v1605_v50, %v1609_v51 }
 0x1fb   :  { %v7875_v33 = vpop.eup %7874  ;;  %4480 = vmatprep.subr.bf16.mxu0 %v7065_v3  ;;  %4644 = vmatprep.subr.bf16.mxu1 %v7067_v4  ;;  %v1278_v34 = vmul.f32 %v7873_v24, %v1254_v20  ;;  %v1584_v1 = vld [vmem:[#allocation7 + $0x920] sm:$0xff]  ;;  %v1581_v3 = vld [vmem:[#allocation7 + $0x908] sm:$0xff]  ;;  %v1134_v31 = vadd.f32 %v1133_v6, %v1132_v16  ;;  %v7128_v6 = vcombine.low %v1604_v47, %v1608_v39 }
 0x1fc   :  { %v1279_v36 = vmul.f32 %v7875_v33, %v1255_v27  ;;  %v1585_v4 = vld [vmem:[#allocation7 + $0x928] sm:$0xff]  ;;  %v7105_v11 = vcombine.high %v1580_v63, %v1584_v1  ;;  %v1588_v20 = vld [vmem:[#allocation7 + $0x940] sm:$0xff]  ;;  %v7104_v33 = vcombine.low %v1580_v63, %v1584_v1 }
 0x1fd   :  { %v8353_v41 = vpack.c.bf16 %v1278_v34, %v1278_v34  ;;  %v7107_v12 = vcombine.high %v1581_v3, %v1585_v4  ;;  %v1589_v24 = vld [vmem:[#allocation7 + $0x948] sm:$0xff]  ;;  %v1135_v38 = vrot.slane %v1134_v31, 1  ;;  %v1612_v16 = vld [vmem:[#allocation7 + $0xa00] sm:$0xff] }
 0x1fe   :  { %4481 = vmatpush1.bf16.msra.mxu0 %v7064_v23  ;;  %4645 = vmatpush1.bf16.msra.mxu1 %v7066_v32  ;;  %v8351_v2 = vpack.c.bf16 %v1279_v36, %v1279_v36  ;;  %v1592_v23 = vld [vmem:[#allocation7 + $0x960] sm:$0xff]  ;;  %v1593_v27 = vld [vmem:[#allocation7 + $0x968] sm:$0xff]  ;;  %v1198_v32 = vrot.slane %v1197_v7, 2  ;;  %v285_v36 = vsub.s32 7, %v8266_v25 }
 0x1ff   :  { %4491 = vmatprep.subr.bf16.mxu0 %v7073_v48  ;;  %4655 = vmatprep.subr.bf16.mxu1 %v7075_v10  ;;  %v7106_v48 = vcombine.low %v1581_v3, %v1585_v4  ;;  %v7113_v10 = vcombine.high %v1588_v20, %v1592_v23  ;;  %v7115_v34 = vcombine.high %v1589_v24, %v1593_v27 }
 0x200   :  { %4482 = vmatprep.mubr.bf16.mxu0 %v8351_v2  ;;  %4646 = vmatprep.mubr.bf16.mxu1 %v8351_v2  ;;  %v286_v62 = vrot.slane %v8268_v28, %v285_v36 }
 0x201   :  { %4483 = vmatmul.mubr.bf16.vlgmr.msra.gmra.mrb[4].mxu0 %v8353_v41  ;;  %4647 = vmatmul.mubr.bf16.vlgmr.msra.gmra.mrb[12].mxu1 %v8353_v41 }
 0x202   :  { %4492 = vmatpush1.bf16.msra.mxu0 %v7072_v59  ;;  %4656 = vmatpush1.bf16.msra.mxu1 %v7074_v5  ;;  %v1199_v59 = vadd.f32 %v1198_v32, %v1197_v7  ;;  %v7112_v5 = vcombine.low %v1588_v20, %v1592_v23  ;;  %v7130_v7 = vcombine.low %v1605_v50, %v1609_v51  ;;  %v1624_v23 = vld [vmem:[#allocation7 + $0xa60] sm:$0xff] }
 0x203   :  { %4493 = vmatprep.subr.bf16.mxu0 %v7081_v42  ;;  %4657 = vmatprep.subr.bf16.mxu1 %v7083_v45  ;;  %v7114_v42 = vcombine.low %v1589_v24, %v1593_v27  ;;  %v7121_v45 = vcombine.high %v1596_v35, %v1600_v37  ;;  %v1621_v24 = vld [vmem:[#allocation7 + $0xa48] sm:$0xff] }
 0x204   :  { %4523 = vmatprep.mubr.bf16.mxu0 %v8357_v49  ;;  %4687 = vmatprep.mubr.bf16.mxu1 %v8357_v49  ;;  %v1625_v27 = vld [vmem:[#allocation7 + $0xa68] sm:$0xff] }
 0x205   :  { %v7146_v39 = vcombine.low %v1621_v24, %v1625_v27 }
 0x206   :  { %4494 = vmatpush1.bf16.msra.mxu0 %v7080_v52  ;;  %4658 = vmatpush1.bf16.msra.mxu1 %v7082_v53  ;;  %v1136_v53 = vadd.f32 %v1135_v38, %v1134_v31 }
 0x207   :  { %4495 = vmatprep.subr.bf16.mxu0 %v7089_v18  ;;  %4659 = vmatprep.subr.bf16.mxu1 %v7091_v54  ;;  %v1200_v18 = vrot.slane %v1199_v59, 1  ;;  %v7120_v54 = vcombine.low %v1596_v35, %v1600_v37  ;;  %v7147_v37 = vcombine.high %v1621_v24, %v1625_v27 }
 0x208   :  { %v8375_v3 = vmul.f32 0.125, %v1136_v53  ;;  %v1636_v53 = vld [vmem:[#allocation7 + $0xac0] sm:$0xff] }
 0x209   :  { %v1201_v4 = vadd.f32 %v1200_v18, %v1199_v59  ;;  %v1632_v59 = vld [vmem:[#allocation7 + $0xaa0] sm:$0xff] }
 0x20a   :  { %4496 = vmatpush1.bf16.msra.mxu0 %v7088_v21  ;;  %4660 = vmatpush1.bf16.msra.mxu1 %v7090_v58  ;;  %v1616_v58 = vld [vmem:[#allocation7 + $0xa20] sm:$0xff]  ;;  %v7153_v50 = vcombine.high %v1628_v22, %v1632_v59 }
 0x20b   :  { %4497 = vmatprep.subr.bf16.mxu0 %v7097_v60  ;;  %4661 = vmatprep.subr.bf16.mxu1 %v7099_v61  ;;  %v1613_v60 = vld [vmem:[#allocation7 + $0xa08] sm:$0xff] }
 0x20c   :  { %v1617_v61 = vld [vmem:[#allocation7 + $0xa28] sm:$0xff] }
 0x20e   :  { %4498 = vmatpush1.bf16.msra.mxu0 %v7096_v8  ;;  %4662 = vmatpush1.bf16.msra.mxu1 %v7098_v9  ;;  %v7137_v8 = vcombine.high %v1612_v16, %v1616_v58  ;;  %v7139_v9 = vcombine.high %v1613_v60, %v1617_v61 }
 0x20f   :  { %4499 = vmatprep.subr.bf16.mxu0 %v7105_v11  ;;  %4663 = vmatprep.subr.bf16.mxu1 %v7107_v12  ;;  %v1620_v11 = vld [vmem:[#allocation7 + $0xa40] sm:$0xff] }
 0x210   :  { %v7145_v35 = vcombine.high %v1620_v11, %v1624_v23 }
 0x212   :  { %4500 = vmatpush1.bf16.msra.mxu0 %v7104_v33  ;;  %4664 = vmatpush1.bf16.msra.mxu1 %v7106_v48  ;;  %v1224_v33 = vmul.f32 0.125, %v1201_v4  ;;  %v1232_v48 = vmul.f32 %v8375_v3, %v8375_v3 }
 0x213   :  { %4501 = vmatprep.subr.bf16.mxu0 %v7113_v10  ;;  %4665 = vmatprep.subr.bf16.mxu1 %v7115_v34  ;;  %v7136_v10 = vcombine.low %v1612_v16, %v1616_v58  ;;  %v7138_v34 = vcombine.low %v1613_v60, %v1617_v61 }
 0x214   :  { %v1240_v47 = vsub.f32 %v1224_v33, %v1232_v48  ;;  %v1656_v48 = vld [vmem:[#allocation7 + $0xb60] sm:$0xff] }
 0x215   :  { %v8371_v52 = vpop.f32.mrb[8].mxu1 }
 0x216   :  { %4502 = vmatpush1.bf16.msra.mxu0 %v7112_v5  ;;  %4666 = vmatpush1.bf16.msra.mxu1 %v7114_v42  ;;  %v1094_v56 = vpop.f32.mrb[9].mxu1  ;;  %v1629_v5 = vld [vmem:[#allocation7 + $0xa88] sm:$0xff] }
 0x217   :  { %4503 = vmatprep.subr.bf16.mxu0 %v7121_v45  ;;  %4667 = vmatprep.subr.bf16.mxu1 %v7123_v46  ;;  %v1095_v19 = vadd.f32 %v1094_v56, %v286_v62  ;;  %v1096_v21 = vpop.f32.mrb[10].mxu1  ;;  %v1633_v42 = vld [vmem:[#allocation7 + $0xaa8] sm:$0xff]  ;;  %v7144_v62 = vcombine.low %v1620_v11, %v1624_v23 }
 0x218   :  { %v1097_v63 = vpop.f32.mrb[11].mxu1  ;;  %v7155_v51 = vcombine.high %v1629_v5, %v1633_v42  ;;  %v1637_v56 = vld [vmem:[#allocation7 + $0xac8] sm:$0xff]  ;;  %v7152_v21 = vcombine.low %v1628_v22, %v1632_v59  ;;  %v7154_v58 = vcombine.low %v1629_v5, %v1633_v42  ;;  %v1660_v5 = vld [vmem:[#allocation7 + $0xb80] sm:$0xff] }
 0x219   :  { %v8373_v1 = vmax.f32 %v1095_v19, 0.0  ;;  %v1248_v19 = vmax.f32 %v1240_v47, 0.0  ;;  %v1644_v63 = vld [vmem:[#allocation7 + $0xb00] sm:$0xff] }
 0x21a   :  { %4504 = vmatpush1.bf16.msra.mxu0 %v7120_v54  ;;  %4668 = vmatpush1.bf16.msra.mxu1 %v7122_v55  ;;  %v1640_v55 = vld [vmem:[#allocation7 + $0xae0] sm:$0xff] }
 0x21b   :  { %4505 = vmatprep.subr.bf16.mxu0 %v7129_v57  ;;  %4669 = vmatprep.subr.bf16.mxu1 %v7131_v15  ;;  %v1149_v12 = vrot.slane %v8373_v1, 4  ;;  %v1171_v20 = vmul.f32 %v8373_v1, %v8373_v1  ;;  %v1641_v57 = vld [vmem:[#allocation7 + $0xae8] sm:$0xff]  ;;  %v7161_v60 = vcombine.high %v1636_v53, %v1640_v55  ;;  %v7160_v23 = vcombine.low %v1636_v53, %v1640_v55  ;;  %v1664_v42 = vld [vmem:[#allocation7 + $0xba0] sm:$0xff] }
 0x21c   :  { %v7163_v61 = vcombine.high %v1637_v56, %v1641_v57  ;;  %v7162_v24 = vcombine.low %v1637_v56, %v1641_v57  ;;  %v1668_v53 = vld [vmem:[#allocation7 + $0xbc0] sm:$0xff]  ;;  %v1673_v55 = vld [vmem:[#allocation7 + $0xbe8] sm:$0xff]  ;;  %v7184_v57 = vcombine.low %v1660_v5, %v1664_v42 }
 0x21d   :  { %v1150_v31 = vadd.f32 %v1149_v12, %v8373_v1  ;;  %v1214_v32 = vrot.slane %v1171_v20, 4 }
 0x21e   :  { %4506 = vmatpush1.bf16.msra.mxu0 %v7128_v6  ;;  %4670 = vmatpush1.bf16.msra.mxu1 %v7130_v7  ;;  %v1648_v7 = vld [vmem:[#allocation7 + $0xb20] sm:$0xff] }
 0x21f   :  { %4507 = vmatprep.subr.bf16.mxu0 %v7137_v8  ;;  %4671 = vmatprep.subr.bf16.mxu1 %v7139_v9  ;;  %v1151_v0 = vrot.slane %v1150_v31, 2  ;;  %v1215_v38 = vadd.f32 %v1214_v32, %v1171_v20  ;;  %v1645_v8 = vld [vmem:[#allocation7 + $0xb08] sm:$0xff]  ;;  %v1264_v20 = vadd.f32 1e-05, %v1248_v19  ;;  %v7169_v27 = vcombine.high %v1644_v63, %v1648_v7  ;;  %v1652_v32 = vld [vmem:[#allocation7 + $0xb40] sm:$0xff] }
 0x220   :  { %v1649_v9 = vld [vmem:[#allocation7 + $0xb28] sm:$0xff]  ;;  %v7176_v47 = vcombine.low %v1652_v32, %v1656_v48 }
 0x221   :  { %v1152_v45 = vadd.f32 %v1151_v0, %v1150_v31  ;;  %v1216_v46 = vrot.slane %v1215_v38, 2  ;;  %v7171_v31 = vcombine.high %v1645_v8, %v1649_v9  ;;  %7876 = vrsqrt.f32 %v1264_v20  ;;  %v1684_v20 = vld [vmem:[#allocation7 + $0xc40] sm:$0xff] }
 0x222   :  { %4508 = vmatpush1.bf16.msra.mxu0 %v7136_v10  ;;  %4672 = vmatpush1.bf16.msra.mxu1 %v7138_v34  ;;  %v1653_v10 = vld [vmem:[#allocation7 + $0xb48] sm:$0xff]  ;;  %v7170_v22 = vcombine.low %v1645_v8, %v1649_v9  ;;  %v7177_v0 = vcombine.high %v1652_v32, %v1656_v48 }
 0x223   :  { %4509 = vmatprep.subr.bf16.mxu0 %v7145_v35  ;;  %4673 = vmatprep.subr.bf16.mxu1 %v7147_v37  ;;  %v1153_v18 = vrot.slane %v1152_v45, 1  ;;  %v1217_v54 = vadd.f32 %v1216_v46, %v1215_v38  ;;  %v1657_v34 = vld [vmem:[#allocation7 + $0xb68] sm:$0xff]  ;;  %v7168_v37 = vcombine.low %v1644_v63, %v1648_v7  ;;  %v1680_v63 = vld [vmem:[#allocation7 + $0xc20] sm:$0xff] }
 0x224   :  { %v7179_v38 = vcombine.high %v1653_v10, %v1657_v34  ;;  %v1665_v46 = vld [vmem:[#allocation7 + $0xba8] sm:$0xff] }
 0x225   :  { %v1154_v15 = vadd.f32 %v1153_v18, %v1152_v45  ;;  %v1218_v16 = vrot.slane %v1217_v54, 1  ;;  %v1661_v45 = vld [vmem:[#allocation7 + $0xb88] sm:$0xff]  ;;  %v1672_v18 = vld [vmem:[#allocation7 + $0xbe0] sm:$0xff] }
 0x226   :  { %4510 = vmatpush1.bf16.msra.mxu0 %v7144_v62  ;;  %4674 = vmatpush1.bf16.msra.mxu1 %v7146_v39  ;;  %v7178_v62 = vcombine.low %v1653_v10, %v1657_v34  ;;  %v281_v39 = vsub.s32 6, %v8266_v25  ;;  %v7193_v19 = vcombine.high %v1668_v53, %v1672_v18  ;;  %v1681_v7 = vld [vmem:[#allocation7 + $0xc28] sm:$0xff]  ;;  %v7192_v8 = vcombine.low %v1668_v53, %v1672_v18  ;;  %v1692_v10 = vld [vmem:[#allocation7 + $0xc80] sm:$0xff] }
 0x227   :  { %4511 = vmatprep.subr.bf16.mxu0 %v7153_v50  ;;  %4675 = vmatprep.subr.bf16.mxu1 %v7155_v51  ;;  %v8383_v4 = vmul.f32 0.125, %v1154_v15  ;;  %v1219_v6 = vadd.f32 %v1218_v16, %v1217_v54  ;;  %v7185_v50 = vcombine.high %v1660_v5, %v1664_v42  ;;  %v7187_v51 = vcombine.high %v1661_v45, %v1665_v46  ;;  %v1669_v54 = vld [vmem:[#allocation7 + $0xbc8] sm:$0xff]  ;;  %v1696_v34 = vld [vmem:[#allocation7 + $0xca0] sm:$0xff] }
 0x228   :  { %v282_v56 = vrot.slane %v8268_v28, %v281_v39  ;;  %v7186_v15 = vcombine.low %v1661_v45, %v1665_v46  ;;  %v1256_v16 = vsub.f32 %v8349_v40, %v8375_v3  ;;  %v7194_v9 = vcombine.low %v1669_v54, %v1673_v55  ;;  %v1700_v46 = vld [vmem:[#allocation7 + $0xcc0] sm:$0xff] }
 0x229   :  { %v1227_v11 = vmul.f32 0.125, %v1219_v6  ;;  %v1235_v12 = vmul.f32 %v8383_v4, %v8383_v4  ;;  %v1677_v6 = vld [vmem:[#allocation7 + $0xc08] sm:$0xff]  ;;  %v7217_v42 = vcombine.high %v1692_v10, %v1696_v34  ;;  %v7216_v18 = vcombine.low %v1692_v10, %v1696_v34 }
 0x22a   :  { %4512 = vmatpush1.bf16.msra.mxu0 %v7152_v21  ;;  %4676 = vmatpush1.bf16.msra.mxu1 %v7154_v58  ;;  %v7195_v21 = vcombine.high %v1669_v54, %v1673_v55  ;;  %v1676_v58 = vld [vmem:[#allocation7 + $0xc00] sm:$0xff]  ;;  %v1093_v28 = vadd.f32 %v8371_v52, %v282_v56 }
 0x22b   :  { %4513 = vmatprep.subr.bf16.mxu0 %v7161_v60  ;;  %4677 = vmatprep.subr.bf16.mxu1 %v7163_v61  ;;  %v1243_v33 = vsub.f32 %v1227_v11, %v1235_v12  ;;  %v7877_v60 = vpop.eup %7876  ;;  %v1259_v61 = vsub.f32 %v8373_v1, %v8383_v4  ;;  %v7201_v3 = vcombine.high %v1676_v58, %v1680_v63 }
 0x22c   :  { %v1280_v40 = vmul.f32 %v7877_v60, %v1256_v16  ;;  %v7203_v12 = vcombine.high %v1677_v6, %v1681_v7  ;;  %v8396_v4 = vmax.f32 %v1093_v28, 0.0  ;;  %v7200_v52 = vcombine.low %v1676_v58, %v1680_v63  ;;  %v1709_v16 = vld [vmem:[#allocation7 + $0xd08] sm:$0xff]  ;;  %v1720_v28 = vld [vmem:[#allocation7 + $0xd60] sm:$0xff] }
 0x22d   :  { %v1251_v35 = vmax.f32 %v1243_v33, 0.0 }
 0x22e   :  { %4514 = vmatpush1.bf16.msra.mxu0 %v7160_v23  ;;  %4678 = vmatpush1.bf16.msra.mxu1 %v7162_v24  ;;  %v1688_v23 = vld [vmem:[#allocation7 + $0xc60] sm:$0xff]  ;;  %v1685_v24 = vld [vmem:[#allocation7 + $0xc48] sm:$0xff]  ;;  %v8398_v32 = vpack.c.bf16 %v1280_v40, %v1280_v40 }
 0x22f   :  { %4515 = vmatprep.subr.bf16.mxu0 %v7169_v27  ;;  %4679 = vmatprep.subr.bf16.mxu1 %v7171_v31  ;;  %v1267_v59 = vadd.f32 1e-05, %v1251_v35  ;;  %v1689_v27 = vld [vmem:[#allocation7 + $0xc68] sm:$0xff]  ;;  %v7202_v31 = vcombine.low %v1677_v6, %v1681_v7  ;;  %v7209_v33 = vcombine.high %v1684_v20, %v1688_v23  ;;  %v1716_v7 = vld [vmem:[#allocation7 + $0xd40] sm:$0xff] }
 0x230   :  { %v7211_v48 = vcombine.high %v1685_v24, %v1689_v27  ;;  %v1693_v35 = vld [vmem:[#allocation7 + $0xc88] sm:$0xff]  ;;  %v7210_v5 = vcombine.low %v1685_v24, %v1689_v27  ;;  %v1724_v24 = vld [vmem:[#allocation7 + $0xd80] sm:$0xff] }
 0x231   :  { %7878 = vrsqrt.f32 %v1267_v59  ;;  %v7208_v59 = vcombine.low %v1684_v20, %v1688_v23  ;;  %v7241_v20 = vcombine.high %v1716_v7, %v1720_v28  ;;  %v1728_v27 = vld [vmem:[#allocation7 + $0xda0] sm:$0xff] }
 0x232   :  { %4516 = vmatpush1.bf16.msra.mxu0 %v7168_v37  ;;  %4680 = vmatpush1.bf16.msra.mxu1 %v7170_v22  ;;  %v1697_v37 = vld [vmem:[#allocation7 + $0xca8] sm:$0xff]  ;;  %v7249_v34 = vcombine.high %v1724_v24, %v1728_v27 }
 0x233   :  { %4517 = vmatprep.subr.bf16.mxu0 %v7177_v0  ;;  %4681 = vmatprep.subr.bf16.mxu1 %v7179_v38  ;;  %v1143_v0 = vrot.slane %v8396_v4, 4  ;;  %v1170_v38 = vmul.f32 %v8396_v4, %v8396_v4  ;;  %v7219_v45 = vcombine.high %v1693_v35, %v1697_v37  ;;  %v7218_v54 = vcombine.low %v1693_v35, %v1697_v37  ;;  %v1732_v37 = vld [vmem:[#allocation7 + $0xdc0] sm:$0xff] }
 0x235   :  { %v1208_v53 = vrot.slane %v1170_v38, 4 }
 0x236   :  { %4518 = vmatpush1.bf16.msra.mxu0 %v7176_v47  ;;  %4682 = vmatpush1.bf16.msra.mxu1 %v7178_v62  ;;  %v1704_v47 = vld [vmem:[#allocation7 + $0xce0] sm:$0xff]  ;;  %v1701_v62 = vld [vmem:[#allocation7 + $0xcc8] sm:$0xff] }
 0x237   :  { %4519 = vmatprep.subr.bf16.mxu0 %v7185_v50  ;;  %4683 = vmatprep.subr.bf16.mxu1 %v7187_v51  ;;  %v1705_v50 = vld [vmem:[#allocation7 + $0xce8] sm:$0xff]  ;;  %v1144_v51 = vadd.f32 %v1143_v0, %v8396_v4  ;;  %v7225_v55 = vcombine.high %v1700_v46, %v1704_v47  ;;  %v1209_v58 = vadd.f32 %v1208_v53, %v1170_v38  ;;  %v1736_v0 = vld [vmem:[#allocation7 + $0xde0] sm:$0xff] }
 0x238   :  { %v7227_v56 = vcombine.high %v1701_v62, %v1705_v50  ;;  %v7224_v60 = vcombine.low %v1700_v46, %v1704_v47  ;;  %v1733_v38 = vld [vmem:[#allocation7 + $0xdc8] sm:$0xff]  ;;  %v7257_v47 = vcombine.high %v1732_v37, %v1736_v0 }
 0x239   :  { %v1210_v40 = vrot.slane %v1209_v58, 2  ;;  %v1741_v53 = vld [vmem:[#allocation7 + $0xe08] sm:$0xff] }
 0x23a   :  { %4520 = vmatpush1.bf16.msra.mxu0 %v7184_v57  ;;  %4684 = vmatpush1.bf16.msra.mxu1 %v7186_v15  ;;  %v1708_v57 = vld [vmem:[#allocation7 + $0xd00] sm:$0xff] }
 0x23b   :  { %v7879_v11 = vpop.eup %7878  ;;  %4521 = vmatprep.subr.bf16.mxu0 %v7193_v19  ;;  %4685 = vmatprep.subr.bf16.mxu1 %v7195_v21  ;;  %v1712_v15 = vld [vmem:[#allocation7 + $0xd20] sm:$0xff]  ;;  %v1713_v19 = vld [vmem:[#allocation7 + $0xd28] sm:$0xff]  ;;  %v1145_v21 = vrot.slane %v1144_v51, 2 }
 0x23c   :  { %v1283_v1 = vmul.f32 %v7879_v11, %v1259_v61  ;;  %v7226_v61 = vcombine.low %v1701_v62, %v1705_v50  ;;  %v7233_v63 = vcombine.high %v1708_v57, %v1712_v15  ;;  %v7235_v6 = vcombine.high %v1709_v16, %v1713_v19  ;;  %v1740_v50 = vld [vmem:[#allocation7 + $0xe00] sm:$0xff] }
 0x23d   :  { %v1146_v11 = vadd.f32 %v1145_v21, %v1144_v51  ;;  %v1744_v51 = vld [vmem:[#allocation7 + $0xe20] sm:$0xff] }
 0x23e   :  { %4522 = vmatpush1.bf16.msra.mxu0 %v7192_v8  ;;  %4686 = vmatpush1.bf16.msra.mxu1 %v7194_v9  ;;  %v8400_v22 = vpack.c.bf16 %v1283_v1, %v1283_v1  ;;  %v1717_v8 = vld [vmem:[#allocation7 + $0xd48] sm:$0xff]  ;;  %v1752_v21 = vld [vmem:[#allocation7 + $0xe60] sm:$0xff] }
 0x23f   :  { %4532 = vmatprep.subr.bf16.mxu0 %v7201_v3  ;;  %4696 = vmatprep.subr.bf16.mxu1 %v7203_v12  ;;  %v1721_v9 = vld [vmem:[#allocation7 + $0xd68] sm:$0xff]  ;;  %v7232_v3 = vcombine.low %v1708_v57, %v1712_v15  ;;  %v7234_v12 = vcombine.low %v1709_v16, %v1713_v19  ;;  %v7265_v15 = vcombine.high %v1740_v50, %v1744_v51  ;;  %v1748_v19 = vld [vmem:[#allocation7 + $0xe40] sm:$0xff] }
 0x240   :  { %v7243_v23 = vcombine.high %v1717_v8, %v1721_v9  ;;  %v1725_v1 = vld [vmem:[#allocation7 + $0xd88] sm:$0xff]  ;;  %v7242_v10 = vcombine.low %v1717_v8, %v1721_v9  ;;  %v1756_v9 = vld [vmem:[#allocation7 + $0xe80] sm:$0xff] }
 0x241   :  { %4524 = vmatmul.mubr.bf16.vlgmr.msra.gmra.mrb[4].mxu0 %v8398_v32  ;;  %4688 = vmatmul.mubr.bf16.vlgmr.msra.gmra.mrb[12].mxu1 %v8398_v32 }
 0x242   :  { %4533 = vmatpush1.bf16.msra.mxu0 %v7200_v52  ;;  %4697 = vmatpush1.bf16.msra.mxu1 %v7202_v31  ;;  %v1729_v52 = vld [vmem:[#allocation7 + $0xda8] sm:$0xff]  ;;  %v1147_v31 = vrot.slane %v1146_v11, 1 }
 0x243   :  { %4534 = vmatprep.subr.bf16.mxu0 %v7209_v33  ;;  %4698 = vmatprep.subr.bf16.mxu1 %v7211_v48  ;;  %v1211_v33 = vadd.f32 %v1210_v40, %v1209_v58  ;;  %v7240_v48 = vcombine.low %v1716_v7, %v1720_v28  ;;  %v7251_v35 = vcombine.high %v1725_v1, %v1729_v52  ;;  %v1749_v58 = vld [vmem:[#allocation7 + $0xe48] sm:$0xff] }
 0x244   :  { %4564 = vmatprep.mubr.bf16.mxu0 %v8400_v22  ;;  %4728 = vmatprep.mubr.bf16.mxu1 %v8400_v22  ;;  %v7250_v46 = vcombine.low %v1725_v1, %v1729_v52  ;;  %v7273_v28 = vcombine.high %v1748_v19, %v1752_v21  ;;  %v1757_v40 = vld [vmem:[#allocation7 + $0xe88] sm:$0xff]  ;;  %v1764_v1 = vld [vmem:[#allocation7 + $0xec0] sm:$0xff] }
 0x245   :  { %v1768_v52 = vld [vmem:[#allocation7 + $0xee0] sm:$0xff] }
 0x246   :  { %4535 = vmatpush1.bf16.msra.mxu0 %v7208_v59  ;;  %4699 = vmatpush1.bf16.msra.mxu1 %v7210_v5  ;;  %v1737_v59 = vld [vmem:[#allocation7 + $0xde8] sm:$0xff]  ;;  %v1148_v5 = vadd.f32 %v1147_v31, %v1146_v11  ;;  %v1760_v11 = vld [vmem:[#allocation7 + $0xea0] sm:$0xff] }
 0x247   :  { %4536 = vmatprep.subr.bf16.mxu0 %v7217_v42  ;;  %4700 = vmatprep.subr.bf16.mxu1 %v7219_v45  ;;  %v1212_v42 = vrot.slane %v1211_v33, 1  ;;  %v7248_v45 = vcombine.low %v1724_v24, %v1728_v27  ;;  %v7259_v62 = vcombine.high %v1733_v38, %v1737_v59  ;;  %v7258_v57 = vcombine.low %v1733_v38, %v1737_v59  ;;  %v1765_v31 = vld [vmem:[#allocation7 + $0xec8] sm:$0xff]  ;;  %v1776_v38 = vld [vmem:[#allocation7 + $0xf20] sm:$0xff] }
 0x248   :  { %v7281_v24 = vcombine.high %v1756_v9, %v1760_v11  ;;  %v1773_v59 = vld [vmem:[#allocation7 + $0xf08] sm:$0xff] }
 0x24a   :  { %4537 = vmatpush1.bf16.msra.mxu0 %v7216_v18  ;;  %4701 = vmatpush1.bf16.msra.mxu1 %v7218_v54  ;;  %v1745_v18 = vld [vmem:[#allocation7 + $0xe28] sm:$0xff]  ;;  %v8410_v54 = vmul.f32 0.125, %v1148_v5 }
 0x24b   :  { %4538 = vmatprep.subr.bf16.mxu0 %v7225_v55  ;;  %4702 = vmatprep.subr.bf16.mxu1 %v7227_v56  ;;  %v1213_v55 = vadd.f32 %v1212_v42, %v1211_v33  ;;  %v7256_v56 = vcombine.low %v1732_v37, %v1736_v0  ;;  %v7267_v16 = vcombine.high %v1741_v53, %v1745_v18  ;;  %v1769_v33 = vld [vmem:[#allocation7 + $0xee8] sm:$0xff]  ;;  %v1772_v0 = vld [vmem:[#allocation7 + $0xf00] sm:$0xff] }
 0x24c   :  { %v7266_v7 = vcombine.low %v1741_v53, %v1745_v18  ;;  %v7291_v37 = vcombine.high %v1765_v31, %v1769_v33  ;;  %v1777_v5 = vld [vmem:[#allocation7 + $0xf28] sm:$0xff] }
 0x24d   :  { %v1781_v53 = vld [vmem:[#allocation7 + $0xf48] sm:$0xff] }
 0x24e   :  { %4539 = vmatpush1.bf16.msra.mxu0 %v7224_v60  ;;  %4703 = vmatpush1.bf16.msra.mxu1 %v7226_v61  ;;  %v1753_v60 = vld [vmem:[#allocation7 + $0xe68] sm:$0xff]  ;;  %v1226_v61 = vmul.f32 0.125, %v1213_v55  ;;  %v7296_v55 = vcombine.low %v1772_v0, %v1776_v38 }
 0x24f   :  { %4540 = vmatprep.subr.bf16.mxu0 %v7233_v63  ;;  %4704 = vmatprep.subr.bf16.mxu1 %v7235_v6  ;;  %v1234_v63 = vmul.f32 %v8410_v54, %v8410_v54  ;;  %v7264_v6 = vcombine.low %v1740_v50, %v1744_v51  ;;  %v7275_v8 = vcombine.high %v1749_v58, %v1753_v60  ;;  %v1780_v50 = vld [vmem:[#allocation7 + $0xf40] sm:$0xff]  ;;  %v1785_v18 = vld [vmem:[#allocation7 + $0xf68] sm:$0xff] }
 0x250   :  { %v1784_v51 = vld [vmem:[#allocation7 + $0xf60] sm:$0xff] }
 0x252   :  { %4541 = vmatpush1.bf16.msra.mxu0 %v7232_v3  ;;  %4705 = vmatpush1.bf16.msra.mxu1 %v7234_v12  ;;  %v1761_v3 = vld [vmem:[#allocation7 + $0xea8] sm:$0xff]  ;;  %v1242_v12 = vsub.f32 %v1226_v61, %v1234_v63  ;;  %v7306_v61 = vcombine.low %v1781_v53, %v1785_v18 }
 0x253   :  { %4542 = vmatprep.subr.bf16.mxu0 %v7241_v20  ;;  %4706 = vmatprep.subr.bf16.mxu1 %v7243_v23  ;;  %v7272_v20 = vcombine.low %v1748_v19, %v1752_v21  ;;  %v7274_v23 = vcombine.low %v1749_v58, %v1753_v60  ;;  %v7283_v27 = vcombine.high %v1757_v40, %v1761_v3  ;;  %v1792_v19 = vld [vmem:[#allocation7 + $0xfa0] sm:$0xff]  ;;  %v1789_v21 = vld [vmem:[#allocation7 + $0xf88] sm:$0xff] }
 0x254   :  { %v1793_v58 = vld [vmem:[#allocation7 + $0xfa8] sm:$0xff]  ;;  %v7304_v60 = vcombine.low %v1780_v50, %v1784_v51 }
 0x256   :  { %4543 = vmatpush1.bf16.msra.mxu0 %v7240_v48  ;;  %4707 = vmatpush1.bf16.msra.mxu1 %v7242_v10  ;;  %v1250_v48 = vmax.f32 %v1242_v12, 0.0  ;;  %v7280_v10 = vcombine.low %v1756_v9, %v1760_v11  ;;  %v1801_v9 = vld [vmem:[#allocation7 + $0xfe8] sm:$0xff] }
 0x257   :  { %4544 = vmatprep.subr.bf16.mxu0 %v7249_v34  ;;  %4708 = vmatprep.subr.bf16.mxu1 %v7251_v35  ;;  %v7282_v34 = vcombine.low %v1757_v40, %v1761_v3  ;;  %v7289_v35 = vcombine.high %v1764_v1, %v1768_v52  ;;  %v7314_v40 = vcombine.low %v1789_v21, %v1793_v58 }
 0x258   :  { %v1266_v42 = vadd.f32 1e-05, %v1250_v48  ;;  %v1258_v3 = vsub.f32 %v8396_v4, %v8410_v54  ;;  %v1306_v4 = vld [vmem:[#allocation7 + $0x70] sm:$0xff]  ;;  %v1303_v54 = vld [vmem:[#allocation7 + $0x58] sm:$0xff] }
 0x25a   :  { %4545 = vmatpush1.bf16.msra.mxu0 %v7248_v45  ;;  %4709 = vmatpush1.bf16.msra.mxu1 %v7250_v46  ;;  %v7288_v45 = vcombine.low %v1764_v1, %v1768_v52  ;;  %v7290_v46 = vcombine.low %v1765_v31, %v1769_v33  ;;  %7880 = vrsqrt.f32 %v1266_v42  ;;  %v1295_v1 = vld [vmem:[#allocation7 + $0x18] sm:$0xff] }
 0x25b   :  { %4546 = vmatprep.subr.bf16.mxu0 %v7257_v47  ;;  %4710 = vmatprep.subr.bf16.mxu1 %v7259_v62  ;;  %v7297_v47 = vcombine.high %v1772_v0, %v1776_v38  ;;  %v7299_v62 = vcombine.high %v1773_v59, %v1777_v5  ;;  %v1299_v52 = vld [vmem:[#allocation7 + $0x38] sm:$0xff] }
 0x25e   :  { %4547 = vmatpush1.bf16.msra.mxu0 %v7256_v56  ;;  %4711 = vmatpush1.bf16.msra.mxu1 %v7258_v57  ;;  %v7298_v56 = vcombine.low %v1773_v59, %v1777_v5  ;;  %v7305_v57 = vcombine.high %v1780_v50, %v1784_v51  ;;  %v6822_v59 = vcombine.low %v1295_v1, %v1299_v52 }
 0x25f   :  { %4548 = vmatprep.subr.bf16.mxu0 %v7265_v15  ;;  %4712 = vmatprep.subr.bf16.mxu1 %v7267_v16  ;;  %v7307_v15 = vcombine.high %v1781_v53, %v1785_v18  ;;  %v1788_v16 = vld [vmem:[#allocation7 + $0xf80] sm:$0xff] }
 0x260   :  { %v7313_v63 = vcombine.high %v1788_v16, %v1792_v19  ;;  %v7312_v11 = vcombine.low %v1788_v16, %v1792_v19 }
 0x262   :  { %4549 = vmatpush1.bf16.msra.mxu0 %v7264_v6  ;;  %4713 = vmatpush1.bf16.msra.mxu1 %v7266_v7  ;;  %v7315_v6 = vcombine.high %v1789_v21, %v1793_v58  ;;  %v1796_v7 = vld [vmem:[#allocation7 + $0xfc0] sm:$0xff] }
 0x263   :  { %4550 = vmatprep.subr.bf16.mxu0 %v7273_v28  ;;  %4714 = vmatprep.subr.bf16.mxu1 %v7275_v8  ;;  %v1800_v28 = vld [vmem:[#allocation7 + $0xfe0] sm:$0xff]  ;;  %v1797_v8 = vld [vmem:[#allocation7 + $0xfc8] sm:$0xff] }
 0x264   :  { %v7321_v12 = vcombine.high %v1796_v7, %v1800_v28  ;;  %v7320_v31 = vcombine.low %v1796_v7, %v1800_v28  ;;  %v7322_v33 = vcombine.low %v1797_v8, %v1801_v9 }
 0x266   :  { %4551 = vmatpush1.bf16.msra.mxu0 %v7272_v20  ;;  %4715 = vmatpush1.bf16.msra.mxu1 %v7274_v23  ;;  %v7323_v20 = vcombine.high %v1797_v8, %v1801_v9  ;;  %v1294_v23 = vld [vmem:[#allocation7 + $0x10] sm:$0xff] }
 0x267   :  { %4552 = vmatprep.subr.bf16.mxu0 %v7281_v24  ;;  %4716 = vmatprep.subr.bf16.mxu1 %v7283_v27  ;;  %v7881_v24 = vpop.eup %7880  ;;  %v1298_v27 = vld [vmem:[#allocation7 + $0x30] sm:$0xff] }
 0x268   :  { %v1282_v48 = vmul.f32 %v7881_v24, %v1258_v3  ;;  %v6820_v0 = vcombine.low %v1294_v23, %v1298_v27  ;;  %v1334_v9 = vld [vmem:[#allocation7 + $0x150] sm:$0xff]  ;;  %v1339_v3 = vld [vmem:[#allocation7 + $0x178] sm:$0xff] }
 0x26a   :  { %4553 = vmatpush1.bf16.msra.mxu0 %v7280_v10  ;;  %4717 = vmatpush1.bf16.msra.mxu1 %v7282_v34  ;;  %v6821_v10 = vcombine.high %v1294_v23, %v1298_v27  ;;  %v6823_v34 = vcombine.high %v1295_v1, %v1299_v52  ;;  %v8416_v38 = vpack.c.bf16 %v1282_v48, %v1282_v48  ;;  %v1342_v27 = vld [vmem:[#allocation7 + $0x190] sm:$0xff]  ;;  %v1343_v52 = vld [vmem:[#allocation7 + $0x198] sm:$0xff] }
 0x26b   :  { %4554 = vmatprep.subr.bf16.mxu0 %v7289_v35  ;;  %4718 = vmatprep.subr.bf16.mxu1 %v7291_v37  ;;  %v1302_v35 = vld [vmem:[#allocation7 + $0x50] sm:$0xff]  ;;  %v1307_v37 = vld [vmem:[#allocation7 + $0x78] sm:$0xff] }
 0x26c   :  { %v6829_v5 = vcombine.high %v1302_v35, %v1306_v4  ;;  %v6831_v42 = vcombine.high %v1303_v54, %v1307_v37  ;;  %v6828_v50 = vcombine.low %v1302_v35, %v1306_v4  ;;  %v6830_v51 = vcombine.low %v1303_v54, %v1307_v37  ;;  %v1346_v1 = vld [vmem:[#allocation7 + $0x1b0] sm:$0xff]  ;;  %v1351_v54 = vld [vmem:[#allocation7 + $0x1d8] sm:$0xff] }
 0x26d   :  { %v1350_v35 = vld [vmem:[#allocation7 + $0x1d0] sm:$0xff]  ;;  %v1355_v37 = vld [vmem:[#allocation7 + $0x1f8] sm:$0xff] }
 0x26e   :  { %4555 = vmatpush1.bf16.msra.mxu0 %v7288_v45  ;;  %4719 = vmatpush1.bf16.msra.mxu1 %v7290_v46  ;;  %v1310_v45 = vld [vmem:[#allocation7 + $0x90] sm:$0xff] }
 0x26f   :  { %4556 = vmatprep.subr.bf16.mxu0 %v7297_v47  ;;  %4720 = vmatprep.subr.bf16.mxu1 %v7299_v62  ;;  %v1314_v46 = vld [vmem:[#allocation7 + $0xb0] sm:$0xff]  ;;  %v1311_v47 = vld [vmem:[#allocation7 + $0x98] sm:$0xff] }
 0x270   :  { %v1315_v62 = vld [vmem:[#allocation7 + $0xb8] sm:$0xff]  ;;  %v6837_v53 = vcombine.high %v1310_v45, %v1314_v46  ;;  %v6836_v16 = vcombine.low %v1310_v45, %v1314_v46  ;;  %v1354_v4 = vld [vmem:[#allocation7 + $0x1f0] sm:$0xff] }
 0x271   :  { %v6839_v18 = vcombine.high %v1311_v47, %v1315_v62  ;;  %v6838_v19 = vcombine.low %v1311_v47, %v1315_v62  ;;  %v1358_v45 = vld [vmem:[#allocation7 + $0x210] sm:$0xff]  ;;  %v1359_v47 = vld [vmem:[#allocation7 + $0x218] sm:$0xff] }
 0x272   :  { %4557 = vmatpush1.bf16.msra.mxu0 %v7296_v55  ;;  %4721 = vmatpush1.bf16.msra.mxu1 %v7298_v56  ;;  %v1318_v55 = vld [vmem:[#allocation7 + $0xd0] sm:$0xff]  ;;  %v1363_v62 = vld [vmem:[#allocation7 + $0x238] sm:$0xff] }
 0x273   :  { %4558 = vmatprep.subr.bf16.mxu0 %v7305_v57  ;;  %4722 = vmatprep.subr.bf16.mxu1 %v7307_v15  ;;  %v1322_v56 = vld [vmem:[#allocation7 + $0xf0] sm:$0xff]  ;;  %v1319_v57 = vld [vmem:[#allocation7 + $0xd8] sm:$0xff] }
 0x274   :  { %v1323_v15 = vld [vmem:[#allocation7 + $0xf8] sm:$0xff]  ;;  %v6845_v21 = vcombine.high %v1318_v55, %v1322_v56  ;;  %v1362_v46 = vld [vmem:[#allocation7 + $0x230] sm:$0xff] }
 0x275   :  { %v6847_v58 = vcombine.high %v1319_v57, %v1323_v15  ;;  %v6846_v7 = vcombine.low %v1319_v57, %v1323_v15  ;;  %v1367_v57 = vld [vmem:[#allocation7 + $0x258] sm:$0xff] }
 0x276   :  { %4559 = vmatpush1.bf16.msra.mxu0 %v7304_v60  ;;  %4723 = vmatpush1.bf16.msra.mxu1 %v7306_v61  ;;  %v1326_v60 = vld [vmem:[#allocation7 + $0x110] sm:$0xff]  ;;  %v1371_v15 = vld [vmem:[#allocation7 + $0x278] sm:$0xff] }
 0x277   :  { %4560 = vmatprep.subr.bf16.mxu0 %v7313_v63  ;;  %4724 = vmatprep.subr.bf16.mxu1 %v7315_v6  ;;  %v1330_v61 = vld [vmem:[#allocation7 + $0x130] sm:$0xff]  ;;  %v1331_v63 = vld [vmem:[#allocation7 + $0x138] sm:$0xff]  ;;  %v6844_v6 = vcombine.low %v1318_v55, %v1322_v56 }
 0x278   :  { %v6853_v28 = vcombine.high %v1326_v60, %v1330_v61  ;;  %v1366_v55 = vld [vmem:[#allocation7 + $0x250] sm:$0xff] }
 0x279   :  { %v1370_v56 = vld [vmem:[#allocation7 + $0x270] sm:$0xff] }
 0x27a   :  { %4561 = vmatpush1.bf16.msra.mxu0 %v7312_v11  ;;  %4725 = vmatpush1.bf16.msra.mxu1 %v7314_v40  ;;  %v1338_v11 = vld [vmem:[#allocation7 + $0x170] sm:$0xff]  ;;  %v1335_v40 = vld [vmem:[#allocation7 + $0x158] sm:$0xff] }
 0x27b   :  { %4562 = vmatprep.subr.bf16.mxu0 %v7321_v12  ;;  %4726 = vmatprep.subr.bf16.mxu1 %v7323_v20  ;;  %v6852_v12 = vcombine.low %v1326_v60, %v1330_v61  ;;  %v6861_v23 = vcombine.high %v1334_v9, %v1338_v11  ;;  %v6863_v24 = vcombine.high %v1335_v40, %v1339_v3  ;;  %v1374_v60 = vld [vmem:[#allocation7 + $0x290] sm:$0xff] }
 0x27c   :  { %v6862_v48 = vcombine.low %v1335_v40, %v1339_v3  ;;  %v1378_v61 = vld [vmem:[#allocation7 + $0x2b0] sm:$0xff]  ;;  %v1383_v40 = vld [vmem:[#allocation7 + $0x2d8] sm:$0xff] }
 0x27d   :  { %v1387_v3 = vld [vmem:[#allocation7 + $0x2f8] sm:$0xff] }
 0x27e   :  { %4563 = vmatpush1.bf16.msra.mxu0 %v7320_v31  ;;  %4727 = vmatpush1.bf16.msra.mxu1 %v7322_v33  ;;  %v1347_v31 = vld [vmem:[#allocation7 + $0x1b8] sm:$0xff]  ;;  %v6860_v33 = vcombine.low %v1334_v9, %v1338_v11  ;;  %v1382_v9 = vld [vmem:[#allocation7 + $0x2d0] sm:$0xff] }
 0x27f   :  { %4737 = vmatprep.subr.bf16.mxu0 %v6821_v10  ;;  %4901 = vmatprep.subr.bf16.mxu1 %v6823_v34  ;;  %v6869_v10 = vcombine.high %v1342_v27, %v1346_v1  ;;  %v6871_v34 = vcombine.high %v1343_v52, %v1347_v31  ;;  %v1386_v11 = vld [vmem:[#allocation7 + $0x2f0] sm:$0xff] }
 0x281   :  { %4565 = vmatmul.mubr.bf16.vlgmr.msra.gmra.mrb[4].mxu0 %v8416_v38  ;;  %4729 = vmatmul.mubr.bf16.vlgmr.msra.gmra.mrb[12].mxu1 %v8416_v38 }
 0x282   :  { %4738 = vmatpush1.bf16.msra.mxu0 %v6820_v0  ;;  %4769 = vmatprep.mubr.bf16.mxu0 %v8286_v43  ;;  %v6868_v0 = vcombine.low %v1342_v27, %v1346_v1  ;;  %v1390_v27 = vld [vmem:[#allocation7 + $0x310] sm:$0xff] }
 0x283   :  { %4902 = vmatpush1.bf16.msra.mxu1 %v6822_v59  ;;  %4933 = vmatprep.mubr.bf16.mxu1 %v8286_v43  ;;  %v1327_v43 = vld [vmem:[#allocation7 + $0x118] sm:$0xff]  ;;  %v6870_v59 = vcombine.low %v1343_v52, %v1347_v31  ;;  %v1394_v1 = vld [vmem:[#allocation7 + $0x330] sm:$0xff] }
 0x284   :  { %4739 = vmatprep.subr.bf16.mxu0 %v6829_v5  ;;  %4903 = vmatprep.subr.bf16.mxu1 %v6831_v42  ;;  %v6855_v8 = vcombine.high %v1327_v43, %v1331_v63  ;;  %v6854_v20 = vcombine.low %v1327_v43, %v1331_v63  ;;  %v6877_v5 = vcombine.high %v1350_v35, %v1354_v4  ;;  %v1375_v43 = vld [vmem:[#allocation7 + $0x298] sm:$0xff] }
 0x285   :  { %v6879_v42 = vcombine.high %v1351_v54, %v1355_v37  ;;  %v1379_v63 = vld [vmem:[#allocation7 + $0x2b8] sm:$0xff] }
 0x286   :  { %4740 = vmatpush1.bf16.msra.mxu0 %v6828_v50  ;;  %v6876_v50 = vcombine.low %v1350_v35, %v1354_v4  ;;  %v1391_v52 = vld [vmem:[#allocation7 + $0x318] sm:$0xff]  ;;  %v1398_v35 = vld [vmem:[#allocation7 + $0x350] sm:$0xff] }
 0x287   :  { %4904 = vmatpush1.bf16.msra.mxu1 %v6830_v51  ;;  %4741 = vmatprep.subr.bf16.mxu0 %v6837_v53  ;;  %v6878_v51 = vcombine.low %v1351_v54, %v1355_v37  ;;  %v6885_v53 = vcombine.high %v1358_v45, %v1362_v46  ;;  %v1395_v31 = vld [vmem:[#allocation7 + $0x338] sm:$0xff]  ;;  %v1402_v4 = vld [vmem:[#allocation7 + $0x370] sm:$0xff] }
 0x288   :  { %4905 = vmatprep.subr.bf16.mxu1 %v6839_v18  ;;  %v6887_v18 = vcombine.high %v1359_v47, %v1363_v62  ;;  %v1399_v54 = vld [vmem:[#allocation7 + $0x358] sm:$0xff] }
 0x289   :  { %v1403_v37 = vld [vmem:[#allocation7 + $0x378] sm:$0xff] }
 0x28a   :  { %4742 = vmatpush1.bf16.msra.mxu0 %v6836_v16  ;;  %v6884_v16 = vcombine.low %v1358_v45, %v1362_v46  ;;  %v1406_v45 = vld [vmem:[#allocation7 + $0x390] sm:$0xff] }
 0x28b   :  { %4906 = vmatpush1.bf16.msra.mxu1 %v6838_v19  ;;  %4743 = vmatprep.subr.bf16.mxu0 %v6845_v21  ;;  %v6886_v19 = vcombine.low %v1359_v47, %v1363_v62  ;;  %v6893_v21 = vcombine.high %v1366_v55, %v1370_v56  ;;  %v1410_v46 = vld [vmem:[#allocation7 + $0x3b0] sm:$0xff]  ;;  %v1407_v47 = vld [vmem:[#allocation7 + $0x398] sm:$0xff] }
 0x28c   :  { %4907 = vmatprep.subr.bf16.mxu1 %v6847_v58  ;;  %v6895_v58 = vcombine.high %v1367_v57, %v1371_v15  ;;  %v1411_v62 = vld [vmem:[#allocation7 + $0x3b8] sm:$0xff] }
 0x28e   :  { %4744 = vmatpush1.bf16.msra.mxu0 %v6844_v6  ;;  %v6892_v6 = vcombine.low %v1366_v55, %v1370_v56  ;;  %v1414_v55 = vld [vmem:[#allocation7 + $0x3d0] sm:$0xff] }
 0x28f   :  { %4908 = vmatpush1.bf16.msra.mxu1 %v6846_v7  ;;  %4745 = vmatprep.subr.bf16.mxu0 %v6853_v28  ;;  %v6894_v7 = vcombine.low %v1367_v57, %v1371_v15  ;;  %v6901_v28 = vcombine.high %v1374_v60, %v1378_v61  ;;  %v1418_v56 = vld [vmem:[#allocation7 + $0x3f0] sm:$0xff]  ;;  %v1415_v57 = vld [vmem:[#allocation7 + $0x3d8] sm:$0xff] }
 0x290   :  { %4909 = vmatprep.subr.bf16.mxu1 %v6855_v8  ;;  %v6903_v8 = vcombine.high %v1375_v43, %v1379_v63  ;;  %v1419_v15 = vld [vmem:[#allocation7 + $0x3f8] sm:$0xff] }
 0x292   :  { %4746 = vmatpush1.bf16.msra.mxu0 %v6852_v12  ;;  %v6900_v12 = vcombine.low %v1374_v60, %v1378_v61  ;;  %v1422_v60 = vld [vmem:[#allocation7 + $0x410] sm:$0xff] }
 0x293   :  { %4910 = vmatpush1.bf16.msra.mxu1 %v6854_v20  ;;  %4747 = vmatprep.subr.bf16.mxu0 %v6861_v23  ;;  %v6902_v20 = vcombine.low %v1375_v43, %v1379_v63  ;;  %v6909_v23 = vcombine.high %v1382_v9, %v1386_v11  ;;  %v1426_v61 = vld [vmem:[#allocation7 + $0x430] sm:$0xff]  ;;  %v1423_v43 = vld [vmem:[#allocation7 + $0x418] sm:$0xff] }
 0x294   :  { %4911 = vmatprep.subr.bf16.mxu1 %v6863_v24  ;;  %v6911_v24 = vcombine.high %v1383_v40, %v1387_v3  ;;  %v1427_v63 = vld [vmem:[#allocation7 + $0x438] sm:$0xff] }
 0x296   :  { %4748 = vmatpush1.bf16.msra.mxu0 %v6860_v33  ;;  %v6908_v33 = vcombine.low %v1382_v9, %v1386_v11  ;;  %v1430_v9 = vld [vmem:[#allocation7 + $0x450] sm:$0xff] }
 0x297   :  { %4912 = vmatpush1.bf16.msra.mxu1 %v6862_v48  ;;  %4749 = vmatprep.subr.bf16.mxu0 %v6869_v10  ;;  %v6910_v48 = vcombine.low %v1383_v40, %v1387_v3  ;;  %v6917_v10 = vcombine.high %v1390_v27, %v1394_v1  ;;  %v1434_v11 = vld [vmem:[#allocation7 + $0x470] sm:$0xff]  ;;  %v6948_v40 = vcombine.low %v1422_v60, %v1426_v61  ;;  %v1431_v3 = vld [vmem:[#allocation7 + $0x458] sm:$0xff] }
 0x298   :  { %4913 = vmatprep.subr.bf16.mxu1 %v6871_v34  ;;  %v6919_v34 = vcombine.high %v1391_v52, %v1395_v31 }
 0x29a   :  { %4750 = vmatpush1.bf16.msra.mxu0 %v6868_v0  ;;  %v6916_v0 = vcombine.low %v1390_v27, %v1394_v1  ;;  %v1442_v27 = vld [vmem:[#allocation7 + $0x4b0] sm:$0xff] }
 0x29b   :  { %4914 = vmatpush1.bf16.msra.mxu1 %v6870_v59  ;;  %4751 = vmatprep.subr.bf16.mxu0 %v6877_v5  ;;  %v6918_v59 = vcombine.low %v1391_v52, %v1395_v31  ;;  %v6925_v5 = vcombine.high %v1398_v35, %v1402_v4  ;;  %v1439_v52 = vld [vmem:[#allocation7 + $0x498] sm:$0xff] }
 0x29c   :  { %4915 = vmatprep.subr.bf16.mxu1 %v6879_v42  ;;  %v6927_v42 = vcombine.high %v1399_v54, %v1403_v37  ;;  %v1443_v31 = vld [vmem:[#allocation7 + $0x4b8] sm:$0xff] }
 0x29e   :  { %4752 = vmatpush1.bf16.msra.mxu0 %v6876_v50  ;;  %v6924_v50 = vcombine.low %v1398_v35, %v1402_v4  ;;  %v1446_v35 = vld [vmem:[#allocation7 + $0x4d0] sm:$0xff] }
 0x29f   :  { %4916 = vmatpush1.bf16.msra.mxu1 %v6878_v51  ;;  %4753 = vmatprep.subr.bf16.mxu0 %v6885_v53  ;;  %v6926_v51 = vcombine.low %v1399_v54, %v1403_v37  ;;  %v6933_v53 = vcombine.high %v1406_v45, %v1410_v46  ;;  %v1450_v4 = vld [vmem:[#allocation7 + $0x4f0] sm:$0xff]  ;;  %v1447_v54 = vld [vmem:[#allocation7 + $0x4d8] sm:$0xff] }
 0x2a0   :  { %4917 = vmatprep.subr.bf16.mxu1 %v6887_v18  ;;  %v6935_v18 = vcombine.high %v1407_v47, %v1411_v62  ;;  %v1451_v37 = vld [vmem:[#allocation7 + $0x4f8] sm:$0xff] }
 0x2a2   :  { %4754 = vmatpush1.bf16.msra.mxu0 %v6884_v16  ;;  %v6932_v16 = vcombine.low %v1406_v45, %v1410_v46  ;;  %v1458_v45 = vld [vmem:[#allocation7 + $0x530] sm:$0xff]  ;;  %v1455_v46 = vld [vmem:[#allocation7 + $0x518] sm:$0xff] }
 0x2a3   :  { %4918 = vmatpush1.bf16.msra.mxu1 %v6886_v19  ;;  %4755 = vmatprep.subr.bf16.mxu0 %v6893_v21  ;;  %v6934_v19 = vcombine.low %v1407_v47, %v1411_v62  ;;  %v6941_v21 = vcombine.high %v1414_v55, %v1418_v56  ;;  %v1459_v47 = vld [vmem:[#allocation7 + $0x538] sm:$0xff]  ;;  %v6974_v62 = vcombine.low %v1447_v54, %v1451_v37 }
 0x2a4   :  { %4919 = vmatprep.subr.bf16.mxu1 %v6895_v58  ;;  %v6943_v58 = vcombine.high %v1415_v57, %v1419_v15 }
 0x2a6   :  { %4756 = vmatpush1.bf16.msra.mxu0 %v6892_v6  ;;  %v6940_v6 = vcombine.low %v1414_v55, %v1418_v56  ;;  %v1463_v55 = vld [vmem:[#allocation7 + $0x558] sm:$0xff] }
 0x2a7   :  { %4920 = vmatpush1.bf16.msra.mxu1 %v6894_v7  ;;  %4757 = vmatprep.subr.bf16.mxu0 %v6901_v28  ;;  %v6942_v7 = vcombine.low %v1415_v57, %v1419_v15  ;;  %v6949_v28 = vcombine.high %v1422_v60, %v1426_v61  ;;  %v1467_v56 = vld [vmem:[#allocation7 + $0x578] sm:$0xff]  ;;  %v6982_v15 = vcombine.low %v1455_v46, %v1459_v47 }
 0x2a8   :  { %4921 = vmatprep.subr.bf16.mxu1 %v6903_v8  ;;  %v6951_v8 = vcombine.high %v1423_v43, %v1427_v63  ;;  %v1471_v60 = vld [vmem:[#allocation7 + $0x598] sm:$0xff] }
 0x2a9   :  { %v1475_v61 = vld [vmem:[#allocation7 + $0x5b8] sm:$0xff] }
 0x2aa   :  { %4758 = vmatpush1.bf16.msra.mxu0 %v6900_v12  ;;  %v1435_v12 = vld [vmem:[#allocation7 + $0x478] sm:$0xff] }
 0x2ab   :  { %4922 = vmatpush1.bf16.msra.mxu1 %v6902_v20  ;;  %4759 = vmatprep.subr.bf16.mxu0 %v6909_v23  ;;  %v6950_v20 = vcombine.low %v1423_v43, %v1427_v63  ;;  %v6957_v23 = vcombine.high %v1430_v9, %v1434_v11  ;;  %v6959_v1 = vcombine.high %v1431_v3, %v1435_v12 }
 0x2ac   :  { %4923 = vmatprep.subr.bf16.mxu1 %v6911_v24  ;;  %v1438_v24 = vld [vmem:[#allocation7 + $0x490] sm:$0xff]  ;;  %v6990_v63 = vcombine.low %v1463_v55, %v1467_v56 }
 0x2ae   :  { %4760 = vmatpush1.bf16.msra.mxu0 %v6908_v33  ;;  %v6956_v33 = vcombine.low %v1430_v9, %v1434_v11  ;;  %v1479_v9 = vld [vmem:[#allocation7 + $0x5d8] sm:$0xff] }
 0x2af   :  { %4924 = vmatpush1.bf16.msra.mxu1 %v6910_v48  ;;  %4761 = vmatprep.subr.bf16.mxu0 %v6917_v10  ;;  %v6958_v48 = vcombine.low %v1431_v3, %v1435_v12  ;;  %v6965_v10 = vcombine.high %v1438_v24, %v1442_v27  ;;  %v1483_v11 = vld [vmem:[#allocation7 + $0x5f8] sm:$0xff]  ;;  %v6998_v3 = vcombine.low %v1471_v60, %v1475_v61 }
 0x2b0   :  { %4925 = vmatprep.subr.bf16.mxu1 %v6919_v34  ;;  %v6967_v34 = vcombine.high %v1439_v52, %v1443_v31 }
 0x2b2   :  { %4762 = vmatpush1.bf16.msra.mxu0 %v6916_v0  ;;  %v6964_v0 = vcombine.low %v1438_v24, %v1442_v27  ;;  %v1490_v24 = vld [vmem:[#allocation7 + $0x630] sm:$0xff]  ;;  %v1487_v27 = vld [vmem:[#allocation7 + $0x618] sm:$0xff] }
 0x2b3   :  { %4926 = vmatpush1.bf16.msra.mxu1 %v6918_v59  ;;  %4763 = vmatprep.subr.bf16.mxu0 %v6925_v5  ;;  %v6973_v59 = vcombine.high %v1446_v35, %v1450_v4  ;;  %v6975_v5 = vcombine.high %v1447_v54, %v1451_v37 }
 0x2b4   :  { %4927 = vmatprep.subr.bf16.mxu1 %v6927_v42  ;;  %v1454_v42 = vld [vmem:[#allocation7 + $0x510] sm:$0xff] }
 0x2b5   :  { %v6980_v57 = vcombine.low %v1454_v42, %v1458_v45 }
 0x2b6   :  { %4764 = vmatpush1.bf16.msra.mxu0 %v6924_v50  ;;  %v6981_v50 = vcombine.high %v1454_v42, %v1458_v45  ;;  %v1503_v42 = vld [vmem:[#allocation7 + $0x698] sm:$0xff] }
 0x2b7   :  { %4928 = vmatpush1.bf16.msra.mxu1 %v6926_v51  ;;  %4765 = vmatprep.subr.bf16.mxu0 %v6933_v53  ;;  %v6983_v51 = vcombine.high %v1455_v46, %v1459_v47  ;;  %v1462_v53 = vld [vmem:[#allocation7 + $0x550] sm:$0xff]  ;;  %v1507_v45 = vld [vmem:[#allocation7 + $0x6b8] sm:$0xff] }
 0x2b8   :  { %4929 = vmatprep.subr.bf16.mxu1 %v6935_v18  ;;  %v1466_v18 = vld [vmem:[#allocation7 + $0x570] sm:$0xff] }
 0x2b9   :  { %v6988_v43 = vcombine.low %v1462_v53, %v1466_v18 }
 0x2ba   :  { %4766 = vmatpush1.bf16.msra.mxu0 %v6932_v16  ;;  %v6989_v16 = vcombine.high %v1462_v53, %v1466_v18  ;;  %v1511_v53 = vld [vmem:[#allocation7 + $0x6d8] sm:$0xff] }
 0x2bb   :  { %4930 = vmatpush1.bf16.msra.mxu1 %v6934_v19  ;;  %4767 = vmatprep.subr.bf16.mxu0 %v6941_v21  ;;  %v6991_v19 = vcombine.high %v1463_v55, %v1467_v56  ;;  %v1470_v21 = vld [vmem:[#allocation7 + $0x590] sm:$0xff]  ;;  %v1515_v18 = vld [vmem:[#allocation7 + $0x6f8] sm:$0xff]  ;;  %v7030_v56 = vcombine.low %v1503_v42, %v1507_v45 }
 0x2bc   :  { %4931 = vmatprep.subr.bf16.mxu1 %v6943_v58  ;;  %v1474_v58 = vld [vmem:[#allocation7 + $0x5b0] sm:$0xff] }
 0x2be   :  { %4768 = vmatpush1.bf16.msra.mxu0 %v6940_v6  ;;  %v6997_v6 = vcombine.high %v1470_v21, %v1474_v58 }
 0x2bf   :  { %4932 = vmatpush1.bf16.msra.mxu1 %v6942_v7  ;;  %4778 = vmatprep.subr.bf16.mxu0 %v6949_v28  ;;  %v6999_v7 = vcombine.high %v1471_v60, %v1475_v61  ;;  %v1478_v28 = vld [vmem:[#allocation7 + $0x5d0] sm:$0xff]  ;;  %v7038_v61 = vcombine.low %v1511_v53, %v1515_v18 }
 0x2c0   :  { %4942 = vmatprep.subr.bf16.mxu1 %v6951_v8  ;;  %v1482_v8 = vld [vmem:[#allocation7 + $0x5f0] sm:$0xff] }
 0x2c1   :  { %4770 = vmatmul.mubr.bf16.vlgmr.msra.gmra.mrb[8].mxu0 %v8288_v44  ;;  %v7005_v12 = vcombine.high %v1478_v28, %v1482_v8 }
 0x2c2   :  { %4934 = vmatmul.mubr.bf16.vlgmr.msra.gmra.mrb[16].mxu1 %v8288_v44  ;;  %4779 = vmatpush1.bf16.msra.mxu0 %v6948_v40  ;;  %v6966_v44 = vcombine.low %v1439_v52, %v1443_v31  ;;  %v6996_v40 = vcombine.low %v1470_v21, %v1474_v58  ;;  %v7004_v52 = vcombine.low %v1478_v28, %v1482_v8  ;;  %v1519_v21 = vld [vmem:[#allocation7 + $0x718] sm:$0xff] }
 0x2c3   :  { %4810 = vmatprep.mubr.bf16.mxu0 %v8351_v2  ;;  %4943 = vmatpush1.bf16.msra.mxu1 %v6950_v20  ;;  %v7007_v20 = vcombine.high %v1479_v9, %v1483_v11  ;;  %v7006_v31 = vcombine.low %v1479_v9, %v1483_v11  ;;  %v1523_v58 = vld [vmem:[#allocation7 + $0x738] sm:$0xff] }
 0x2c4   :  { %4974 = vmatprep.mubr.bf16.mxu1 %v8351_v2  ;;  %4780 = vmatprep.subr.bf16.mxu0 %v6957_v23  ;;  %v6972_v2 = vcombine.low %v1446_v35, %v1450_v4  ;;  %v1486_v23 = vld [vmem:[#allocation7 + $0x610] sm:$0xff]  ;;  %v1495_v35 = vld [vmem:[#allocation7 + $0x658] sm:$0xff]  ;;  %v7046_v11 = vcombine.low %v1519_v21, %v1523_v58 }
 0x2c5   :  { %4944 = vmatprep.subr.bf16.mxu1 %v6959_v1  ;;  %v1491_v1 = vld [vmem:[#allocation7 + $0x638] sm:$0xff]  ;;  %v7012_v54 = vcombine.low %v1486_v23, %v1490_v24 }
 0x2c6   :  { %4781 = vmatpush1.bf16.msra.mxu0 %v6956_v33  ;;  %v7013_v33 = vcombine.high %v1486_v23, %v1490_v24  ;;  %v1499_v4 = vld [vmem:[#allocation7 + $0x678] sm:$0xff]  ;;  %v7014_v37 = vcombine.low %v1487_v27, %v1491_v1 }
 0x2c7   :  { %4945 = vmatpush1.bf16.msra.mxu1 %v6958_v48  ;;  %4782 = vmatprep.subr.bf16.mxu0 %v6965_v10  ;;  %v7015_v48 = vcombine.high %v1487_v27, %v1491_v1  ;;  %v1494_v10 = vld [vmem:[#allocation7 + $0x650] sm:$0xff]  ;;  %v7022_v47 = vcombine.low %v1495_v35, %v1499_v4  ;;  %v1527_v28 = vld [vmem:[#allocation7 + $0x758] sm:$0xff] }
 0x2c8   :  { %4946 = vmatprep.subr.bf16.mxu1 %v6967_v34  ;;  %v1498_v34 = vld [vmem:[#allocation7 + $0x670] sm:$0xff]  ;;  %v1531_v8 = vld [vmem:[#allocation7 + $0x778] sm:$0xff] }
 0x2c9   :  { %v7020_v46 = vcombine.low %v1494_v10, %v1498_v34  ;;  %v1535_v23 = vld [vmem:[#allocation7 + $0x798] sm:$0xff]  ;;  %v7054_v1 = vcombine.low %v1527_v28, %v1531_v8 }
 0x2ca   :  { %4783 = vmatpush1.bf16.msra.mxu0 %v6964_v0  ;;  %v7021_v0 = vcombine.high %v1494_v10, %v1498_v34  ;;  %v1539_v24 = vld [vmem:[#allocation7 + $0x7b8] sm:$0xff] }
 0x2cb   :  { %4947 = vmatpush1.bf16.msra.mxu1 %v6966_v44  ;;  %4784 = vmatprep.subr.bf16.mxu0 %v6973_v59  ;;  %v7023_v44 = vcombine.high %v1495_v35, %v1499_v4  ;;  %v1502_v59 = vld [vmem:[#allocation7 + $0x690] sm:$0xff]  ;;  %v1543_v10 = vld [vmem:[#allocation7 + $0x7d8] sm:$0xff]  ;;  %v7062_v4 = vcombine.low %v1535_v23, %v1539_v24 }
 0x2cc   :  { %4948 = vmatprep.subr.bf16.mxu1 %v6975_v5  ;;  %v1506_v5 = vld [vmem:[#allocation7 + $0x6b0] sm:$0xff]  ;;  %v1547_v34 = vld [vmem:[#allocation7 + $0x7f8] sm:$0xff] }
 0x2cd   :  { %v7028_v55 = vcombine.low %v1502_v59, %v1506_v5 }
 0x2ce   :  { %4785 = vmatpush1.bf16.msra.mxu0 %v6972_v2  ;;  %v7029_v2 = vcombine.high %v1502_v59, %v1506_v5  ;;  %v1551_v59 = vld [vmem:[#allocation7 + $0x818] sm:$0xff] }
 0x2cf   :  { %4949 = vmatpush1.bf16.msra.mxu1 %v6974_v62  ;;  %4786 = vmatprep.subr.bf16.mxu0 %v6981_v50  ;;  %v7031_v62 = vcombine.high %v1503_v42, %v1507_v45  ;;  %v1510_v50 = vld [vmem:[#allocation7 + $0x6d0] sm:$0xff]  ;;  %v1555_v5 = vld [vmem:[#allocation7 + $0x838] sm:$0xff]  ;;  %v7070_v45 = vcombine.low %v1543_v10, %v1547_v34 }
 0x2d0   :  { %4950 = vmatprep.subr.bf16.mxu1 %v6983_v51  ;;  %v1514_v51 = vld [vmem:[#allocation7 + $0x6f0] sm:$0xff] }
 0x2d1   :  { %v7036_v60 = vcombine.low %v1510_v50, %v1514_v51 }
 0x2d2   :  { %4787 = vmatpush1.bf16.msra.mxu0 %v6980_v57  ;;  %v7037_v57 = vcombine.high %v1510_v50, %v1514_v51  ;;  %v1559_v51 = vld [vmem:[#allocation7 + $0x858] sm:$0xff] }
 0x2d3   :  { %4951 = vmatpush1.bf16.msra.mxu1 %v6982_v15  ;;  %4788 = vmatprep.subr.bf16.mxu0 %v6989_v16  ;;  %v7039_v15 = vcombine.high %v1511_v53, %v1515_v18  ;;  %v1518_v16 = vld [vmem:[#allocation7 + $0x710] sm:$0xff]  ;;  %v1563_v53 = vld [vmem:[#allocation7 + $0x878] sm:$0xff]  ;;  %v7078_v18 = vcombine.low %v1551_v59, %v1555_v5 }
 0x2d4   :  { %4952 = vmatprep.subr.bf16.mxu1 %v6991_v19  ;;  %v1522_v19 = vld [vmem:[#allocation7 + $0x730] sm:$0xff] }
 0x2d5   :  { %v7044_v9 = vcombine.low %v1518_v16, %v1522_v19 }
 0x2d6   :  { %4789 = vmatpush1.bf16.msra.mxu0 %v6988_v43  ;;  %v7045_v43 = vcombine.high %v1518_v16, %v1522_v19  ;;  %v1567_v16 = vld [vmem:[#allocation7 + $0x898] sm:$0xff] }
 0x2d7   :  { %4953 = vmatpush1.bf16.msra.mxu1 %v6990_v63  ;;  %4790 = vmatprep.subr.bf16.mxu0 %v6997_v6  ;;  %v7047_v63 = vcombine.high %v1519_v21, %v1523_v58  ;;  %v1526_v6 = vld [vmem:[#allocation7 + $0x750] sm:$0xff]  ;;  %v1571_v19 = vld [vmem:[#allocation7 + $0x8b8] sm:$0xff]  ;;  %v7086_v58 = vcombine.low %v1559_v51, %v1563_v53 }
 0x2d8   :  { %4954 = vmatprep.subr.bf16.mxu1 %v6999_v7  ;;  %v1530_v7 = vld [vmem:[#allocation7 + $0x770] sm:$0xff] }
 0x2d9   :  { %v7052_v27 = vcombine.low %v1526_v6, %v1530_v7 }
 0x2da   :  { %4791 = vmatpush1.bf16.msra.mxu0 %v6996_v40  ;;  %v7053_v40 = vcombine.high %v1526_v6, %v1530_v7  ;;  %v1575_v6 = vld [vmem:[#allocation7 + $0x8d8] sm:$0xff] }
 0x2db   :  { %4955 = vmatpush1.bf16.msra.mxu1 %v6998_v3  ;;  %4792 = vmatprep.subr.bf16.mxu0 %v7005_v12  ;;  %v7055_v3 = vcombine.high %v1527_v28, %v1531_v8  ;;  %v1534_v12 = vld [vmem:[#allocation7 + $0x790] sm:$0xff]  ;;  %v1579_v7 = vld [vmem:[#allocation7 + $0x8f8] sm:$0xff] }
 0x2dc   :  { %4956 = vmatprep.subr.bf16.mxu1 %v7007_v20  ;;  %v1538_v20 = vld [vmem:[#allocation7 + $0x7b0] sm:$0xff] }
 0x2dd   :  { %v7060_v35 = vcombine.low %v1534_v12, %v1538_v20 }
 0x2de   :  { %4793 = vmatpush1.bf16.msra.mxu0 %v7004_v52  ;;  %v7061_v52 = vcombine.high %v1534_v12, %v1538_v20  ;;  %v1587_v12 = vld [vmem:[#allocation7 + $0x938] sm:$0xff]  ;;  %v7102_v20 = vcombine.low %v1575_v6, %v1579_v7 }
 0x2df   :  { %4957 = vmatpush1.bf16.msra.mxu1 %v7006_v31  ;;  %4794 = vmatprep.subr.bf16.mxu0 %v7013_v33  ;;  %v7063_v31 = vcombine.high %v1535_v23, %v1539_v24  ;;  %v1542_v33 = vld [vmem:[#allocation7 + $0x7d0] sm:$0xff] }
 0x2e0   :  { %4958 = vmatprep.subr.bf16.mxu1 %v7015_v48  ;;  %v1546_v48 = vld [vmem:[#allocation7 + $0x7f0] sm:$0xff] }
 0x2e1   :  { %v7068_v42 = vcombine.low %v1542_v33, %v1546_v48 }
 0x2e2   :  { %4795 = vmatpush1.bf16.msra.mxu0 %v7012_v54  ;;  %v7069_v54 = vcombine.high %v1542_v33, %v1546_v48 }
 0x2e3   :  { %4959 = vmatpush1.bf16.msra.mxu1 %v7014_v37  ;;  %4796 = vmatprep.subr.bf16.mxu0 %v7021_v0  ;;  %v7071_v37 = vcombine.high %v1543_v10, %v1547_v34  ;;  %v1550_v0 = vld [vmem:[#allocation7 + $0x810] sm:$0xff] }
 0x2e4   :  { %4960 = vmatprep.subr.bf16.mxu1 %v7023_v44  ;;  %v1554_v44 = vld [vmem:[#allocation7 + $0x830] sm:$0xff] }
 0x2e5   :  { %v7076_v50 = vcombine.low %v1550_v0, %v1554_v44 }
 0x2e6   :  { %4797 = vmatpush1.bf16.msra.mxu0 %v7020_v46  ;;  %v7077_v46 = vcombine.high %v1550_v0, %v1554_v44 }
 0x2e7   :  { %4961 = vmatpush1.bf16.msra.mxu1 %v7022_v47  ;;  %4798 = vmatprep.subr.bf16.mxu0 %v7029_v2  ;;  %v7079_v47 = vcombine.high %v1551_v59, %v1555_v5  ;;  %v1558_v2 = vld [vmem:[#allocation7 + $0x850] sm:$0xff] }
 0x2e8   :  { %4962 = vmatprep.subr.bf16.mxu1 %v7031_v62  ;;  %v1562_v62 = vld [vmem:[#allocation7 + $0x870] sm:$0xff] }
 0x2e9   :  { %v7084_v21 = vcombine.low %v1558_v2, %v1562_v62 }
 0x2ea   :  { %4799 = vmatpush1.bf16.msra.mxu0 %v7028_v55  ;;  %v7085_v55 = vcombine.high %v1558_v2, %v1562_v62 }
 0x2eb   :  { %4963 = vmatpush1.bf16.msra.mxu1 %v7030_v56  ;;  %4800 = vmatprep.subr.bf16.mxu0 %v7037_v57  ;;  %v1566_v56 = vld [vmem:[#allocation7 + $0x890] sm:$0xff] }
 0x2ec   :  { %4964 = vmatprep.subr.bf16.mxu1 %v7039_v15  ;;  %v1570_v57 = vld [vmem:[#allocation7 + $0x8b0] sm:$0xff]  ;;  %v7087_v15 = vcombine.high %v1559_v51, %v1563_v53 }
 0x2ed   :  { %v7092_v28 = vcombine.low %v1566_v56, %v1570_v57  ;;  %v1614_v53 = vld [vmem:[#allocation7 + $0xa10] sm:$0xff] }
 0x2ee   :  { %4801 = vmatpush1.bf16.msra.mxu0 %v7036_v60  ;;  %v7093_v60 = vcombine.high %v1566_v56, %v1570_v57  ;;  %v1619_v56 = vld [vmem:[#allocation7 + $0xa38] sm:$0xff] }
 0x2ef   :  { %4965 = vmatpush1.bf16.msra.mxu1 %v7038_v61  ;;  %4802 = vmatprep.subr.bf16.mxu0 %v7045_v43  ;;  %v7095_v61 = vcombine.high %v1567_v16, %v1571_v19  ;;  %v1574_v43 = vld [vmem:[#allocation7 + $0x8d0] sm:$0xff] }
 0x2f0   :  { %4966 = vmatprep.subr.bf16.mxu1 %v7047_v63  ;;  %v1578_v63 = vld [vmem:[#allocation7 + $0x8f0] sm:$0xff] }
 0x2f1   :  { %v7101_v8 = vcombine.high %v1574_v43, %v1578_v63 }
 0x2f2   :  { %4803 = vmatpush1.bf16.msra.mxu0 %v7044_v9  ;;  %v7103_v9 = vcombine.high %v1575_v6, %v1579_v7 }
 0x2f3   :  { %4967 = vmatpush1.bf16.msra.mxu1 %v7046_v11  ;;  %4804 = vmatprep.subr.bf16.mxu0 %v7053_v40  ;;  %v1582_v11 = vld [vmem:[#allocation7 + $0x910] sm:$0xff] }
 0x2f4   :  { %4968 = vmatprep.subr.bf16.mxu1 %v7055_v3  ;;  %v1586_v40 = vld [vmem:[#allocation7 + $0x930] sm:$0xff]  ;;  %v1583_v3 = vld [vmem:[#allocation7 + $0x918] sm:$0xff] }
 0x2f5   :  { %v7109_v23 = vcombine.high %v1582_v11, %v1586_v40  ;;  %v7111_v24 = vcombine.high %v1583_v3, %v1587_v12  ;;  %v7108_v33 = vcombine.low %v1582_v11, %v1586_v40  ;;  %v7110_v48 = vcombine.low %v1583_v3, %v1587_v12 }
 0x2f6   :  { %4805 = vmatpush1.bf16.msra.mxu0 %v7052_v27  ;;  %v1590_v27 = vld [vmem:[#allocation7 + $0x950] sm:$0xff] }
 0x2f7   :  { %4969 = vmatpush1.bf16.msra.mxu1 %v7054_v1  ;;  %4806 = vmatprep.subr.bf16.mxu0 %v7061_v52  ;;  %v1594_v1 = vld [vmem:[#allocation7 + $0x970] sm:$0xff]  ;;  %v1591_v52 = vld [vmem:[#allocation7 + $0x958] sm:$0xff] }
 0x2f8   :  { %4970 = vmatprep.subr.bf16.mxu1 %v7063_v31  ;;  %v1595_v31 = vld [vmem:[#allocation7 + $0x978] sm:$0xff]  ;;  %v7117_v10 = vcombine.high %v1590_v27, %v1594_v1  ;;  %v7116_v0 = vcombine.low %v1590_v27, %v1594_v1 }
 0x2f9   :  { %v7119_v34 = vcombine.high %v1591_v52, %v1595_v31  ;;  %v7118_v44 = vcombine.low %v1591_v52, %v1595_v31 }
 0x2fa   :  { %4807 = vmatpush1.bf16.msra.mxu0 %v7060_v35  ;;  %v1598_v35 = vld [vmem:[#allocation7 + $0x990] sm:$0xff] }
 0x2fb   :  { %4971 = vmatpush1.bf16.msra.mxu1 %v7062_v4  ;;  %4808 = vmatprep.subr.bf16.mxu0 %v7069_v54  ;;  %v1602_v4 = vld [vmem:[#allocation7 + $0x9b0] sm:$0xff]  ;;  %v1599_v54 = vld [vmem:[#allocation7 + $0x998] sm:$0xff] }
 0x2fc   :  { %4972 = vmatprep.subr.bf16.mxu1 %v7071_v37  ;;  %v1603_v37 = vld [vmem:[#allocation7 + $0x9b8] sm:$0xff]  ;;  %v7125_v59 = vcombine.high %v1598_v35, %v1602_v4  ;;  %v7124_v2 = vcombine.low %v1598_v35, %v1602_v4 }
 0x2fd   :  { %v7127_v5 = vcombine.high %v1599_v54, %v1603_v37  ;;  %v7126_v62 = vcombine.low %v1599_v54, %v1603_v37 }
 0x2fe   :  { %4809 = vmatpush1.bf16.msra.mxu0 %v7068_v42  ;;  %v1606_v42 = vld [vmem:[#allocation7 + $0x9d0] sm:$0xff] }
 0x2ff   :  { %4973 = vmatpush1.bf16.msra.mxu1 %v7070_v45  ;;  %4819 = vmatprep.subr.bf16.mxu0 %v7077_v46  ;;  %v1610_v45 = vld [vmem:[#allocation7 + $0x9f0] sm:$0xff]  ;;  %v1607_v46 = vld [vmem:[#allocation7 + $0x9d8] sm:$0xff] }
 0x300   :  { %4983 = vmatprep.subr.bf16.mxu1 %v7079_v47  ;;  %v1611_v47 = vld [vmem:[#allocation7 + $0x9f8] sm:$0xff]  ;;  %v7132_v57 = vcombine.low %v1606_v42, %v1610_v45 }
 0x301   :  { %4811 = vmatmul.mubr.bf16.vlgmr.msra.gmra.mrb[8].mxu0 %v8353_v41  ;;  %v7135_v51 = vcombine.high %v1607_v46, %v1611_v47 }
 0x302   :  { %4975 = vmatmul.mubr.bf16.vlgmr.msra.gmra.mrb[16].mxu1 %v8353_v41  ;;  %4820 = vmatpush1.bf16.msra.mxu0 %v7076_v50  ;;  %v7094_v41 = vcombine.low %v1567_v16, %v1571_v19  ;;  %v7133_v50 = vcombine.high %v1606_v42, %v1610_v45 }
 0x303   :  { %4851 = vmatprep.mubr.bf16.mxu0 %v8357_v49  ;;  %4984 = vmatpush1.bf16.msra.mxu1 %v7078_v18  ;;  %v1618_v18 = vld [vmem:[#allocation7 + $0xa30] sm:$0xff] }
 0x304   :  { %5015 = vmatprep.mubr.bf16.mxu1 %v8357_v49  ;;  %4821 = vmatprep.subr.bf16.mxu0 %v7085_v55  ;;  %v7100_v49 = vcombine.low %v1574_v43, %v1578_v63  ;;  %v1615_v55 = vld [vmem:[#allocation7 + $0xa18] sm:$0xff]  ;;  %v7141_v16 = vcombine.high %v1614_v53, %v1618_v18  ;;  %v7140_v43 = vcombine.low %v1614_v53, %v1618_v18 }
 0x305   :  { %4985 = vmatprep.subr.bf16.mxu1 %v7087_v15  ;;  %v7134_v15 = vcombine.low %v1607_v46, %v1611_v47  ;;  %v7143_v19 = vcombine.high %v1615_v55, %v1619_v56  ;;  %v7142_v63 = vcombine.low %v1615_v55, %v1619_v56 }
 0x306   :  { %4822 = vmatpush1.bf16.msra.mxu0 %v7084_v21  ;;  %v1622_v21 = vld [vmem:[#allocation7 + $0xa50] sm:$0xff] }
 0x307   :  { %4986 = vmatpush1.bf16.msra.mxu1 %v7086_v58  ;;  %4823 = vmatprep.subr.bf16.mxu0 %v7093_v60  ;;  %v1626_v58 = vld [vmem:[#allocation7 + $0xa70] sm:$0xff]  ;;  %v1623_v60 = vld [vmem:[#allocation7 + $0xa58] sm:$0xff] }
 0x308   :  { %4987 = vmatprep.subr.bf16.mxu1 %v7095_v61  ;;  %v1627_v61 = vld [vmem:[#allocation7 + $0xa78] sm:$0xff]  ;;  %v7149_v6 = vcombine.high %v1622_v21, %v1626_v58  ;;  %v7148_v11 = vcombine.low %v1622_v21, %v1626_v58 }
 0x309   :  { %v7151_v7 = vcombine.high %v1623_v60, %v1627_v61  ;;  %v7150_v40 = vcombine.low %v1623_v60, %v1627_v61 }
 0x30a   :  { %4824 = vmatpush1.bf16.msra.mxu0 %v7092_v28  ;;  %v1630_v28 = vld [vmem:[#allocation7 + $0xa90] sm:$0xff] }
 0x30b   :  { %4988 = vmatpush1.bf16.msra.mxu1 %v7094_v41  ;;  %4825 = vmatprep.subr.bf16.mxu0 %v7101_v8  ;;  %v1634_v41 = vld [vmem:[#allocation7 + $0xab0] sm:$0xff]  ;;  %v1631_v8 = vld [vmem:[#allocation7 + $0xa98] sm:$0xff] }
 0x30c   :  { %4989 = vmatprep.subr.bf16.mxu1 %v7103_v9  ;;  %v1635_v9 = vld [vmem:[#allocation7 + $0xab8] sm:$0xff]  ;;  %v7157_v3 = vcombine.high %v1630_v28, %v1634_v41  ;;  %v7156_v27 = vcombine.low %v1630_v28, %v1634_v41 }
 0x30d   :  { %v7159_v12 = vcombine.high %v1631_v8, %v1635_v9  ;;  %v7158_v1 = vcombine.low %v1631_v8, %v1635_v9 }
 0x30e   :  { %4826 = vmatpush1.bf16.msra.mxu0 %v7100_v49  ;;  %v1638_v49 = vld [vmem:[#allocation7 + $0xad0] sm:$0xff] }
 0x30f   :  { %4990 = vmatpush1.bf16.msra.mxu1 %v7102_v20  ;;  %4827 = vmatprep.subr.bf16.mxu0 %v7109_v23  ;;  %v1642_v20 = vld [vmem:[#allocation7 + $0xaf0] sm:$0xff]  ;;  %v1639_v23 = vld [vmem:[#allocation7 + $0xad8] sm:$0xff] }
 0x310   :  { %4991 = vmatprep.subr.bf16.mxu1 %v7111_v24  ;;  %v1643_v24 = vld [vmem:[#allocation7 + $0xaf8] sm:$0xff]  ;;  %v7165_v52 = vcombine.high %v1638_v49, %v1642_v20  ;;  %v7164_v35 = vcombine.low %v1638_v49, %v1642_v20 }
 0x311   :  { %v7167_v31 = vcombine.high %v1639_v23, %v1643_v24  ;;  %v7166_v4 = vcombine.low %v1639_v23, %v1643_v24  ;;  %v1691_v49 = vld [vmem:[#allocation7 + $0xc78] sm:$0xff]  ;;  %v1694_v24 = vld [vmem:[#allocation7 + $0xc90] sm:$0xff] }
 0x312   :  { %4828 = vmatpush1.bf16.msra.mxu0 %v7108_v33  ;;  %v1646_v33 = vld [vmem:[#allocation7 + $0xb10] sm:$0xff] }
 0x313   :  { %4992 = vmatpush1.bf16.msra.mxu1 %v7110_v48  ;;  %4829 = vmatprep.subr.bf16.mxu0 %v7117_v10  ;;  %v1650_v48 = vld [vmem:[#allocation7 + $0xb30] sm:$0xff]  ;;  %v1647_v10 = vld [vmem:[#allocation7 + $0xb18] sm:$0xff] }
 0x314   :  { %4993 = vmatprep.subr.bf16.mxu1 %v7119_v34  ;;  %v1651_v34 = vld [vmem:[#allocation7 + $0xb38] sm:$0xff]  ;;  %v7173_v54 = vcombine.high %v1646_v33, %v1650_v48  ;;  %v7172_v42 = vcombine.low %v1646_v33, %v1650_v48 }
 0x315   :  { %v7175_v37 = vcombine.high %v1647_v10, %v1651_v34  ;;  %v7174_v45 = vcombine.low %v1647_v10, %v1651_v34 }
 0x316   :  { %4830 = vmatpush1.bf16.msra.mxu0 %v7116_v0  ;;  %v1654_v0 = vld [vmem:[#allocation7 + $0xb50] sm:$0xff] }
 0x317   :  { %4994 = vmatpush1.bf16.msra.mxu1 %v7118_v44  ;;  %4831 = vmatprep.subr.bf16.mxu0 %v7125_v59  ;;  %v1658_v44 = vld [vmem:[#allocation7 + $0xb70] sm:$0xff]  ;;  %v1655_v59 = vld [vmem:[#allocation7 + $0xb58] sm:$0xff] }
 0x318   :  { %4995 = vmatprep.subr.bf16.mxu1 %v7127_v5  ;;  %v1659_v5 = vld [vmem:[#allocation7 + $0xb78] sm:$0xff]  ;;  %v7181_v46 = vcombine.high %v1654_v0, %v1658_v44  ;;  %v7180_v53 = vcombine.low %v1654_v0, %v1658_v44 }
 0x319   :  { %v7183_v47 = vcombine.high %v1655_v59, %v1659_v5  ;;  %v7182_v18 = vcombine.low %v1655_v59, %v1659_v5  ;;  %v1710_v5 = vld [vmem:[#allocation7 + $0xd10] sm:$0xff] }
 0x31a   :  { %4832 = vmatpush1.bf16.msra.mxu0 %v7124_v2  ;;  %v1662_v2 = vld [vmem:[#allocation7 + $0xb90] sm:$0xff] }
 0x31b   :  { %4996 = vmatpush1.bf16.msra.mxu1 %v7126_v62  ;;  %4833 = vmatprep.subr.bf16.mxu0 %v7133_v50  ;;  %v1666_v62 = vld [vmem:[#allocation7 + $0xbb0] sm:$0xff]  ;;  %v1663_v50 = vld [vmem:[#allocation7 + $0xb98] sm:$0xff] }
 0x31c   :  { %4997 = vmatprep.subr.bf16.mxu1 %v7135_v51  ;;  %v1667_v51 = vld [vmem:[#allocation7 + $0xbb8] sm:$0xff]  ;;  %v7189_v55 = vcombine.high %v1662_v2, %v1666_v62  ;;  %v7188_v21 = vcombine.low %v1662_v2, %v1666_v62 }
 0x31d   :  { %v7191_v56 = vcombine.high %v1663_v50, %v1667_v51  ;;  %v7190_v58 = vcombine.low %v1663_v50, %v1667_v51  ;;  %v1805_v62 = vld [vmem:[#allocation13 + $0x1] ss:$8 sm:$0xf] }
 0x31e   :  { %4834 = vmatpush1.bf16.msra.mxu0 %v7132_v57  ;;  %v1670_v57 = vld [vmem:[#allocation7 + $0xbd0] sm:$0xff] }
 0x31f   :  { %4998 = vmatpush1.bf16.msra.mxu1 %v7134_v15  ;;  %4835 = vmatprep.subr.bf16.mxu0 %v7141_v16  ;;  %v1674_v15 = vld [vmem:[#allocation7 + $0xbf0] sm:$0xff]  ;;  %v1671_v16 = vld [vmem:[#allocation7 + $0xbd8] sm:$0xff] }
 0x320   :  { %4999 = vmatprep.subr.bf16.mxu1 %v7143_v19  ;;  %v1675_v19 = vld [vmem:[#allocation7 + $0xbf8] sm:$0xff]  ;;  %v7197_v60 = vcombine.high %v1670_v57, %v1674_v15  ;;  %v7196_v28 = vcombine.low %v1670_v57, %v1674_v15 }
 0x321   :  { %v7199_v61 = vcombine.high %v1671_v16, %v1675_v19  ;;  %v7198_v41 = vcombine.low %v1671_v16, %v1675_v19  ;;  %v1806_v50 = vld [vmem:[#allocation13 + $0x1] ss:$8 sm:$0xf0] }
 0x322   :  { %4836 = vmatpush1.bf16.msra.mxu0 %v7140_v43  ;;  %v1678_v43 = vld [vmem:[#allocation7 + $0xc10] sm:$0xff]  ;;  %v8434_v15 = vor.u32 %v1806_v50, %v1805_v62  ;;  %v1755_v62 = vld [vmem:[#allocation7 + $0xe78] sm:$0xff] }
 0x323   :  { %5000 = vmatpush1.bf16.msra.mxu1 %v7142_v63  ;;  %4837 = vmatprep.subr.bf16.mxu0 %v7149_v6  ;;  %v1682_v63 = vld [vmem:[#allocation7 + $0xc30] sm:$0xff]  ;;  %v1679_v6 = vld [vmem:[#allocation7 + $0xc18] sm:$0xff] }
 0x324   :  { %5001 = vmatprep.subr.bf16.mxu1 %v7151_v7  ;;  %v1683_v7 = vld [vmem:[#allocation7 + $0xc38] sm:$0xff]  ;;  %v7205_v8 = vcombine.high %v1678_v43, %v1682_v63 }
 0x325   :  { %v7207_v9 = vcombine.high %v1679_v6, %v1683_v7  ;;  %v7206_v20 = vcombine.low %v1679_v6, %v1683_v7 }
 0x326   :  { %4838 = vmatpush1.bf16.msra.mxu0 %v7148_v11  ;;  %v1686_v11 = vld [vmem:[#allocation7 + $0xc50] sm:$0xff] }
 0x327   :  { %5002 = vmatpush1.bf16.msra.mxu1 %v7150_v40  ;;  %4839 = vmatprep.subr.bf16.mxu0 %v7157_v3  ;;  %v1690_v40 = vld [vmem:[#allocation7 + $0xc70] sm:$0xff]  ;;  %v7204_v3 = vcombine.low %v1678_v43, %v1682_v63  ;;  %v1731_v43 = vld [vmem:[#allocation7 + $0xdb8] sm:$0xff]  ;;  %v1816_v63 = vrot.slane %v8434_v15, %v8274_v30 }
 0x328   :  { %5003 = vmatprep.subr.bf16.mxu1 %v7159_v12  ;;  %v1687_v12 = vld [vmem:[#allocation7 + $0xc58] sm:$0xff]  ;;  %v7213_v23 = vcombine.high %v1686_v11, %v1690_v40  ;;  %v7212_v33 = vcombine.low %v1686_v11, %v1690_v40  ;;  %v1734_v11 = vld [vmem:[#allocation7 + $0xdd0] sm:$0xff] }
 0x329   :  { %v7214_v48 = vcombine.low %v1687_v12, %v1691_v49  ;;  %v1738_v40 = vld [vmem:[#allocation7 + $0xdf0] sm:$0xff] }
 0x32a   :  { %4840 = vmatpush1.bf16.msra.mxu0 %v7156_v27  ;;  %v1698_v27 = vld [vmem:[#allocation7 + $0xcb0] sm:$0xff] }
 0x32b   :  { %5004 = vmatpush1.bf16.msra.mxu1 %v7158_v1  ;;  %4841 = vmatprep.subr.bf16.mxu0 %v7165_v52  ;;  %v7215_v1 = vcombine.high %v1687_v12, %v1691_v49  ;;  %v1695_v52 = vld [vmem:[#allocation7 + $0xc98] sm:$0xff]  ;;  %v7221_v10 = vcombine.high %v1694_v24, %v1698_v27  ;;  %v7220_v0 = vcombine.low %v1694_v24, %v1698_v27 }
 0x32c   :  { %5005 = vmatprep.subr.bf16.mxu1 %v7167_v31  ;;  %v1699_v31 = vld [vmem:[#allocation7 + $0xcb8] sm:$0xff] }
 0x32d   :  { %v7223_v34 = vcombine.high %v1695_v52, %v1699_v31  ;;  %v1735_v49 = vld [vmem:[#allocation7 + $0xdd8] sm:$0xff] }
 0x32e   :  { %4842 = vmatpush1.bf16.msra.mxu0 %v7164_v35  ;;  %v1702_v35 = vld [vmem:[#allocation7 + $0xcd0] sm:$0xff] }
 0x32f   :  { %5006 = vmatpush1.bf16.msra.mxu1 %v7166_v4  ;;  %4843 = vmatprep.subr.bf16.mxu0 %v7173_v54  ;;  %v1706_v4 = vld [vmem:[#allocation7 + $0xcf0] sm:$0xff]  ;;  %v1703_v54 = vld [vmem:[#allocation7 + $0xcd8] sm:$0xff] }
 0x330   :  { %5007 = vmatprep.subr.bf16.mxu1 %v7175_v37  ;;  %v1707_v37 = vld [vmem:[#allocation7 + $0xcf8] sm:$0xff]  ;;  %v7229_v44 = vcombine.high %v1702_v35, %v1706_v4 }
 0x331   :  { %v7231_v59 = vcombine.high %v1703_v54, %v1707_v37 }
 0x332   :  { %4844 = vmatpush1.bf16.msra.mxu0 %v7172_v42  ;;  %v1714_v42 = vld [vmem:[#allocation7 + $0xd30] sm:$0xff] }
 0x333   :  { %5008 = vmatpush1.bf16.msra.mxu1 %v7174_v45  ;;  %4845 = vmatprep.subr.bf16.mxu0 %v7181_v46  ;;  %v1711_v45 = vld [vmem:[#allocation7 + $0xd18] sm:$0xff]  ;;  %v7237_v2 = vcombine.high %v1710_v5, %v1714_v42  ;;  %v7236_v57 = vcombine.low %v1710_v5, %v1714_v42 }
 0x334   :  { %5009 = vmatprep.subr.bf16.mxu1 %v7183_v47  ;;  %v1715_v46 = vld [vmem:[#allocation7 + $0xd38] sm:$0xff]  ;;  %v7230_v47 = vcombine.low %v1703_v54, %v1707_v37 }
 0x335   :  { %v7239_v51 = vcombine.high %v1711_v45, %v1715_v46  ;;  %v7238_v16 = vcombine.low %v1711_v45, %v1715_v46  ;;  %v1743_v54 = vld [vmem:[#allocation7 + $0xe18] sm:$0xff] }
 0x336   :  { %4846 = vmatpush1.bf16.msra.mxu0 %v7180_v53  ;;  %v1718_v53 = vld [vmem:[#allocation7 + $0xd50] sm:$0xff]  ;;  %v1747_v37 = vld [vmem:[#allocation7 + $0xe38] sm:$0xff] }
 0x337   :  { %5010 = vmatpush1.bf16.msra.mxu1 %v7182_v18  ;;  %4847 = vmatprep.subr.bf16.mxu0 %v7189_v55  ;;  %v1722_v18 = vld [vmem:[#allocation7 + $0xd70] sm:$0xff]  ;;  %v1719_v55 = vld [vmem:[#allocation7 + $0xd58] sm:$0xff]  ;;  %v7271_v46 = vcombine.high %v1743_v54, %v1747_v37 }
 0x338   :  { %5011 = vmatprep.subr.bf16.mxu1 %v7191_v56  ;;  %v1723_v56 = vld [vmem:[#allocation7 + $0xd78] sm:$0xff]  ;;  %v7245_v19 = vcombine.high %v1718_v53, %v1722_v18  ;;  %v7244_v6 = vcombine.low %v1718_v53, %v1722_v18  ;;  %v7270_v18 = vcombine.low %v1743_v54, %v1747_v37 }
 0x339   :  { %v7246_v7 = vcombine.low %v1719_v55, %v1723_v56  ;;  %v1779_v54 = vld [vmem:[#allocation7 + $0xf38] sm:$0xff] }
 0x33a   :  { %4848 = vmatpush1.bf16.msra.mxu0 %v7188_v21  ;;  %v7247_v21 = vcombine.high %v1719_v55, %v1723_v56 }
 0x33b   :  { %5012 = vmatpush1.bf16.msra.mxu1 %v7190_v58  ;;  %4849 = vmatprep.subr.bf16.mxu0 %v7197_v60  ;;  %v1726_v58 = vld [vmem:[#allocation7 + $0xd90] sm:$0xff] }
 0x33c   :  { %5013 = vmatprep.subr.bf16.mxu1 %v7199_v61  ;;  %v1730_v60 = vld [vmem:[#allocation7 + $0xdb0] sm:$0xff]  ;;  %v1727_v61 = vld [vmem:[#allocation7 + $0xd98] sm:$0xff] }
 0x33e   :  { %4850 = vmatpush1.bf16.msra.mxu0 %v7196_v28  ;;  %v7253_v28 = vcombine.high %v1726_v58, %v1730_v60 }
 0x33f   :  { %5014 = vmatpush1.bf16.msra.mxu1 %v7198_v41  ;;  %4860 = vmatprep.subr.bf16.mxu0 %v7205_v8 }
 0x340   :  { %5024 = vmatprep.subr.bf16.mxu1 %v7207_v9  ;;  %v7255_v9 = vcombine.high %v1727_v61, %v1731_v43 }
 0x341   :  { %4852 = vmatmul.mubr.bf16.vlgmr.msra.gmra.mrb[8].mxu0 %v8398_v32 }
 0x342   :  { %5016 = vmatmul.mubr.bf16.vlgmr.msra.gmra.mrb[16].mxu1 %v8398_v32  ;;  %4861 = vmatpush1.bf16.msra.mxu0 %v7204_v3  ;;  %v7222_v32 = vcombine.low %v1695_v52, %v1699_v31 }
 0x343   :  { %4892 = vmatprep.mubr.bf16.mxu0 %v8400_v22  ;;  %5025 = vmatpush1.bf16.msra.mxu1 %v7206_v20  ;;  %v1739_v20 = vld [vmem:[#allocation7 + $0xdf8] sm:$0xff] }
 0x344   :  { %5056 = vmatprep.mubr.bf16.mxu1 %v8400_v22  ;;  %4862 = vmatprep.subr.bf16.mxu0 %v7213_v23  ;;  %v7228_v22 = vcombine.low %v1702_v35, %v1706_v4  ;;  %v1742_v35 = vld [vmem:[#allocation7 + $0xe10] sm:$0xff] }
 0x345   :  { %5026 = vmatprep.subr.bf16.mxu1 %v7215_v1  ;;  %v7252_v1 = vcombine.low %v1726_v58, %v1730_v60  ;;  %v1746_v4 = vld [vmem:[#allocation7 + $0xe30] sm:$0xff]  ;;  %v1759_v58 = vld [vmem:[#allocation7 + $0xe98] sm:$0xff] }
 0x346   :  { %4863 = vmatpush1.bf16.msra.mxu0 %v7212_v33  ;;  %v7254_v33 = vcombine.low %v1727_v61, %v1731_v43  ;;  %v7269_v5 = vcombine.high %v1742_v35, %v1746_v4  ;;  %v7268_v53 = vcombine.low %v1742_v35, %v1746_v4  ;;  %v1763_v60 = vld [vmem:[#allocation7 + $0xeb8] sm:$0xff] }
 0x347   :  { %5027 = vmatpush1.bf16.msra.mxu1 %v7214_v48  ;;  %4864 = vmatprep.subr.bf16.mxu0 %v7221_v10  ;;  %v7261_v48 = vcombine.high %v1734_v11, %v1738_v40  ;;  %v1775_v4 = vld [vmem:[#allocation7 + $0xf18] sm:$0xff] }
 0x348   :  { %5028 = vmatprep.subr.bf16.mxu1 %v7223_v34  ;;  %v7263_v34 = vcombine.high %v1735_v49, %v1739_v20 }
 0x34a   :  { %4865 = vmatpush1.bf16.msra.mxu0 %v7220_v0 }
 0x34b   :  { %5029 = vmatpush1.bf16.msra.mxu1 %v7222_v32  ;;  %4866 = vmatprep.subr.bf16.mxu0 %v7229_v44  ;;  %v7260_v44 = vcombine.low %v1734_v11, %v1738_v40  ;;  %v1766_v11 = vld [vmem:[#allocation7 + $0xed0] sm:$0xff] }
 0x34c   :  { %5030 = vmatprep.subr.bf16.mxu1 %v7231_v59  ;;  %v7262_v59 = vcombine.low %v1735_v49, %v1739_v20  ;;  %v1770_v40 = vld [vmem:[#allocation7 + $0xef0] sm:$0xff]  ;;  %v1767_v49 = vld [vmem:[#allocation7 + $0xed8] sm:$0xff] }
 0x34d   :  { %v1771_v20 = vld [vmem:[#allocation7 + $0xef8] sm:$0xff]  ;;  %v7292_v37 = vcombine.low %v1766_v11, %v1770_v40 }
 0x34e   :  { %4867 = vmatpush1.bf16.msra.mxu0 %v7228_v22  ;;  %v1750_v22 = vld [vmem:[#allocation7 + $0xe50] sm:$0xff] }
 0x34f   :  { %5031 = vmatpush1.bf16.msra.mxu1 %v7230_v47  ;;  %4868 = vmatprep.subr.bf16.mxu0 %v7237_v2  ;;  %v1754_v47 = vld [vmem:[#allocation7 + $0xe70] sm:$0xff]  ;;  %v1751_v2 = vld [vmem:[#allocation7 + $0xe58] sm:$0xff] }
 0x350   :  { %5032 = vmatprep.subr.bf16.mxu1 %v7239_v51  ;;  %v7277_v55 = vcombine.high %v1750_v22, %v1754_v47  ;;  %v7276_v43 = vcombine.low %v1750_v22, %v1754_v47  ;;  %v1787_v22 = vld [vmem:[#allocation7 + $0xf78] sm:$0xff] }
 0x352   :  { %4869 = vmatpush1.bf16.msra.mxu0 %v7236_v57  ;;  %v7279_v57 = vcombine.high %v1751_v2, %v1755_v62 }
 0x353   :  { %5033 = vmatpush1.bf16.msra.mxu1 %v7238_v16  ;;  %4870 = vmatprep.subr.bf16.mxu0 %v7245_v19  ;;  %v1758_v16 = vld [vmem:[#allocation7 + $0xe90] sm:$0xff] }
 0x354   :  { %v8438_v41 = vpop.f32.mrb[4].mxu0  ;;  %v8440_v8 = vpop.f32.mrb[12].mxu1  ;;  %5034 = vmatprep.subr.bf16.mxu1 %v7247_v21  ;;  %v1762_v19 = vld [vmem:[#allocation7 + $0xeb0] sm:$0xff] }
 0x355   :  { %v4568_v3 = vpop.f32.mrb[5].mxu0  ;;  %v8442_v12 = vpop.f32.mrb[13].mxu1 }
 0x356   :  { %v7527_v23 = vadd.f32 %v4568_v3, %v1816_v63  ;;  %v4570_v24 = vpop.f32.mrb[6].mxu0  ;;  %v4734_v27 = vpop.f32.mrb[14].mxu1  ;;  %4871 = vmatpush1.bf16.msra.mxu0 %v7244_v6  ;;  %v7278_v6 = vcombine.low %v1751_v2, %v1755_v62  ;;  %v7302_v62 = vcombine.low %v1775_v4, %v1779_v54 }
 0x357   :  { %5035 = vmatpush1.bf16.msra.mxu1 %v7246_v7  ;;  %v4571_v52 = vpop.f32.mrb[7].mxu0  ;;  %v4735_v31 = vpop.f32.mrb[15].mxu1  ;;  %4872 = vmatprep.subr.bf16.mxu0 %v7253_v28  ;;  %v7285_v7 = vcombine.high %v1758_v16, %v1762_v19 }
 0x358   :  { %v8444_v10 = vmax.f32 %v7527_v23, 0.0  ;;  %5036 = vmatprep.subr.bf16.mxu1 %v7255_v9  ;;  %v7287_v9 = vcombine.high %v1759_v58, %v1763_v60  ;;  %v7284_v23 = vcombine.low %v1758_v16, %v1762_v19  ;;  %v7293_v52 = vcombine.high %v1766_v11, %v1770_v40 }
 0x359   :  { %v7295_v31 = vcombine.high %v1767_v49, %v1771_v20 }
 0x35a   :  { %v5079_v0 = vrot.slane %v8444_v10, 4  ;;  %v5130_v32 = vmul.f32 %v8444_v10, %v8444_v10  ;;  %4873 = vmatpush1.bf16.msra.mxu0 %v7252_v1  ;;  %v7286_v1 = vcombine.low %v1759_v58, %v1763_v60  ;;  %v1798_v58 = vld [vmem:[#allocation7 + $0xfd0] sm:$0xff] }
 0x35b   :  { %5037 = vmatpush1.bf16.msra.mxu1 %v7254_v33  ;;  %4874 = vmatprep.subr.bf16.mxu0 %v7261_v48  ;;  %v1774_v33 = vld [vmem:[#allocation7 + $0xf10] sm:$0xff] }
 0x35c   :  { %v5080_v42 = vadd.f32 %v5079_v0, %v8444_v10  ;;  %v5143_v45 = vrot.slane %v5130_v32, 4  ;;  %5038 = vmatprep.subr.bf16.mxu1 %v7263_v34  ;;  %v1778_v48 = vld [vmem:[#allocation7 + $0xf30] sm:$0xff] }
 0x35d   :  { %v7300_v47 = vcombine.low %v1774_v33, %v1778_v48  ;;  %v1802_v60 = vld [vmem:[#allocation7 + $0xff0] sm:$0xff] }
 0x35e   :  { %v5081_v50 = vrot.slane %v5080_v42, 2  ;;  %v5144_v51 = vadd.f32 %v5143_v45, %v5130_v32  ;;  %4875 = vmatpush1.bf16.msra.mxu0 %v7260_v44  ;;  %v7294_v32 = vcombine.low %v1767_v49, %v1771_v20  ;;  %v7301_v44 = vcombine.high %v1774_v33, %v1778_v48 }
 0x35f   :  { %5039 = vmatpush1.bf16.msra.mxu1 %v7262_v59  ;;  %4876 = vmatprep.subr.bf16.mxu0 %v7269_v5  ;;  %v7303_v59 = vcombine.high %v1775_v4, %v1779_v54  ;;  %v1782_v5 = vld [vmem:[#allocation7 + $0xf50] sm:$0xff]  ;;  %v7618_v4 = vld [vmem:[#allocation8 + $0x24] ss:$8 sps:$4 sm:$0xff]  }
 0x360   :  { %v5145_v56 = vrot.slane %v5144_v51, 2  ;;  %5040 = vmatprep.subr.bf16.mxu1 %v7271_v46  ;;  %v5082_v21 = vadd.f32 %v5081_v50, %v5080_v42  ;;  %v1786_v42 = vld [vmem:[#allocation7 + $0xf70] sm:$0xff]  ;;  %v1783_v46 = vld [vmem:[#allocation7 + $0xf58] sm:$0xff] }
 0x361   :  { %v7309_v50 = vcombine.high %v1782_v5, %v1786_v42  ;;  %v7310_v16 = vcombine.low %v1783_v46, %v1787_v22 }
 0x362   :  { %v5146_v61 = vadd.f32 %v5145_v56, %v5144_v51  ;;  %4877 = vmatpush1.bf16.msra.mxu0 %v7268_v53  ;;  %v5083_v63 = vrot.slane %v5082_v21, 1  ;;  %v7311_v51 = vcombine.high %v1783_v46, %v1787_v22  ;;  %v1790_v53 = vld [vmem:[#allocation7 + $0xf90] sm:$0xff]  ;;  %v1795_v56 = vld [vmem:[#allocation7 + $0xfb8] sm:$0xff]  ;;  %v7624_v22 = vld [vmem:[#allocation8 + $0x44] ss:$8 sps:$4 sm:$0xff]  }
 0x363   :  { %5041 = vmatpush1.bf16.msra.mxu1 %v7270_v18  ;;  %4878 = vmatprep.subr.bf16.mxu0 %v7277_v55  ;;  %v1794_v18 = vld [vmem:[#allocation7 + $0xfb0] sm:$0xff]  ;;  %v1791_v55 = vld [vmem:[#allocation7 + $0xf98] sm:$0xff] }
 0x364   :  { %v5147_v28 = vrot.slane %v5146_v61, 1  ;;  %5042 = vmatprep.subr.bf16.mxu1 %v7279_v57  ;;  %v5084_v3 = vadd.f32 %v5083_v63, %v5082_v21  ;;  %v7308_v57 = vcombine.low %v1782_v5, %v1786_v42  ;;  %v7317_v19 = vcombine.high %v1790_v53, %v1794_v18  ;;  %v7619_v42 = vld [vmem:[#allocation8 + $0x30] ss:$8 sps:$4 sm:$0xff]  }
 0x365   :  { %v7319_v21 = vcombine.high %v1791_v55, %v1795_v56  ;;  %v1812_v63 = vrot.slane %v8434_v15, %v8271_v29 }
 0x366   :  { %4879 = vmatpush1.bf16.msra.mxu0 %v7276_v43  ;;  %v8450_v24 = vmul.f32 0.125, %v5084_v3  ;;  %v5148_v27 = vadd.f32 %v5147_v28, %v5146_v61  ;;  %v1799_v61 = vld [vmem:[#allocation7 + $0xfd8] sm:$0xff]  ;;  %v7318_v28 = vcombine.low %v1791_v55, %v1795_v56  ;;  %v7324_v3 = vcombine.low %v1798_v58, %v1802_v60 }
 0x367   :  { %5043 = vmatpush1.bf16.msra.mxu1 %v7278_v6  ;;  %4880 = vmatprep.subr.bf16.mxu0 %v7285_v7  ;;  %v1803_v43 = vld [vmem:[#allocation7 + $0xff8] sm:$0xff]  ;;  %v7316_v6 = vcombine.low %v1790_v53, %v1794_v18  ;;  %v1824_v7 = vrot.slane %v8434_v15, %v269_v17  ;;  %v7526_v40 = vadd.f32 %v8438_v41, %v1812_v63 }
 0x368   :  { %5044 = vmatprep.subr.bf16.mxu1 %v7287_v9  ;;  %v5186_v34 = vmul.f32 0.125, %v5148_v27  ;;  %v5194_v35 = vmul.f32 %v8450_v24, %v8450_v24  ;;  %v7325_v9 = vcombine.high %v1798_v58, %v1802_v60  ;;  %v7327_v11 = vcombine.high %v1799_v61, %v1803_v43  ;;  %v7612_v27 = vld [vmem:[#allocation8 + $0x4] ss:$8 sps:$4 sm:$0xff]   ;;  %v7615_v41 = vld [vmem:[#allocation8 + $0x14] ss:$8 sps:$4 sm:$0xff]  }
 0x369   :  { %v7529_v20 = vadd.f32 %v8442_v12, %v1824_v7  ;;  %v5218_v17 = vsub.f32 %v8444_v10, %v8450_v24  ;;  %v7613_v10 = vld [vmem:[#allocation8 + $0x10] ss:$8 sps:$4 sm:$0xff]   ;;  %v7628_v60 = vld [vmem:[#allocation8 + $0x60] ss:$8 sps:$4 sm:$0xff]  }
 0x36a   :  { %4881 = vmatpush1.bf16.msra.mxu0 %v7284_v23  ;;  %v5202_v0 = vsub.f32 %v5186_v34, %v5194_v35  ;;  %v7326_v23 = vcombine.low %v1799_v61, %v1803_v43  ;;  %v7625_v56 = vld [vmem:[#allocation8 + $0x50] ss:$8 sps:$4 sm:$0xff]   ;;  %v7633_v43 = vld [vmem:[#allocation8 + $0x74] ss:$8 sps:$4 sm:$0xff]  }
 0x36b   :  { %5045 = vmatpush1.bf16.msra.mxu1 %v7286_v1  ;;  %4882 = vmatprep.subr.bf16.mxu0 %v7293_v52  ;;  %v8463_v52 = vmax.f32 %v7526_v40, 0.0  ;;  %v8465_v33 = vmax.f32 %v7529_v20, 0.0  ;;  %v7634_v20 = vld [vmem:[#allocation8 + $0x80] ss:$8 sps:$4 sm:$0xff]  }
 0x36c   :  { %5046 = vmatprep.subr.bf16.mxu1 %v7295_v31  ;;  %v5210_v45 = vmax.f32 %v5202_v0, 0.0  ;;  %v7610_v31 = vld [vmem:[#allocation8] ss:$8 sps:$4 sm:$0xff]  }
 0x36d   :  { %v5073_v48 = vrot.slane %v8463_v52, 4  ;;  %v5129_v34 = vmul.f32 %v8463_v52, %v8463_v52  ;;  %v5091_v24 = vrot.slane %v8465_v33, 4  ;;  %v5132_v35 = vmul.f32 %v8465_v33, %v8465_v33  ;;  %v7616_v0 = vld [vmem:[#allocation8 + $0x20] ss:$8 sps:$4 sm:$0xff]  }
 0x36e   :  { %4883 = vmatpush1.bf16.msra.mxu0 %v7292_v37  ;;  %v5226_v2 = vadd.f32 1e-05, %v5210_v45 }
 0x36f   :  { %5047 = vmatpush1.bf16.msra.mxu1 %v7294_v32  ;;  %4884 = vmatprep.subr.bf16.mxu0 %v7301_v44  ;;  %v5074_v54 = vadd.f32 %v5073_v48, %v8463_v52  ;;  %v5137_v37 = vrot.slane %v5129_v34, 4  ;;  %v5092_v32 = vadd.f32 %v5091_v24, %v8465_v33  ;;  %v5155_v44 = vrot.slane %v5132_v35, 4 }
 0x370   :  { %5048 = vmatprep.subr.bf16.mxu1 %v7303_v59  ;;  %7882 = vrsqrt.f32 %v5226_v2 }
 0x371   :  { %v5075_v59 = vrot.slane %v5074_v54, 2  ;;  %v5138_v5 = vadd.f32 %v5137_v37, %v5129_v34  ;;  %v5093_v45 = vrot.slane %v5092_v32, 2  ;;  %v5156_v46 = vadd.f32 %v5155_v44, %v5132_v35  ;;  %v7640_v34 = vld [vmem:[#allocation8 + $0xa0] ss:$8 sps:$4 sm:$0xff]   ;;  %v7649_v44 = vld [vmem:[#allocation8 + $0xd0] ss:$8 sps:$4 sm:$0xff]  }
 0x372   :  { %4885 = vmatpush1.bf16.msra.mxu0 %v7300_v47 }
 0x373   :  { %5049 = vmatpush1.bf16.msra.mxu1 %v7302_v62  ;;  %4886 = vmatprep.subr.bf16.mxu0 %v7309_v50  ;;  %v5076_v47 = vadd.f32 %v5075_v59, %v5074_v54  ;;  %v5139_v2 = vrot.slane %v5138_v5, 2  ;;  %v7622_v62 = vld [vmem:[#allocation8 + $0x40] ss:$8 sps:$4 sm:$0xff]   ;;  %v5157_v50 = vrot.slane %v5156_v46, 2  ;;  %v5094_v53 = vadd.f32 %v5093_v45, %v5092_v32  ;;  %v7648_v54 = vld [vmem:[#allocation8 + $0xc4] ss:$8 sps:$4 sm:$0xff]  }
 0x374   :  { %5050 = vmatprep.subr.bf16.mxu1 %v7311_v51  ;;  %v7627_v51 = vld [vmem:[#allocation8 + $0x54] ss:$8 sps:$4 sm:$0xff]   ;;  %v1820_v59 = vrot.slane %v8434_v15, %v265_v13  ;;  %v7658_v13 = vld [vmem:[#allocation8 + $0x100] ss:$8 sps:$4 sm:$0xff]  }
 0x375   :  { %v5077_v18 = vrot.slane %v5076_v47, 1  ;;  %v5140_v55 = vadd.f32 %v5139_v2, %v5138_v5  ;;  %v7651_v32 = vld [vmem:[#allocation8 + $0xd4] ss:$8 sps:$4 sm:$0xff]   ;;  %v7652_v5 = vld [vmem:[#allocation8 + $0xe0] ss:$8 sps:$4 sm:$0xff]  }
 0x376   :  { %4887 = vmatpush1.bf16.msra.mxu0 %v7308_v57  ;;  %v5158_v57 = vadd.f32 %v5157_v50, %v5156_v46  ;;  %v7655_v2 = vld [vmem:[#allocation8 + $0xf0] ss:$8 sps:$4 sm:$0xff]  }
 0x377   :  { %5051 = vmatpush1.bf16.msra.mxu1 %v7310_v16  ;;  %4888 = vmatprep.subr.bf16.mxu0 %v7317_v19  ;;  %v7630_v16 = vld [vmem:[#allocation8 + $0x64] ss:$8 sps:$4 sm:$0xff]   ;;  %v5095_v19 = vrot.slane %v5094_v53, 1  ;;  %v5141_v58 = vrot.slane %v5140_v55, 1 }
 0x378   :  { %5052 = vmatprep.subr.bf16.mxu1 %v7319_v21  ;;  %v5078_v21 = vadd.f32 %v5077_v18, %v5076_v47  ;;  %v5159_v61 = vrot.slane %v5158_v57, 1  ;;  %v7528_v47 = vadd.f32 %v8440_v8, %v1820_v59  ;;  %v7691_v59 = vld [vmem:[#allocation8 + $0x1b0] ss:$8 sps:$4 sm:$0xff]  }
 0x379   :  { %v5096_v63 = vadd.f32 %v5095_v19, %v5094_v53  ;;  %v5142_v7 = vadd.f32 %v5141_v58, %v5140_v55  ;;  %v7664_v58 = vld [vmem:[#allocation8 + $0x120] ss:$8 sps:$4 sm:$0xff]  }
 0x37a   :  { %4889 = vmatpush1.bf16.msra.mxu0 %v7316_v6  ;;  %v7883_v49 = vpop.eup %7882  ;;  %v5121_v6 = vmul.f32 0.125, %v5078_v21  ;;  %v5160_v40 = vadd.f32 %v5159_v61, %v5158_v57  ;;  %v8483_v18 = vmax.f32 %v7528_v47, 0.0  ;;  %v7700_v47 = vld [vmem:[#allocation8 + $0x1e0] ss:$8 sps:$4 sm:$0xff]  }
 0x37b   :  { %5053 = vmatpush1.bf16.msra.mxu1 %v7318_v28  ;;  %4890 = vmatprep.subr.bf16.mxu0 %v7325_v9  ;;  %v5242_v1 = vmul.f32 %v7883_v49, %v5218_v17  ;;  %v7631_v28 = vld [vmem:[#allocation8 + $0x70] ss:$8 sps:$4 sm:$0xff]   ;;  %v7636_v9 = vld [vmem:[#allocation8 + $0x84] ss:$8 sps:$4 sm:$0xff]  }
 0x37c   :  { %5054 = vmatprep.subr.bf16.mxu1 %v7327_v11  ;;  %v5124_v11 = vmul.f32 0.125, %v5096_v63  ;;  %v5193_v49 = vmul.f32 %v5121_v6, %v5121_v6  ;;  %v5131_v8 = vmul.f32 %v8483_v18, %v8483_v18  ;;  %v7667_v63 = vld [vmem:[#allocation8 + $0x130] ss:$8 sps:$4 sm:$0xff]  }
 0x37d   :  { %v5250_v12 = vpack.c.bf16 %v5242_v1, %v5242_v1 }
 0x37e   :  { %4891 = vmatpush1.bf16.msra.mxu0 %v7324_v3  ;;  %v5185_v3 = vmul.f32 0.125, %v5142_v7  ;;  %v5196_v17 = vmul.f32 %v5124_v11, %v5124_v11  ;;  %v5149_v21 = vrot.slane %v5131_v8, 4 }
 0x37f   :  { %5055 = vmatpush1.bf16.msra.mxu1 %v7326_v23  ;;  %6038 = vmatprep.subr.bf16.mxu0 %v7612_v27  ;;  %v7639_v23 = vld [vmem:[#allocation8 + $0x94] ss:$8 sps:$4 sm:$0xff]   ;;  %v5188_v27 = vmul.f32 0.125, %v5160_v40 }
 0x380   :  { %v5201_v1 = vsub.f32 %v5185_v3, %v5193_v49  ;;  %v7673_v49 = vld [vmem:[#allocation8 + $0x150] ss:$8 sps:$4 sm:$0xff]  }
 0x381   :  { %4893 = vmatmul.mubr.bf16.vlgmr.msra.gmra.mrb[8].mxu0 %v8416_v38 }
 0x382   :  { %5057 = vmatmul.mubr.bf16.vlgmr.msra.gmra.mrb[16].mxu1 %v8416_v38  ;;  %6039 = vmatpush1.bf16.msra.mxu0 %v7610_v31  ;;  %v7621_v38 = vld [vmem:[#allocation8 + $0x34] ss:$8 sps:$4 sm:$0xff]   ;;  %v7637_v31 = vld [vmem:[#allocation8 + $0x90] ss:$8 sps:$4 sm:$0xff]   ;;  %v5209_v48 = vmax.f32 %v5201_v1, 0.0 }
 0x383   :  { %6070 = vmatprep.mubr.bf16.mxu0 %v5250_v12  ;;  %6040 = vmatprep.subr.bf16.mxu0 %v7615_v41  ;;  %v7642_v41 = vld [vmem:[#allocation8 + $0xa4] ss:$8 sps:$4 sm:$0xff]   ;;  %v5204_v12 = vsub.f32 %v5188_v27, %v5196_v17  ;;  %v7676_v17 = vld [vmem:[#allocation8 + $0x160] ss:$8 sps:$4 sm:$0xff]   ;;  %v7681_v1 = vld [vmem:[#allocation8 + $0x174] ss:$8 sps:$4 sm:$0xff]  }
 0x384   :  { %v5225_v35 = vadd.f32 1e-05, %v5209_v48  ;;  %v7684_v48 = vld [vmem:[#allocation8 + $0x184] ss:$8 sps:$4 sm:$0xff]  }
 0x385   :  { %v5212_v24 = vmax.f32 %v5204_v12, 0.0  ;;  %v7679_v12 = vld [vmem:[#allocation8 + $0x170] ss:$8 sps:$4 sm:$0xff]  }
 0x386   :  { %6041 = vmatpush1.bf16.msra.mxu0 %v7613_v10  ;;  %v7645_v10 = vld [vmem:[#allocation8 + $0xb4] ss:$8 sps:$4 sm:$0xff]   ;;  %7884 = vrsqrt.f32 %v5225_v35 }
 0x387   :  { %6042 = vmatprep.subr.bf16.mxu0 %v7618_v4  ;;  %v7643_v4 = vld [vmem:[#allocation8 + $0xb0] ss:$8 sps:$4 sm:$0xff]   ;;  %v5228_v37 = vadd.f32 1e-05, %v5212_v24  ;;  %v7682_v24 = vld [vmem:[#allocation8 + $0x180] ss:$8 sps:$4 sm:$0xff]  }
 0x388   :  { %v7687_v35 = vld [vmem:[#allocation8 + $0x194] ss:$8 sps:$4 sm:$0xff]  }
 0x389   :  { %7886 = vrsqrt.f32 %v5228_v37  ;;  %v7690_v37 = vld [vmem:[#allocation8 + $0x1a4] ss:$8 sps:$4 sm:$0xff]  }
 0x38a   :  { %6043 = vmatpush1.bf16.msra.mxu0 %v7616_v0  ;;  %v7646_v0 = vld [vmem:[#allocation8 + $0xc0] ss:$8 sps:$4 sm:$0xff]  }
 0x38b   :  { %6044 = vmatprep.subr.bf16.mxu0 %v7621_v38  ;;  %v7654_v38 = vld [vmem:[#allocation8 + $0xe4] ss:$8 sps:$4 sm:$0xff]  }
 0x38e   :  { %6045 = vmatpush1.bf16.msra.mxu0 %v7619_v42  ;;  %v7657_v42 = vld [vmem:[#allocation8 + $0xf4] ss:$8 sps:$4 sm:$0xff]  }
 0x38f   :  { %6046 = vmatprep.subr.bf16.mxu0 %v7624_v22  ;;  %v5217_v22 = vsub.f32 %v8463_v52, %v5121_v6  ;;  %v5085_v52 = vrot.slane %v8483_v18, 4  ;;  %v7672_v6 = vld [vmem:[#allocation8 + $0x144] ss:$8 sps:$4 sm:$0xff]  }
 0x390   :  { %v7885_v45 = vpop.eup %7884 }
 0x391   :  { %v5241_v50 = vmul.f32 %v7885_v45, %v5217_v22  ;;  %v5086_v19 = vadd.f32 %v5085_v52, %v8483_v18  ;;  %v7699_v45 = vld [vmem:[#allocation8 + $0x1d4] ss:$8 sps:$4 sm:$0xff]   ;;  %v7702_v22 = vld [vmem:[#allocation8 + $0x1e4] ss:$8 sps:$4 sm:$0xff]   ;;  %v7709_v52 = vld [vmem:[#allocation8 + $0x210] ss:$8 sps:$4 sm:$0xff]  }
 0x392   :  { %6047 = vmatpush1.bf16.msra.mxu0 %v7622_v62  ;;  %v5220_v62 = vsub.f32 %v8465_v33, %v5124_v11  ;;  %v7661_v33 = vld [vmem:[#allocation8 + $0x110] ss:$8 sps:$4 sm:$0xff]   ;;  %v7675_v11 = vld [vmem:[#allocation8 + $0x154] ss:$8 sps:$4 sm:$0xff]  }
 0x393   :  { %6048 = vmatprep.subr.bf16.mxu0 %v7627_v51  ;;  %v7887_v46 = vpop.eup %7886  ;;  %v7660_v51 = vld [vmem:[#allocation8 + $0x104] ss:$8 sps:$4 sm:$0xff]   ;;  %v5249_v55 = vpack.c.bf16 %v5241_v50, %v5241_v50  ;;  %v5087_v61 = vrot.slane %v5086_v19, 2 }
 0x394   :  { %v5244_v53 = vmul.f32 %v7887_v46, %v5220_v62  ;;  %v7697_v46 = vld [vmem:[#allocation8 + $0x1d0] ss:$8 sps:$4 sm:$0xff]  }
 0x395   :  { %v5088_v7 = vadd.f32 %v5087_v61, %v5086_v19  ;;  %v7720_v19 = vld [vmem:[#allocation8 + $0x244] ss:$8 sps:$4 sm:$0xff]  }
 0x396   :  { %6049 = vmatpush1.bf16.msra.mxu0 %v7625_v56  ;;  %v7663_v56 = vld [vmem:[#allocation8 + $0x114] ss:$8 sps:$4 sm:$0xff]   ;;  %v5252_v57 = vpack.c.bf16 %v5244_v53, %v5244_v53  ;;  %v7726_v61 = vld [vmem:[#allocation8 + $0x264] ss:$8 sps:$4 sm:$0xff]  }
 0x397   :  { %6050 = vmatprep.subr.bf16.mxu0 %v7630_v16  ;;  %v7666_v16 = vld [vmem:[#allocation8 + $0x124] ss:$8 sps:$4 sm:$0xff]   ;;  %v5089_v40 = vrot.slane %v5088_v7, 1 }
 0x39a   :  { %6051 = vmatpush1.bf16.msra.mxu0 %v7628_v60  ;;  %v7669_v60 = vld [vmem:[#allocation8 + $0x134] ss:$8 sps:$4 sm:$0xff]  }
 0x39b   :  { %6052 = vmatprep.subr.bf16.mxu0 %v7633_v43  ;;  %v5150_v43 = vadd.f32 %v5149_v21, %v5131_v8  ;;  %v7714_v8 = vld [vmem:[#allocation8 + $0x224] ss:$8 sps:$4 sm:$0xff]   ;;  %v7718_v21 = vld [vmem:[#allocation8 + $0x240] ss:$8 sps:$4 sm:$0xff]  }
 0x39e   :  { %6053 = vmatpush1.bf16.msra.mxu0 %v7631_v28  ;;  %v5151_v28 = vrot.slane %v5150_v43, 2 }
 0x39f   :  { %6054 = vmatprep.subr.bf16.mxu0 %v7636_v9  ;;  %v7670_v9 = vld [vmem:[#allocation8 + $0x140] ss:$8 sps:$4 sm:$0xff]  }
 0x3a0   :  { %v5152_v3 = vadd.f32 %v5151_v28, %v5150_v43  ;;  %v7724_v43 = vld [vmem:[#allocation8 + $0x260] ss:$8 sps:$4 sm:$0xff]  }
 0x3a1   :  { %v7730_v28 = vld [vmem:[#allocation8 + $0x280] ss:$8 sps:$4 sm:$0xff]  }
 0x3a2   :  { %6055 = vmatpush1.bf16.msra.mxu0 %v7634_v20  ;;  %v7678_v20 = vld [vmem:[#allocation8 + $0x164] ss:$8 sps:$4 sm:$0xff]   ;;  %v5153_v27 = vrot.slane %v5152_v3, 1 }
 0x3a3   :  { %6056 = vmatprep.subr.bf16.mxu0 %v7639_v23  ;;  %v5090_v23 = vadd.f32 %v5089_v40, %v5088_v7  ;;  %v7732_v7 = vld [vmem:[#allocation8 + $0x284] ss:$8 sps:$4 sm:$0xff]  }
 0x3a4   :  { %v7738_v40 = vld [vmem:[#allocation8 + $0x2a4] ss:$8 sps:$4 sm:$0xff]  }
 0x3a6   :  { %6057 = vmatpush1.bf16.msra.mxu0 %v7637_v31  ;;  %v5123_v31 = vmul.f32 0.125, %v5090_v23  ;;  %v7744_v23 = vld [vmem:[#allocation8 + $0x2c4] ss:$8 sps:$4 sm:$0xff]  }
 0x3a7   :  { %6058 = vmatprep.subr.bf16.mxu0 %v7642_v41  ;;  %v5154_v41 = vadd.f32 %v5153_v27, %v5152_v3  ;;  %v7736_v3 = vld [vmem:[#allocation8 + $0x2a0] ss:$8 sps:$4 sm:$0xff]  }
 0x3a8   :  { %v5219_v50 = vsub.f32 %v8483_v18, %v5123_v31  ;;  %v7715_v18 = vld [vmem:[#allocation8 + $0x230] ss:$8 sps:$4 sm:$0xff]   ;;  %v7742_v27 = vld [vmem:[#allocation8 + $0x2c0] ss:$8 sps:$4 sm:$0xff]  }
 0x3aa   :  { %6059 = vmatpush1.bf16.msra.mxu0 %v7640_v34  ;;  %v5187_v34 = vmul.f32 0.125, %v5154_v41  ;;  %v7748_v41 = vld [vmem:[#allocation8 + $0x2e0] ss:$8 sps:$4 sm:$0xff]  }
 0x3ab   :  { %6060 = vmatprep.subr.bf16.mxu0 %v7645_v10  ;;  %v5195_v10 = vmul.f32 %v5123_v31, %v5123_v31  ;;  %v7750_v31 = vld [vmem:[#allocation8 + $0x2e4] ss:$8 sps:$4 sm:$0xff]  }
 0x3ae   :  { %6061 = vmatpush1.bf16.msra.mxu0 %v7643_v4  ;;  %v5203_v4 = vsub.f32 %v5187_v34, %v5195_v10  ;;  %v7756_v34 = vld [vmem:[#allocation8 + $0x304] ss:$8 sps:$4 sm:$0xff]   ;;  %v7802_v10 = vld [vmem:[#allocation10] ss:$8 sps:$4 sm:$0xff]  }
 0x3af   :  { %6062 = vmatprep.subr.bf16.mxu0 %v7648_v54  ;;  %v7685_v54 = vld [vmem:[#allocation8 + $0x190] ss:$8 sps:$4 sm:$0xff]  }
 0x3b2   :  { %6063 = vmatpush1.bf16.msra.mxu0 %v7646_v0  ;;  %v5211_v0 = vmax.f32 %v5203_v4, 0.0  ;;  %v7805_v4 = vld [vmem:[#allocation10 + $0x10] ss:$8 sps:$4 sm:$0xff]  }
 0x3b3   :  { %6064 = vmatprep.subr.bf16.mxu0 %v7651_v32  ;;  %v7688_v32 = vld [vmem:[#allocation8 + $0x1a0] ss:$8 sps:$4 sm:$0xff]  }
 0x3b6   :  { %6065 = vmatpush1.bf16.msra.mxu0 %v7649_v44  ;;  %v7693_v44 = vld [vmem:[#allocation8 + $0x1b4] ss:$8 sps:$4 sm:$0xff]  }
 0x3b7   :  { %6066 = vmatprep.subr.bf16.mxu0 %v7654_v38  ;;  %v5227_v38 = vadd.f32 1e-05, %v5211_v0  ;;  %v7813_v0 = vld [vmem:[#allocation10 + $0x34] ss:$8 sps:$4 sm:$0xff]  }
 0x3b9   :  { %7888 = vrsqrt.f32 %v5227_v38  ;;  %v7814_v38 = vld [vmem:[#allocation10 + $0x40] ss:$8 sps:$4 sm:$0xff]  }
 0x3ba   :  { %6067 = vmatpush1.bf16.msra.mxu0 %v7652_v5  ;;  %v7696_v5 = vld [vmem:[#allocation8 + $0x1c4] ss:$8 sps:$4 sm:$0xff]  }
 0x3bb   :  { %6068 = vmatprep.subr.bf16.mxu0 %v7657_v42  ;;  %v7694_v42 = vld [vmem:[#allocation8 + $0x1c0] ss:$8 sps:$4 sm:$0xff]  }
 0x3be   :  { %6069 = vmatpush1.bf16.msra.mxu0 %v7655_v2  ;;  %v7705_v2 = vld [vmem:[#allocation8 + $0x1f4] ss:$8 sps:$4 sm:$0xff]  }
 0x3bf   :  { %6079 = vmatprep.subr.bf16.mxu0 %v7660_v51  ;;  %v7703_v51 = vld [vmem:[#allocation8 + $0x1f0] ss:$8 sps:$4 sm:$0xff]  }
 0x3c1   :  { %6071 = vmatmul.mubr.bf16.vlgmr.msra.gmra.mrb[12].mxu0 %v5249_v55  ;;  %v7706_v55 = vld [vmem:[#allocation8 + $0x200] ss:$8 sps:$4 sm:$0xff]  }
 0x3c2   :  { %6080 = vmatpush1.bf16.msra.mxu0 %v7658_v13  ;;  %6111 = vmatprep.mubr.bf16.mxu0 %v5252_v57  ;;  %v7708_v13 = vld [vmem:[#allocation8 + $0x204] ss:$8 sps:$4 sm:$0xff]   ;;  %v7711_v57 = vld [vmem:[#allocation8 + $0x214] ss:$8 sps:$4 sm:$0xff]  }
 0x3c3   :  { %6081 = vmatprep.subr.bf16.mxu0 %v7663_v56  ;;  %v7889_v62 = vpop.eup %7888 }
 0x3c4   :  { %v5243_v53 = vmul.f32 %v7889_v62, %v5219_v50 }
 0x3c6   :  { %6082 = vmatpush1.bf16.msra.mxu0 %v7661_v33  ;;  %v5251_v56 = vpack.c.bf16 %v5243_v53, %v5243_v53  ;;  %v7712_v33 = vld [vmem:[#allocation8 + $0x220] ss:$8 sps:$4 sm:$0xff]  }
 0x3c7   :  { %6083 = vmatprep.subr.bf16.mxu0 %v7666_v16  ;;  %v7717_v16 = vld [vmem:[#allocation8 + $0x234] ss:$8 sps:$4 sm:$0xff]  }
 0x3ca   :  { %6084 = vmatpush1.bf16.msra.mxu0 %v7664_v58  ;;  %v7723_v58 = vld [vmem:[#allocation8 + $0x254] ss:$8 sps:$4 sm:$0xff]  }
 0x3cb   :  { %6085 = vmatprep.subr.bf16.mxu0 %v7669_v60  ;;  %v7721_v60 = vld [vmem:[#allocation8 + $0x250] ss:$8 sps:$4 sm:$0xff]  }
 0x3ce   :  { %6086 = vmatpush1.bf16.msra.mxu0 %v7667_v63  ;;  %v7729_v63 = vld [vmem:[#allocation8 + $0x274] ss:$8 sps:$4 sm:$0xff]  }
 0x3cf   :  { %6087 = vmatprep.subr.bf16.mxu0 %v7672_v6  ;;  %v7727_v6 = vld [vmem:[#allocation8 + $0x270] ss:$8 sps:$4 sm:$0xff]  }
 0x3d2   :  { %6088 = vmatpush1.bf16.msra.mxu0 %v7670_v9  ;;  %v7735_v9 = vld [vmem:[#allocation8 + $0x294] ss:$8 sps:$4 sm:$0xff]  }
 0x3d3   :  { %6089 = vmatprep.subr.bf16.mxu0 %v7675_v11  ;;  %v7733_v11 = vld [vmem:[#allocation8 + $0x290] ss:$8 sps:$4 sm:$0xff]  }
 0x3d6   :  { %6090 = vmatpush1.bf16.msra.mxu0 %v7673_v49  ;;  %v7741_v49 = vld [vmem:[#allocation8 + $0x2b4] ss:$8 sps:$4 sm:$0xff]  }
 0x3d7   :  { %6091 = vmatprep.subr.bf16.mxu0 %v7678_v20  ;;  %v7739_v20 = vld [vmem:[#allocation8 + $0x2b0] ss:$8 sps:$4 sm:$0xff]  }
 0x3da   :  { %6092 = vmatpush1.bf16.msra.mxu0 %v7676_v17  ;;  %v7747_v17 = vld [vmem:[#allocation8 + $0x2d4] ss:$8 sps:$4 sm:$0xff]  }
 0x3db   :  { %6093 = vmatprep.subr.bf16.mxu0 %v7681_v1  ;;  %v7745_v1 = vld [vmem:[#allocation8 + $0x2d0] ss:$8 sps:$4 sm:$0xff]  }
 0x3de   :  { %6094 = vmatpush1.bf16.msra.mxu0 %v7679_v12  ;;  %v7753_v12 = vld [vmem:[#allocation8 + $0x2f4] ss:$8 sps:$4 sm:$0xff]  }
 0x3df   :  { %6095 = vmatprep.subr.bf16.mxu0 %v7684_v48  ;;  %v7751_v48 = vld [vmem:[#allocation8 + $0x2f0] ss:$8 sps:$4 sm:$0xff]  }
 0x3e2   :  { %6096 = vmatpush1.bf16.msra.mxu0 %v7682_v24  ;;  %v7804_v24 = vld [vmem:[#allocation10 + $0x4] ss:$8 sps:$4 sm:$0xff]  }
 0x3e3   :  { %6097 = vmatprep.subr.bf16.mxu0 %v7687_v35  ;;  %v7807_v35 = vld [vmem:[#allocation10 + $0x14] ss:$8 sps:$4 sm:$0xff]   ;;  %6455 = vmatprep.subr.bf16.mxu1 %v7804_v24 }
 0x3e4   :  { %6456 = vmatpush1.bf16.msra.mxu1 %v7802_v10 }
 0x3e5   :  { %6457 = vmatprep.subr.bf16.mxu1 %v7807_v35 }
 0x3e6   :  { %6098 = vmatpush1.bf16.msra.mxu0 %v7685_v54  ;;  %v7810_v54 = vld [vmem:[#allocation10 + $0x24] ss:$8 sps:$4 sm:$0xff]  }
 0x3e7   :  { %6099 = vmatprep.subr.bf16.mxu0 %v7690_v37  ;;  %v7808_v37 = vld [vmem:[#allocation10 + $0x20] ss:$8 sps:$4 sm:$0xff]  }
 0x3e8   :  { %6458 = vmatpush1.bf16.msra.mxu1 %v7805_v4 }
 0x3e9   :  { %6459 = vmatprep.subr.bf16.mxu1 %v7810_v54 }
 0x3ea   :  { %6100 = vmatpush1.bf16.msra.mxu0 %v7688_v32  ;;  %v7811_v32 = vld [vmem:[#allocation10 + $0x30] ss:$8 sps:$4 sm:$0xff]  }
 0x3eb   :  { %6101 = vmatprep.subr.bf16.mxu0 %v7693_v44  ;;  %v7816_v44 = vld [vmem:[#allocation10 + $0x44] ss:$8 sps:$4 sm:$0xff]  }
 0x3ec   :  { %6460 = vmatpush1.bf16.msra.mxu1 %v7808_v37 }
 0x3ed   :  { %6461 = vmatprep.subr.bf16.mxu1 %v7813_v0 }
 0x3ee   :  { %6102 = vmatpush1.bf16.msra.mxu0 %v7691_v59  ;;  %v1828_v59 = vrot.slane %v8434_v15, %v273_v14 }
 0x3ef   :  { %6103 = vmatprep.subr.bf16.mxu0 %v7696_v5  ;;  %v1832_v5 = vrot.slane %v8434_v15, %v277_v26 }
 0x3f0   :  { %6462 = vmatpush1.bf16.msra.mxu1 %v7811_v32 }
 0x3f1   :  { %6463 = vmatprep.subr.bf16.mxu1 %v7816_v44 }
 0x3f2   :  { %6104 = vmatpush1.bf16.msra.mxu0 %v7694_v42  ;;  %v1840_v42 = vrot.slane %v8434_v15, %v285_v36 }
 0x3f3   :  { %6105 = vmatprep.subr.bf16.mxu0 %v7699_v45 }
 0x3f4   :  { %6464 = vmatpush1.bf16.msra.mxu1 %v7814_v38 }
 0x3f6   :  { %6106 = vmatpush1.bf16.msra.mxu0 %v7697_v46 }
 0x3f7   :  { %6107 = vmatprep.subr.bf16.mxu0 %v7702_v22 }
 0x3fa   :  { %6108 = vmatpush1.bf16.msra.mxu0 %v7700_v47 }
 0x3fb   :  { %6109 = vmatprep.subr.bf16.mxu0 %v7705_v2 }
 0x3fe   :  { %6110 = vmatpush1.bf16.msra.mxu0 %v7703_v51 }
 0x3ff   :  { %6120 = vmatprep.subr.bf16.mxu0 %v7708_v13 }
 0x401   :  { %6112 = vmatmul.mubr.bf16.vlgmr.msra.gmra.mrb[12].mxu0 %v5251_v56 }
 0x402   :  { %6121 = vmatpush1.bf16.msra.mxu0 %v7706_v55 }
 0x403   :  { %6122 = vmatprep.subr.bf16.mxu0 %v7711_v57 }
 0x406   :  { %6123 = vmatpush1.bf16.msra.mxu0 %v7709_v52 }
 0x407   :  { %6124 = vmatprep.subr.bf16.mxu0 %v7714_v8 }
 0x40a   :  { %6125 = vmatpush1.bf16.msra.mxu0 %v7712_v33 }
 0x40b   :  { %6126 = vmatprep.subr.bf16.mxu0 %v7717_v16 }
 0x40e   :  { %6127 = vmatpush1.bf16.msra.mxu0 %v7715_v18 }
 0x40f   :  { %6128 = vmatprep.subr.bf16.mxu0 %v7720_v19 }
 0x412   :  { %6129 = vmatpush1.bf16.msra.mxu0 %v7718_v21 }
 0x413   :  { %6130 = vmatprep.subr.bf16.mxu0 %v7723_v58 }
 0x416   :  { %6131 = vmatpush1.bf16.msra.mxu0 %v7721_v60 }
 0x417   :  { %6132 = vmatprep.subr.bf16.mxu0 %v7726_v61 }
 0x41a   :  { %6133 = vmatpush1.bf16.msra.mxu0 %v7724_v43 }
 0x41b   :  { %6134 = vmatprep.subr.bf16.mxu0 %v7729_v63 }
 0x41e   :  { %6135 = vmatpush1.bf16.msra.mxu0 %v7727_v6 }
 0x41f   :  { %6136 = vmatprep.subr.bf16.mxu0 %v7732_v7 }
 0x422   :  { %6137 = vmatpush1.bf16.msra.mxu0 %v7730_v28 }
 0x423   :  { %6138 = vmatprep.subr.bf16.mxu0 %v7735_v9 }
 0x426   :  { %6139 = vmatpush1.bf16.msra.mxu0 %v7733_v11 }
 0x427   :  { %6140 = vmatprep.subr.bf16.mxu0 %v7738_v40 }
 0x42a   :  { %6141 = vmatpush1.bf16.msra.mxu0 %v7736_v3 }
 0x42b   :  { %6142 = vmatprep.subr.bf16.mxu0 %v7741_v49 }
 0x42e   :  { %6143 = vmatpush1.bf16.msra.mxu0 %v7739_v20 }
 0x42f   :  { %6144 = vmatprep.subr.bf16.mxu0 %v7744_v23 }
 0x432   :  { %6145 = vmatpush1.bf16.msra.mxu0 %v7742_v27 }
 0x433   :  { %6146 = vmatprep.subr.bf16.mxu0 %v7747_v17 }
 0x436   :  { %6147 = vmatpush1.bf16.msra.mxu0 %v7745_v1 }
 0x437   :  { %6148 = vmatprep.subr.bf16.mxu0 %v7750_v31 }
 0x43a   :  { %6149 = vmatpush1.bf16.msra.mxu0 %v7748_v41 }
 0x43b   :  { %6150 = vmatprep.subr.bf16.mxu0 %v7753_v12 }
 0x43e   :  { %6151 = vmatpush1.bf16.msra.mxu0 %v7751_v48 }
 0x43f   :  { %6161 = vmatprep.subr.bf16.mxu0 %v7756_v34 }
 0x454   :  { %v4894_v45 = vpop.f32.mrb[8].mxu0 }
 0x455   :  { %v7530_v46 = vadd.f32 %v4894_v45, %v1828_v59  ;;  %v8499_v22 = vpop.f32.mrb[16].mxu1  ;;  %v4896_v47 = vpop.f32.mrb[9].mxu0 }
 0x456   :  { %v7531_v2 = vadd.f32 %v4896_v47, %v1832_v5  ;;  %v5060_v62 = vpop.f32.mrb[17].mxu1  ;;  %v4898_v50 = vpop.f32.mrb[10].mxu0 }
 0x457   :  { %v8501_v51 = vmax.f32 %v7530_v46, 0.0  ;;  %v7533_v14 = vadd.f32 %v5060_v62, %v1840_v42  ;;  %v5062_v53 = vpop.f32.mrb[18].mxu1  ;;  %v4899_v13 = vpop.f32.mrb[11].mxu0 }
 0x458   :  { %v8503_v55 = vmax.f32 %v7531_v2, 0.0  ;;  %v5063_v26 = vpop.f32.mrb[19].mxu1 }
 0x459   :  { %v5097_v56 = vrot.slane %v8501_v51, 4  ;;  %v5133_v36 = vmul.f32 %v8501_v51, %v8501_v51  ;;  %v8508_v57 = vmax.f32 %v7533_v14, 0.0 }
 0x45a   :  { %v5103_v52 = vrot.slane %v8503_v55, 4  ;;  %v5134_v8 = vmul.f32 %v8503_v55, %v8503_v55 }
 0x45b   :  { %v5098_v33 = vadd.f32 %v5097_v56, %v8501_v51  ;;  %v5161_v16 = vrot.slane %v5133_v36, 4  ;;  %v5115_v18 = vrot.slane %v8508_v57, 4  ;;  %v5136_v19 = vmul.f32 %v8508_v57, %v8508_v57 }
 0x45c   :  { %v5104_v21 = vadd.f32 %v5103_v52, %v8503_v55  ;;  %v5167_v58 = vrot.slane %v5134_v8, 4  ;;  %v1836_v52 = vrot.slane %v8434_v15, %v281_v39  ;;  %v7759_v39 = vld [vmem:[#allocation8 + $0x314] ss:$8 sps:$4 sm:$0xff]  }
 0x45d   :  { %v5099_v60 = vrot.slane %v5098_v33, 2  ;;  %v5162_v61 = vadd.f32 %v5161_v16, %v5133_v36  ;;  %v5116_v43 = vadd.f32 %v5115_v18, %v8508_v57  ;;  %v5179_v63 = vrot.slane %v5136_v19, 4 }
 0x45e   :  { %v5105_v6 = vrot.slane %v5104_v21, 2  ;;  %v5168_v7 = vadd.f32 %v5167_v58, %v5134_v8  ;;  %v7532_v16 = vadd.f32 %v8499_v22, %v1836_v52  ;;  %v7796_v52 = vld [vmem:[#allocation8 + $0x3e0] ss:$8 sps:$4 sm:$0xff]  }
 0x45f   :  { %v5100_v28 = vadd.f32 %v5099_v60, %v5098_v33  ;;  %v5163_v9 = vrot.slane %v5162_v61, 2  ;;  %v5117_v11 = vrot.slane %v5116_v43, 2  ;;  %v5180_v40 = vadd.f32 %v5179_v63, %v5136_v19 }
 0x460   :  { %v5169_v3 = vrot.slane %v5168_v7, 2  ;;  %v5106_v49 = vadd.f32 %v5105_v6, %v5104_v21  ;;  %v7754_v6 = vld [vmem:[#allocation8 + $0x300] ss:$8 sps:$4 sm:$0xff]  }
 0x461   :  { %v5101_v20 = vrot.slane %v5100_v28, 1  ;;  %v5164_v23 = vadd.f32 %v5163_v9, %v5162_v61  ;;  %v5181_v27 = vrot.slane %v5180_v40, 2  ;;  %v5118_v17 = vadd.f32 %v5117_v11, %v5116_v43  ;;  %v7760_v11 = vld [vmem:[#allocation8 + $0x320] ss:$8 sps:$4 sm:$0xff]  }
 0x462   :  { %v5170_v1 = vadd.f32 %v5169_v3, %v5168_v7  ;;  %v5107_v31 = vrot.slane %v5106_v49, 1  ;;  %v8526_v43 = vmax.f32 %v7532_v16, 0.0 }
 0x463   :  { %v5102_v41 = vadd.f32 %v5101_v20, %v5100_v28  ;;  %v5165_v12 = vrot.slane %v5164_v23, 1  ;;  %v5182_v48 = vadd.f32 %v5181_v27, %v5180_v40  ;;  %v5119_v34 = vrot.slane %v5118_v17, 1  ;;  %v7765_v40 = vld [vmem:[#allocation8 + $0x334] ss:$8 sps:$4 sm:$0xff]   ;;  %v7763_v20 = vld [vmem:[#allocation8 + $0x330] ss:$8 sps:$4 sm:$0xff]  }
 0x464   :  { %v5171_v10 = vrot.slane %v5170_v1, 1  ;;  %v5108_v24 = vadd.f32 %v5107_v31, %v5106_v49  ;;  %v5109_v22 = vrot.slane %v8526_v43, 4  ;;  %v7771_v31 = vld [vmem:[#allocation8 + $0x354] ss:$8 sps:$4 sm:$0xff]  }
 0x465   :  { %v5125_v35 = vmul.f32 0.125, %v5102_v41  ;;  %v5166_v4 = vadd.f32 %v5165_v12, %v5164_v23  ;;  %v5183_v54 = vrot.slane %v5182_v48, 1  ;;  %v5120_v37 = vadd.f32 %v5119_v34, %v5118_v17  ;;  %v7768_v23 = vld [vmem:[#allocation8 + $0x344] ss:$8 sps:$4 sm:$0xff]  }
 0x466   :  { %v5126_v0 = vmul.f32 0.125, %v5108_v24  ;;  %v5172_v32 = vadd.f32 %v5171_v10, %v5170_v1  ;;  %v5110_v28 = vadd.f32 %v5109_v22, %v8526_v43  ;;  %v7766_v1 = vld [vmem:[#allocation8 + $0x340] ss:$8 sps:$4 sm:$0xff]   ;;  %v7774_v34 = vld [vmem:[#allocation8 + $0x364] ss:$8 sps:$4 sm:$0xff]  }
 0x467   :  { %v5189_v44 = vmul.f32 0.125, %v5166_v4  ;;  %v5197_v38 = vmul.f32 %v5125_v35, %v5125_v35  ;;  %v5128_v59 = vmul.f32 0.125, %v5120_v37  ;;  %v5184_v46 = vadd.f32 %v5183_v54, %v5182_v48  ;;  %v7769_v48 = vld [vmem:[#allocation8 + $0x350] ss:$8 sps:$4 sm:$0xff]   ;;  %v7777_v4 = vld [vmem:[#allocation8 + $0x374] ss:$8 sps:$4 sm:$0xff]  }
 0x468   :  { %v5190_v5 = vmul.f32 0.125, %v5172_v32  ;;  %v5198_v45 = vmul.f32 %v5126_v0, %v5126_v0  ;;  %v5221_v33 = vsub.f32 %v8501_v51, %v5125_v35  ;;  %v5222_v18 = vsub.f32 %v8503_v55, %v5126_v0  ;;  %v7757_v55 = vld [vmem:[#allocation8 + $0x310] ss:$8 sps:$4 sm:$0xff]   ;;  %v7772_v35 = vld [vmem:[#allocation8 + $0x360] ss:$8 sps:$4 sm:$0xff]  }
 0x469   :  { %v5205_v42 = vsub.f32 %v5189_v44, %v5197_v38  ;;  %v5200_v47 = vmul.f32 %v5128_v59, %v5128_v59  ;;  %v5192_v50 = vmul.f32 0.125, %v5184_v46  ;;  %v5224_v60 = vsub.f32 %v8508_v57, %v5128_v59  ;;  %v7762_v57 = vld [vmem:[#allocation8 + $0x324] ss:$8 sps:$4 sm:$0xff]   ;;  %v7775_v0 = vld [vmem:[#allocation8 + $0x370] ss:$8 sps:$4 sm:$0xff]  }
 0x46a   :  { %v5206_v62 = vsub.f32 %v5190_v5, %v5198_v45  ;;  %v5135_v51 = vmul.f32 %v8526_v43, %v8526_v43  ;;  %v5111_v3 = vrot.slane %v5110_v28, 2  ;;  %v7780_v32 = vld [vmem:[#allocation8 + $0x384] ss:$8 sps:$4 sm:$0xff]   ;;  %v7778_v59 = vld [vmem:[#allocation8 + $0x380] ss:$8 sps:$4 sm:$0xff]  }
 0x46b   :  { %v5213_v2 = vmax.f32 %v5205_v42, 0.0  ;;  %v5208_v13 = vsub.f32 %v5192_v50, %v5200_v47  ;;  %v7783_v5 = vld [vmem:[#allocation8 + $0x394] ss:$8 sps:$4 sm:$0xff]   ;;  %v7781_v45 = vld [vmem:[#allocation8 + $0x390] ss:$8 sps:$4 sm:$0xff]  }
 0x46c   :  { %v5214_v53 = vmax.f32 %v5206_v62, 0.0  ;;  %v5173_v9 = vrot.slane %v5135_v51, 4  ;;  %v5112_v27 = vadd.f32 %v5111_v3, %v5110_v28  ;;  %v7786_v46 = vld [vmem:[#allocation8 + $0x3a4] ss:$8 sps:$4 sm:$0xff]   ;;  %v7789_v62 = vld [vmem:[#allocation8 + $0x3b4] ss:$8 sps:$4 sm:$0xff]  }
 0x46d   :  { %v5229_v14 = vadd.f32 1e-05, %v5213_v2  ;;  %v5216_v56 = vmax.f32 %v5208_v13, 0.0  ;;  %v7784_v2 = vld [vmem:[#allocation8 + $0x3a0] ss:$8 sps:$4 sm:$0xff]  }
 0x46e   :  { %v5230_v26 = vadd.f32 1e-05, %v5214_v53  ;;  %v5174_v49 = vadd.f32 %v5173_v9, %v5135_v51  ;;  %v5113_v41 = vrot.slane %v5112_v27, 1  ;;  %v7792_v53 = vld [vmem:[#allocation8 + $0x3c4] ss:$8 sps:$4 sm:$0xff]  }
 0x46f   :  { %7890 = vrsqrt.f32 %v5229_v14  ;;  %v5232_v36 = vadd.f32 1e-05, %v5216_v56  ;;  %v7787_v14 = vld [vmem:[#allocation8 + $0x3b0] ss:$8 sps:$4 sm:$0xff]   ;;  %v7790_v13 = vld [vmem:[#allocation8 + $0x3c0] ss:$8 sps:$4 sm:$0xff]  }
 0x470   :  { %7892 = vrsqrt.f32 %v5230_v26  ;;  %v5175_v17 = vrot.slane %v5174_v49, 2  ;;  %v5114_v10 = vadd.f32 %v5113_v41, %v5112_v27  ;;  %v7795_v26 = vld [vmem:[#allocation8 + $0x3d4] ss:$8 sps:$4 sm:$0xff]   ;;  %v7793_v56 = vld [vmem:[#allocation8 + $0x3d0] ss:$8 sps:$4 sm:$0xff]   ;;  %v7850_v27 = vld [vmem:[#allocation11 + $0x40] sm:$0xff]  }
 0x471   :  { %7894 = vrsqrt.f32 %v5232_v36  ;;  %v7798_v36 = vld [vmem:[#allocation8 + $0x3e4] ss:$8 sps:$4 sm:$0xff]   ;;  %v7832_v51 = vld [vmem:[#allocation10 + $0xa0] ss:$8 sps:$4 sm:$0xff]  }
 0x472   :  { %v5176_v12 = vadd.f32 %v5175_v17, %v5174_v49  ;;  %v5127_v54 = vmul.f32 0.125, %v5114_v10  ;;  %v7834_v22 = vld [vmem:[#allocation10 + $0xa4] ss:$8 sps:$4 sm:$0xff]   ;;  %v7838_v28 = vld [vmem:[#allocation10 + $0xc0] ss:$8 sps:$4 sm:$0xff]  }
 0x473   :  { %v7840_v9 = vld [vmem:[#allocation10 + $0xc4] ss:$8 sps:$4 sm:$0xff]   ;;  %v7844_v49 = vld [vmem:[#allocation10 + $0xe0] ss:$8 sps:$4 sm:$0xff]  }
 0x474   :  { %v5177_v24 = vrot.slane %v5176_v12, 1  ;;  %v5199_v38 = vmul.f32 %v5127_v54, %v5127_v54  ;;  %v5223_v16 = vsub.f32 %v8526_v43, %v5127_v54  ;;  %v7828_v43 = vld [vmem:[#allocation10 + $0x84] ss:$8 sps:$4 sm:$0xff]   ;;  %v5386_v17 = vld [vmem:[#allocation13 + $0x2] ss:$8 sm:$0x3] }
 0x475   :  { %v7846_v3 = vld [vmem:[#allocation10 + $0xe4] ss:$8 sps:$4 sm:$0xff]  }
 0x476   :  { %v5178_v37 = vadd.f32 %v5177_v24, %v5176_v12 }
 0x478   :  { %v5191_v44 = vmul.f32 0.125, %v5178_v37 }
 0x479   :  { %v7891_v8 = vpop.eup %7890 }
 0x47a   :  { %v7893_v19 = vpop.eup %7892  ;;  %v5245_v21 = vmul.f32 %v7891_v8, %v5221_v33  ;;  %v5207_v42 = vsub.f32 %v5191_v44, %v5199_v38  ;;  %v7801_v8 = vld [vmem:[#allocation8 + $0x3f4] ss:$8 sps:$4 sm:$0xff]  }
 0x47b   :  { %v5246_v58 = vmul.f32 %v7893_v19, %v5222_v18  ;;  %v7895_v61 = vpop.eup %7894  ;;  %v7799_v18 = vld [vmem:[#allocation8 + $0x3f0] ss:$8 sps:$4 sm:$0xff]  }
 0x47c   :  { %v5248_v25 = vmul.f32 %v7895_v61, %v5224_v60  ;;  %v5253_v7 = vpack.c.bf16 %v5245_v21, %v5245_v21  ;;  %v5215_v47 = vmax.f32 %v5207_v42, 0.0  ;;  %v7817_v60 = vld [vmem:[#allocation10 + $0x50] ss:$8 sps:$4 sm:$0xff]   ;;  %v7822_v61 = vld [vmem:[#allocation10 + $0x64] ss:$8 sps:$4 sm:$0xff]  }
 0x47d   :  { %v5254_v63 = vpack.c.bf16 %v5246_v58, %v5246_v58  ;;  %v7819_v58 = vld [vmem:[#allocation10 + $0x54] ss:$8 sps:$4 sm:$0xff]  }
 0x47e   :  { %v5256_v15 = vpack.c.bf16 %v5248_v25, %v5248_v25  ;;  %v5231_v50 = vadd.f32 1e-05, %v5215_v47  ;;  %6465 = vmatprep.subr.bf16.mxu1 %v7819_v58  ;;  %v7823_v25 = vld [vmem:[#allocation10 + $0x70] ss:$8 sps:$4 sm:$0xff]  }
 0x47f   :  { %6152 = vmatprep.mubr.bf16.mxu0 %v5254_v63  ;;  %6466 = vmatpush1.bf16.msra.mxu1 %v7817_v60  ;;  %v7820_v63 = vld [vmem:[#allocation10 + $0x60] ss:$8 sps:$4 sm:$0xff]  }
 0x480   :  { %6153 = vmatmul.mubr.bf16.vlgmr.msra.gmra.mrb[12].mxu0 %v5253_v7  ;;  %7896 = vrsqrt.f32 %v5231_v50  ;;  %6467 = vmatprep.subr.bf16.mxu1 %v7822_v61  ;;  %v7826_v7 = vld [vmem:[#allocation10 + $0x80] ss:$8 sps:$4 sm:$0xff]  }
 0x481   :  { %6162 = vmatpush1.bf16.msra.mxu0 %v7754_v6  ;;  %6193 = vmatprep.mubr.bf16.mxu0 %v5256_v15  ;;  %v7825_v6 = vld [vmem:[#allocation10 + $0x74] ss:$8 sps:$4 sm:$0xff]   ;;  %v7829_v15 = vld [vmem:[#allocation10 + $0x90] ss:$8 sps:$4 sm:$0xff]  }
 0x482   :  { %6163 = vmatprep.subr.bf16.mxu0 %v7759_v39  ;;  %v7831_v39 = vld [vmem:[#allocation10 + $0x94] ss:$8 sps:$4 sm:$0xff]  }
 0x483   :  { %6468 = vmatpush1.bf16.msra.mxu1 %v7820_v63 }
 0x484   :  { %6469 = vmatprep.subr.bf16.mxu1 %v7825_v6 }
 0x485   :  { %6164 = vmatpush1.bf16.msra.mxu0 %v7757_v55  ;;  %v7837_v55 = vld [vmem:[#allocation10 + $0xb4] ss:$8 sps:$4 sm:$0xff]  }
 0x486   :  { %6165 = vmatprep.subr.bf16.mxu0 %v7762_v57  ;;  %v7835_v57 = vld [vmem:[#allocation10 + $0xb0] ss:$8 sps:$4 sm:$0xff]  }
 0x487   :  { %6470 = vmatpush1.bf16.msra.mxu1 %v7823_v25 }
 0x488   :  { %6471 = vmatprep.subr.bf16.mxu1 %v7828_v43 }
 0x489   :  { %6166 = vmatpush1.bf16.msra.mxu0 %v7760_v11  ;;  %v7843_v11 = vld [vmem:[#allocation10 + $0xd4] ss:$8 sps:$4 sm:$0xff]  }
 0x48a   :  { %6167 = vmatprep.subr.bf16.mxu0 %v7765_v40  ;;  %v7897_v33 = vpop.eup %7896  ;;  %v7841_v40 = vld [vmem:[#allocation10 + $0xd0] ss:$8 sps:$4 sm:$0xff]  }
 0x48b   :  { %v5247_v19 = vmul.f32 %v7897_v33, %v5223_v16  ;;  %6472 = vmatpush1.bf16.msra.mxu1 %v7826_v7 }
 0x48c   :  { %6473 = vmatprep.subr.bf16.mxu1 %v7831_v39 }
 0x48d   :  { %6168 = vmatpush1.bf16.msra.mxu0 %v7763_v20  ;;  %v5255_v21 = vpack.c.bf16 %v5247_v19, %v5247_v19  ;;  %v7849_v20 = vld [vmem:[#allocation10 + $0xf4] ss:$8 sps:$4 sm:$0xff]  }
 0x48e   :  { %6169 = vmatprep.subr.bf16.mxu0 %v7768_v23  ;;  %v7847_v23 = vld [vmem:[#allocation10 + $0xf0] ss:$8 sps:$4 sm:$0xff]  }
 0x48f   :  { %6474 = vmatpush1.bf16.msra.mxu1 %v7829_v15 }
 0x490   :  { %6475 = vmatprep.subr.bf16.mxu1 %v7834_v22 }
 0x491   :  { %6170 = vmatpush1.bf16.msra.mxu0 %v7766_v1  ;;  %v5391_v1 = vrot.slane %v5386_v17, %v8271_v29 }
 0x492   :  { %6171 = vmatprep.subr.bf16.mxu0 %v7771_v31  ;;  %v5395_v31 = vrot.slane %v5386_v17, %v8274_v30  ;;  %v7856_v17 = vld [vmem:[#allocation11 + $0x58] sm:$0xff]  }
 0x493   :  { %6476 = vmatpush1.bf16.msra.mxu1 %v7832_v51 }
 0x494   :  { %6477 = vmatprep.subr.bf16.mxu1 %v7837_v55 }
 0x495   :  { %6172 = vmatpush1.bf16.msra.mxu0 %v7769_v48 }
 0x496   :  { %6173 = vmatprep.subr.bf16.mxu0 %v7774_v34 }
 0x497   :  { %6478 = vmatpush1.bf16.msra.mxu1 %v7835_v57 }
 0x498   :  { %6479 = vmatprep.subr.bf16.mxu1 %v7840_v9 }
 0x499   :  { %6174 = vmatpush1.bf16.msra.mxu0 %v7772_v35 }
 0x49a   :  { %6175 = vmatprep.subr.bf16.mxu0 %v7777_v4 }
 0x49b   :  { %6480 = vmatpush1.bf16.msra.mxu1 %v7838_v28 }
 0x49c   :  { %6481 = vmatprep.subr.bf16.mxu1 %v7843_v11 }
 0x49d   :  { %6176 = vmatpush1.bf16.msra.mxu0 %v7775_v0 }
 0x49e   :  { %6177 = vmatprep.subr.bf16.mxu0 %v7780_v32 }
 0x49f   :  { %6482 = vmatpush1.bf16.msra.mxu1 %v7841_v40  ;;  %v7851_v40 = vld [vmem:[#allocation11] sm:$0xff]  }
 0x4a0   :  { %6483 = vmatprep.subr.bf16.mxu1 %v7846_v3 }
 0x4a1   :  { %6178 = vmatpush1.bf16.msra.mxu0 %v7778_v59 }
 0x4a2   :  { %6179 = vmatprep.subr.bf16.mxu0 %v7783_v5 }
 0x4a3   :  { %6484 = vmatpush1.bf16.msra.mxu1 %v7844_v49  ;;  %v7852_v49 = vld [vmem:[#allocation11 + $0x48] sm:$0xff]  }
 0x4a4   :  { %6485 = vmatprep.subr.bf16.mxu1 %v7849_v20  ;;  %v7853_v20 = vld [vmem:[#allocation11 + $0x8] sm:$0xff]  }
 0x4a5   :  { %6180 = vmatpush1.bf16.msra.mxu0 %v7781_v45 }
 0x4a6   :  { %6181 = vmatprep.subr.bf16.mxu0 %v7786_v46 }
 0x4a7   :  { %6486 = vmatpush1.bf16.msra.mxu1 %v7847_v23  ;;  %v7854_v23 = vld [vmem:[#allocation11 + $0x50] sm:$0xff]  }
 0x4a8   :  { %7504 = vmatprep.subr.bf16.mxu1 %v7850_v27  ;;  %v7855_v27 = vld [vmem:[#allocation11 + $0x10] sm:$0xff]  }
 0x4a9   :  { %6182 = vmatpush1.bf16.msra.mxu0 %v7784_v2 }
 0x4aa   :  { %6183 = vmatprep.subr.bf16.mxu0 %v7789_v62 }
 0x4ad   :  { %6184 = vmatpush1.bf16.msra.mxu0 %v7787_v14 }
 0x4ae   :  { %6185 = vmatprep.subr.bf16.mxu0 %v7792_v53 }
 0x4b1   :  { %6186 = vmatpush1.bf16.msra.mxu0 %v7790_v13 }
 0x4b2   :  { %6187 = vmatprep.subr.bf16.mxu0 %v7795_v26 }
 0x4b5   :  { %6188 = vmatpush1.bf16.msra.mxu0 %v7793_v56 }
 0x4b6   :  { %6189 = vmatprep.subr.bf16.mxu0 %v7798_v36 }
 0x4b9   :  { %6190 = vmatpush1.bf16.msra.mxu0 %v7796_v52 }
 0x4ba   :  { %6191 = vmatprep.subr.bf16.mxu0 %v7801_v8 }
 0x4bd   :  { %6192 = vmatpush1.bf16.msra.mxu0 %v7799_v18 }
 0x4c0   :  { %6194 = vmatmul.mubr.bf16.vlgmr.msra.gmra.mrb[12].mxu0 %v5255_v21 }
 0x593   :  { %v6195_v41 = vpop.f32.mrb[12].mxu0 }
 0x594   :  { %v7534_v12 = vadd.f32 %v6195_v41, %v5391_v1  ;;  %v6197_v48 = vpop.f32.mrb[13].mxu0  ;;  %v7857_v1 = vld [vmem:[#allocation11 + $0x18] sm:$0xff]   ;;  %v7859_v41 = vld [vmem:[#allocation11 + $0x20] sm:$0xff]  }
 0x595   :  { %v7535_v34 = vadd.f32 %v6197_v48, %v5395_v31  ;;  %v6199_v10 = vpop.f32.mrb[14].mxu0  ;;  %v7858_v31 = vld [vmem:[#allocation11 + $0x60] sm:$0xff]   ;;  %v7861_v48 = vld [vmem:[#allocation11 + $0x28] sm:$0xff]  }
 0x596   :  { %v6202_v24 = vmax.f32 %v7534_v12, 0.0  ;;  %v6200_v35 = vpop.f32.mrb[15].mxu0  ;;  %v7860_v12 = vld [vmem:[#allocation11 + $0x68] sm:$0xff]   ;;  %v7863_v10 = vld [vmem:[#allocation11 + $0x30] sm:$0xff]  }
 0x597   :  { %v6203_v4 = vmax.f32 %v7535_v34, 0.0  ;;  %v7862_v34 = vld [vmem:[#allocation11 + $0x70] sm:$0xff]   ;;  %v7865_v35 = vld [vmem:[#allocation11 + $0x38] sm:$0xff]  }
 0x598   :  { %v6204_v54 = vrot.slane %v6202_v24, 4  ;;  %v6218_v37 = vmul.f32 %v6202_v24, %v6202_v24 }
 0x599   :  { %v6210_v0 = vrot.slane %v6203_v4, 4  ;;  %v6219_v32 = vmul.f32 %v6203_v4, %v6203_v4 }
 0x59a   :  { %v6205_v44 = vadd.f32 %v6204_v54, %v6202_v24  ;;  %v6220_v38 = vrot.slane %v6218_v37, 4 }
 0x59b   :  { %v6211_v59 = vadd.f32 %v6210_v0, %v6203_v4  ;;  %v6226_v5 = vrot.slane %v6219_v32, 4 }
 0x59c   :  { %v6206_v42 = vrot.slane %v6205_v44, 2  ;;  %v6221_v45 = vadd.f32 %v6220_v38, %v6218_v37 }
 0x59d   :  { %v6212_v46 = vrot.slane %v6211_v59, 2  ;;  %v6227_v47 = vadd.f32 %v6226_v5, %v6219_v32 }
 0x59e   :  { %v6207_v2 = vadd.f32 %v6206_v42, %v6205_v44  ;;  %v6222_v62 = vrot.slane %v6221_v45, 2 }
 0x59f   :  { %v6228_v50 = vrot.slane %v6227_v47, 2  ;;  %v6213_v14 = vadd.f32 %v6212_v46, %v6211_v59 }
 0x5a0   :  { %v6208_v53 = vrot.slane %v6207_v2, 1  ;;  %v6223_v13 = vadd.f32 %v6222_v62, %v6221_v45  ;;  %v6532_v62 = vld [vmem:[#allocation13 + $0x4] ss:$0 sm:$0xff] }
 0x5a1   :  { %v6229_v26 = vadd.f32 %v6228_v50, %v6227_v47  ;;  %v6214_v56 = vrot.slane %v6213_v14, 1 }
 0x5a2   :  { %v6209_v36 = vadd.f32 %v6208_v53, %v6207_v2  ;;  %v6224_v52 = vrot.slane %v6223_v13, 1 }
 0x5a3   :  { %v6230_v8 = vrot.slane %v6229_v26, 1  ;;  %v6215_v33 = vadd.f32 %v6214_v56, %v6213_v14 }
 0x5a4   :  { %v6216_v16 = vmul.f32 0.125, %v6209_v36  ;;  %v6225_v18 = vadd.f32 %v6224_v52, %v6223_v13 }
 0x5a5   :  { %v6217_v19 = vmul.f32 0.125, %v6215_v33  ;;  %v6231_v21 = vadd.f32 %v6230_v8, %v6229_v26 }
 0x5a6   :  { %v6232_v58 = vmul.f32 0.125, %v6225_v18  ;;  %v6234_v60 = vmul.f32 %v6216_v16, %v6216_v16  ;;  %v6240_v22 = vsub.f32 %v6202_v24, %v6216_v16  ;;  %v7864_v24 = vld [vmem:[#allocation11 + $0x78] sm:$0xff]  }
 0x5a7   :  { %v6233_v61 = vmul.f32 0.125, %v6231_v21  ;;  %v6235_v63 = vmul.f32 %v6217_v19, %v6217_v19  ;;  %v6241_v55 = vsub.f32 %v6203_v4, %v6217_v19  ;;  %v6283_v4 = vld [vmem:[#allocation13 + $0x3] ss:$8 sm:$0x3] }
 0x5a8   :  { %v6236_v6 = vsub.f32 %v6232_v58, %v6234_v60  ;;  %v6288_v54 = vrot.slane %v6283_v4, %v8271_v29  ;;  %v6292_v37 = vrot.slane %v6283_v4, %v8274_v30 }
 0x5a9   :  { %v6237_v25 = vsub.f32 %v6233_v61, %v6235_v63 }
 0x5aa   :  { %v6238_v43 = vmax.f32 %v6236_v6, 0.0 }
 0x5ab   :  { %v6239_v7 = vmax.f32 %v6237_v25, 0.0 }
 0x5ac   :  { %v6242_v39 = vadd.f32 1e-05, %v6238_v43 }
 0x5ad   :  { %v6243_v15 = vadd.f32 1e-05, %v6239_v7 }
 0x5ae   :  { %7898 = vrsqrt.f32 %v6242_v39 }
 0x5af   :  { %7900 = vrsqrt.f32 %v6243_v15 }
 0x5b8   :  { %v7899_v51 = vpop.eup %7898 }
 0x5b9   :  { %v7901_v57 = vpop.eup %7900  ;;  %v6246_v28 = vmul.f32 %v7899_v51, %v6240_v22 }
 0x5ba   :  { %v6247_v9 = vmul.f32 %v7901_v57, %v6241_v55 }
 0x5bb   :  { %v6248_v3 = vpack.c.bf16 %v6246_v28, %v6246_v28 }
 0x5bc   :  { %v6249_v11 = vpack.c.bf16 %v6247_v9, %v6247_v9 }
 0x5be   :  { %6487 = vmatprep.mubr.bf16.mxu1 %v6249_v11 }
 0x5bf   :  { %6488 = vmatmul.mubr.bf16.vlgmr.msra.gmra.mrb[20].mxu1 %v6248_v3 }
 0x5c0   :  { %7505 = vmatpush3.bf16.msra.mxu1 %v7851_v40 }
 0x5c1   :  { %7506 = vmatprep.subr.bf16.mxu1 %v7852_v49 }
 0x5c4   :  { %7507 = vmatpush3.bf16.msra.mxu1 %v7853_v20 }
 0x5c5   :  { %7508 = vmatprep.subr.bf16.mxu1 %v7854_v23 }
 0x5c8   :  { %7509 = vmatpush3.bf16.msra.mxu1 %v7855_v27 }
 0x5c9   :  { %7510 = vmatprep.subr.bf16.mxu1 %v7856_v17 }
 0x5cc   :  { %7511 = vmatpush3.bf16.msra.mxu1 %v7857_v1 }
 0x5cd   :  { %7512 = vmatprep.subr.bf16.mxu1 %v7858_v31 }
 0x5d0   :  { %7513 = vmatpush3.bf16.msra.mxu1 %v7859_v41 }
 0x5d1   :  { %7514 = vmatprep.subr.bf16.mxu1 %v7860_v12 }
 0x5d4   :  { %7515 = vmatpush3.bf16.msra.mxu1 %v7861_v48 }
 0x5d5   :  { %7516 = vmatprep.subr.bf16.mxu1 %v7862_v34 }
 0x5d8   :  { %7517 = vmatpush3.bf16.msra.mxu1 %v7863_v10 }
 0x5d9   :  { %7518 = vmatprep.subr.bf16.mxu1 %v7864_v24 }
 0x5dc   :  { %7519 = vmatpush3.bf16.msra.mxu1 %v7865_v35 }
 0x692   :  { %v6489_v0 = vpop.f32.mrb[20].mxu1 }
 0x693   :  { %v6490_v32 = vadd.f32 %v6489_v0, %v6288_v54  ;;  %v6491_v44 = vpop.f32.mrb[21].mxu1 }
 0x694   :  { %v6492_v38 = vadd.f32 %v6491_v44, %v6292_v37  ;;  %v6493_v59 = vpop.f32.mrb[22].mxu1 }
 0x695   :  { %v6496_v5 = vmax.f32 %v6490_v32, 0.0  ;;  %v6494_v42 = vpop.f32.mrb[23].mxu1 }
 0x696   :  { %v6497_v45 = vmax.f32 %v6492_v38, 0.0 }
 0x697   :  { %v6498_v47 = vpack.c.bf16 %v6496_v5, %v6496_v5 }
 0x698   :  { %v6499_v46 = vpack.c.bf16 %v6497_v45, %v6497_v45 }
 0x69a   :  { %6661 = vmatprep.mubr.bf16.mxu1 %v6499_v46 }
 0x69b   :  { %6662 = vmatmul.mubr.bf16.vlgmr.msra.gmra.mrb[24].mxu1 %v6498_v47 }
 0x76e   :  { %v7520_v2 = vpop.f32.mrb[24].mxu1 }
 0x76f   :  { %v7521_v50 = vpop.f32.mrb[25].mxu1 }
 0x770   :  { %v7522_v29 = vadd.f32 %v7521_v50, %v7520_v2  ;;  %v7523_v14 = vpop.f32.mrb[26].mxu1 }
 0x771   :  { %v7524_v30 = vpop.f32.mrb[27].mxu1 }
 0x772   :  { %v6664_v53 = vadd.f32 %v7522_v29, %v6532_v62 }
 0x774   :  { %6669 = vst [vmem:[#allocation14] sm:$0xff] %v6664_v53 }
 0x775   :  { %8067 = shalt.err (!%p8064_p4)
}
 0x776   :  { %s8068_s20 = scalar_lea.hbm %s8556_s7, 128 }
 0x777   :  { %p8069_p5 = scmp.ne.s32.totalorder %s8556_s7, %s8068_s20  ;;  %p8072_p6 = scmp.lt.u32.totalorder %s8068_s20, %s8556_s7 }
 0x779   :  { %p8074_p7 = pnand %p8072_p6, %p8069_p5 }
 0x77b   :  { %8077 = shalt.err (!%p8074_p7)
}
 0x77c   :  { %6679 = dma.vmem_to_hbm [thread:$0]  %s6677_s25, 128, %s8556_s7, [#allocation4]  }
 0x77d   :  { %8086 = dma.done.wait [#allocation4], 128  }
 0x77e   :  { %8087 = vsyncadd [#allocation4], 4294967168 }
 0x77f   :  { %6683 = vsyncpa [#allocation3], 1 }
 0x780   :  { %6684 = vsyncpa [#allocation6], 1 }
 0x781   :  { %6685 = vsyncpa [#allocation9], 1 }
 0x782   :  { %6686 = vsyncpa [#allocation12], 1 }
 0x783   :  { %6687 = vsyncpa [#allocation4], 1 }

</bundles_post_ra>
